<compile_context>
chip_gen: v6e
topology: v6e:2x2x1
jax: 0.10.0
libtpu: 0.0.40
codegen_flags: <defaults>
</compile_context>

<pallas_src>
import functools

import jax
import jax.numpy as jnp
from jax.experimental import pallas as pl
from jax.experimental.pallas import tpu as pltpu


def _round_up(v, m):
    return ((v + m - 1) // m) * m


# ---------------------------------------------------------------------------
# Kernel 1: fused conv (in-kernel patch extraction) + per-tile BN partials
# ---------------------------------------------------------------------------
def _conv_stats_kernel(x_ref, w_ref, y_ref, stats_ref, *, KH, KW, TOH, OW, Cin, Coutp):
    # x_ref:     (Hp, Wp, Cin)        bf16  whole padded image of batch n (block index constant
    #                                       across the row-tile axis -> DMA'd once per image).
    # w_ref:     (KH*KW, Cin, Coutp)  bf16  weights, Cout zero-padded to lane-dense Coutp.
    # y_ref:     (TOH*OW, Coutp)      bf16  conv output rows of this tile, flat NHWC order.
    # stats_ref: (8, Coutp)           f32   row0 = per-channel sum, row1 = per-channel sumsq.
    t = pl.program_id(1)
    row0 = t * TOH                                   # first output row of this tile (stride == 1)

    # Accumulate the KH*KW shifted pointwise matmuls in a local f32 value (single store below).
    acc = jnp.zeros((TOH * OW, Coutp), jnp.float32)
    for kh in range(KH):
        xr = x_ref[pl.ds(row0 + kh, TOH), :, :]              # (TOH, Wp, Cin); loaded once per kh
        for kw in range(KW):
            xs = xr[:, kw:kw + OW, :]                        # (TOH, OW, Cin) shifted window
            a = xs.reshape(TOH * OW, Cin)                    # pure re-tiling of sublanes
            acc = acc + jnp.dot(a, w_ref[kh * KW + kw],
                                preferred_element_type=jnp.float32)

    # Single lane-dense bf16 store of the conv activation tile.
    y_ref[...] = acc.astype(y_ref.dtype)

    # Per-tile BN partial statistics in f32 from the exact accumulator (finalized outside;
    # M has no padded rows -> exact batch statistics).
    s = jnp.sum(acc, axis=0, keepdims=True)                  # (1, Coutp)
    ss = jnp.sum(acc * acc, axis=0, keepdims=True)           # (1, Coutp)
    rid = jax.lax.broadcasted_iota(jnp.int32, (8, Coutp), 0)
    stats_ref[...] = jnp.where(rid == 0, s, 0.0) + jnp.where(rid == 1, ss, 0.0)


# ---------------------------------------------------------------------------
# Kernel 2: per-channel scale/shift (BN-apply or bias) + ReLU on the flat NHWC slab
# ---------------------------------------------------------------------------
def _scale_shift_act_kernel(y_ref, scale_ref, shift_ref, o_ref, *, relu):
    y = y_ref[...].astype(jnp.float32) * scale_ref[...] + shift_ref[...]
    if relu:
        y = jnp.maximum(y, 0.0)
    o_ref[...] = y


# ---------------------------------------------------------------------------
# BasicConv forward
# ---------------------------------------------------------------------------
def basic_conv_forward(x_nchw, params, *, stride=1, padding=0, relu=True, bn=True, eps=1e-5):
    N, Cin, H, W = x_nchw.shape
    w_oihw = params["w"]
    Cout, cin_w, KH, KW = w_oihw.shape
    assert cin_w == Cin, "groups != 1 not supported"
    assert stride == 1, "see TODO(synk) above: only stride=1 implemented"

    Hp, Wp = H + 2 * padding, W + 2 * padding
    OH, OW = Hp - KH + 1, Wp - KW + 1
    M = N * OH * OW
    Coutp = _round_up(Cout, 128)            # lane-dense output channels (no masked stores)

    # Row tile: TOH output rows x OW columns; grow toward ~2k rows/tile while dividing OH.
    TOH = OH
    while TOH * OW > 2048 and TOH % 2 == 0:
        TOH //= 2
    n_oh_tiles = OH // TOH
    TM = TOH * OW
    assert TM % 8 == 0 or TM == M, "row tile must be sublane-aligned"
    G = N * n_oh_tiles                      # total number of conv row tiles / grid steps

    # ---- cheap layout glue (all O(input)-sized; no im2col materialization) ----
    xp = jnp.transpose(x_nchw, (0, 2, 3, 1))                                     # NHWC
    xp = jnp.pad(xp, ((0, 0), (padding, padding), (padding, padding), (0, 0)))
    xp = xp.reshape(N * Hp, Wp, Cin).astype(jnp.bfloat16)                        # bf16 MXU operand

    wk = jnp.transpose(w_oihw, (2, 3, 1, 0)).reshape(KH * KW, Cin, Cout)
    wk = jnp.pad(wk, ((0, 0), (0, 0), (0, Coutp - Cout))).astype(jnp.bfloat16)

    conv_kernel = functools.partial(_conv_stats_kernel, KH=KH, KW=KW, TOH=TOH,
                                    OW=OW, Cin=Cin, Coutp=Coutp)
    y_slab, stats = pl.pallas_call(
        conv_kernel,
        out_shape=(jax.ShapeDtypeStruct((M, Coutp), jnp.bfloat16),   # bf16 intermediate slab
                   jax.ShapeDtypeStruct((G * 8, Coutp), jnp.float32)),
        grid_spec=pltpu.PrefetchScalarGridSpec(
            num_scalar_prefetch=0,
            grid=(N, n_oh_tiles),
            in_specs=[
                pl.BlockSpec((Hp, Wp, Cin), lambda n, t: (n, 0, 0)),
                pl.BlockSpec((KH * KW, Cin, Coutp), lambda n, t: (0, 0, 0)),
            ],
            out_specs=(
                pl.BlockSpec((TM, Coutp), lambda n, t: (n * n_oh_tiles + t, 0)),
                pl.BlockSpec((8, Coutp), lambda n, t: (n * n_oh_tiles + t, 0)),
            ),
        ),
        compiler_params=pltpu.CompilerParams(
            dimension_semantics=("parallel", "parallel"),   # shards row tiles across TCs on v7x
            vmem_limit_bytes=32 * 1024 * 1024,              # safe across v5e/v6e/v7x scoped VMEM
        ),
    )(xp, wk)

    # ---- trivial per-channel finalize (O(Cout) work in plain JAX) ----
    bias = params.get("b")
    if bn:
        p = stats.reshape(G, 8, Coutp)
        ssum = jnp.sum(p[:, 0, :], axis=0)
        ssq = jnp.sum(p[:, 1, :], axis=0)
        cnt = jnp.float32(M)
        mean = ssum / cnt
        # Single-pass sumsq variance in f32; biased var == PyTorch BN forward normalization.
        var = jnp.maximum(ssq / cnt - mean * mean, 0.0)
        inv = jax.lax.rsqrt(var + eps)
        gamma = jnp.pad(params["gamma"].astype(jnp.float32), (0, Coutp - Cout))
        beta = jnp.pad(params["beta"].astype(jnp.float32), (0, Coutp - Cout))
        scale = gamma * inv
        shift = beta - mean * scale
        # Conv bias intentionally omitted under BN: batch-mean subtraction cancels it exactly.
    else:
        scale = jnp.ones((Coutp,), jnp.float32)
        shift = (jnp.pad(bias.astype(jnp.float32), (0, Coutp - Cout))
                 if bias is not None else jnp.zeros((Coutp,), jnp.float32))

    apply_kernel = functools.partial(_scale_shift_act_kernel, relu=relu)
    out_slab = pl.pallas_call(
        apply_kernel,
        out_shape=jax.ShapeDtypeStruct((M, Coutp), jnp.float32),
        grid_spec=pltpu.PrefetchScalarGridSpec(
            num_scalar_prefetch=0,
            grid=(G,),
            in_specs=[
                pl.BlockSpec((TM, Coutp), lambda i: (i, 0)),
                pl.BlockSpec((1, Coutp), lambda i: (0, 0)),
                pl.BlockSpec((1, Coutp), lambda i: (0, 0)),
            ],
            out_specs=pl.BlockSpec((TM, Coutp), lambda i: (i, 0)),
        ),
        compiler_params=pltpu.CompilerParams(
            dimension_semantics=("parallel",),
            vmem_limit_bytes=32 * 1024 * 1024,
        ),
    )(y_slab, scale.reshape(1, Coutp), shift.reshape(1, Coutp))

    out = out_slab[:, :Cout].reshape(N, OH, OW, Cout)        # flat NHWC -> NHWC
    return jnp.transpose(out, (0, 3, 1, 2))                  # single NHWC -> NCHW transpose


# ---------------------------------------------------------------------------
# Reference (pure JAX, f32) for a sanity check
# ---------------------------------------------------------------------------
def _reference(x, params, stride, padding, relu=True, bn=True):
    y = jax.lax.conv_general_dilated(
        x, params["w"], window_strides=(stride, stride),
        padding=[(padding, padding), (padding, padding)],
        dimension_numbers=("NCHW", "OIHW", "NCHW"))
    if params.get("b") is not None:
        y = y + params["b"].reshape(1, -1, 1, 1)
    if bn:
        mean = jnp.mean(y, axis=(0, 2, 3), keepdims=True)
        var = jnp.mean((y - mean) ** 2, axis=(0, 2, 3), keepdims=True)
        y = (y - mean) * jax.lax.rsqrt(var + 1e-5)
        y = y * params["gamma"].reshape(1, -1, 1, 1) + params["beta"].reshape(1, -1, 1, 1)
    if relu:
        y = jnp.maximum(y, 0.0)
    return y


if __name__ == "__main__":
    # BasicConv(in_planes=4, out_planes=8, kernel_size=3, stride=1, padding=1)
    N, Cin, H, W = 2, 4, 16, 16
    Cout, KH, KW = 8, 3, 3
    stride, padding = 1, 1

    key = jax.random.PRNGKey(0)
    kx, kwt, kb, kg, kbt = jax.random.split(key, 5)
    x = jax.random.normal(kx, (N, Cin, H, W), dtype=jnp.float32)
    params = {
        "w": jax.random.normal(kwt, (Cout, Cin, KH, KW), dtype=jnp.float32) * 0.1,
        "b": jax.random.normal(kb, (Cout,), dtype=jnp.float32) * 0.1,
        "gamma": 1.0 + 0.1 * jax.random.normal(kg, (Cout,), dtype=jnp.float32),
        "beta": 0.1 * jax.random.normal(kbt, (Cout,), dtype=jnp.float32),
    }

    out = basic_conv_forward(x, params, stride=stride, padding=padding)
    out = jax.block_until_ready(out)

    ref = jax.block_until_ready(_reference(x, params, stride, padding))
    assert out.shape == (N, Cout, H, W), out.shape
    max_err = float(jnp.max(jnp.abs(out - ref)))
    # Tolerance reflects bf16 MXU operands AND the bf16 intermediate activation slab;
    # the reference path is pure f32, and BN statistics here are computed in exact f32.
    assert jnp.allclose(out, ref, atol=5e-2, rtol=5e-2), max_err

    print("KERNEL_OK")
</pallas_src>

<mosaic_0001>
module attributes {stable_mosaic.version = 11 : i64} {
  func.func @_conv_stats_kernel(%arg0: i32, %arg1: i32, %arg2: memref<18x18x4xbf16, #tpu.memory_space<vmem>>, %arg3: memref<9x4x128xbf16, #tpu.memory_space<vmem>>, %arg4: memref<256x128xbf16, #tpu.memory_space<vmem>>, %arg5: memref<8x128xf32, #tpu.memory_space<vmem>>) attributes {dimension_semantics = [#tpu.dimension_semantics<parallel>, #tpu.dimension_semantics<parallel>], iteration_bounds = array<i64: 2, 1>, scalar_prefetch = 0 : i64, scratch_operands = 0 : i64, tpu.core_type = #tpu.core_type<tc>, window_params = [{transform_indices = @transform_0, window_bounds = array<i64: 18, 18, 4>}, {pipeline_mode = #tpu.pipeline_mode<synchronous>, transform_indices = @transform_1, window_bounds = array<i64: 9, 4, 128>}, {transform_indices = @transform_2, window_bounds = array<i64: 256, 128>}, {transform_indices = @transform_3, window_bounds = array<i64: 8, 128>}]} {
    %c16_i32 = arith.constant 16 : i32
    %0 = arith.muli %arg1, %c16_i32 : i32
    %cst = arith.constant 0.000000e+00 : f32
    %1 = vector.broadcast %cst : f32 to vector<256x128xf32>
    %c0_i32 = arith.constant 0 : i32
    %2 = arith.addi %0, %c0_i32 : i32
    %3 = arith.index_cast %2 : i32 to index
    %c0 = arith.constant 0 : index
    %c0_0 = arith.constant 0 : index
    %4 = vector.load %arg2[%3, %c0, %c0_0] : memref<18x18x4xbf16, #tpu.memory_space<vmem>>, vector<16x18x4xbf16>
    %5 = vector.extract_strided_slice %4 {offsets = [0, 0, 0], sizes = [16, 16, 4], strides = [1, 1, 1]} : vector<16x18x4xbf16> to vector<16x16x4xbf16>
    %6 = vector.shape_cast %5 : vector<16x16x4xbf16> to vector<256x4xbf16>
    %c0_1 = arith.constant 0 : index
    %c0_2 = arith.constant 0 : index
    %c0_3 = arith.constant 0 : index
    %7 = vector.load %arg3[%c0_1, %c0_2, %c0_3] : memref<9x4x128xbf16, #tpu.memory_space<vmem>>, vector<1x4x128xbf16>
    %8 = vector.shape_cast %7 : vector<1x4x128xbf16> to vector<4x128xbf16>
    %cst_4 = arith.constant dense<0.000000e+00> : vector<256x128xf32>
    %9 = tpu.matmul %6, %8, %cst_4 {dimension_numbers = #tpu.dot_dimension_numbers<[1], [0], [0], [1], [0, 0, 1, 1], [], []>} : vector<256x4xbf16>, vector<4x128xbf16>, vector<256x128xf32> -> vector<256x128xf32>
    %10 = arith.addf %1, %9 : vector<256x128xf32>
    %11 = vector.extract_strided_slice %4 {offsets = [0, 1, 0], sizes = [16, 16, 4], strides = [1, 1, 1]} : vector<16x18x4xbf16> to vector<16x16x4xbf16>
    %12 = vector.shape_cast %11 : vector<16x16x4xbf16> to vector<256x4xbf16>
    %c1 = arith.constant 1 : index
    %c0_5 = arith.constant 0 : index
    %c0_6 = arith.constant 0 : index
    %13 = vector.load %arg3[%c1, %c0_5, %c0_6] : memref<9x4x128xbf16, #tpu.memory_space<vmem>>, vector<1x4x128xbf16>
    %14 = vector.shape_cast %13 : vector<1x4x128xbf16> to vector<4x128xbf16>
    %cst_7 = arith.constant dense<0.000000e+00> : vector<256x128xf32>
    %15 = tpu.matmul %12, %14, %cst_7 {dimension_numbers = #tpu.dot_dimension_numbers<[1], [0], [0], [1], [0, 0, 1, 1], [], []>} : vector<256x4xbf16>, vector<4x128xbf16>, vector<256x128xf32> -> vector<256x128xf32>
    %16 = arith.addf %10, %15 : vector<256x128xf32>
    %17 = vector.extract_strided_slice %4 {offsets = [0, 2, 0], sizes = [16, 16, 4], strides = [1, 1, 1]} : vector<16x18x4xbf16> to vector<16x16x4xbf16>
    %18 = vector.shape_cast %17 : vector<16x16x4xbf16> to vector<256x4xbf16>
    %c2 = arith.constant 2 : index
    %c0_8 = arith.constant 0 : index
    %c0_9 = arith.constant 0 : index
    %19 = vector.load %arg3[%c2, %c0_8, %c0_9] : memref<9x4x128xbf16, #tpu.memory_space<vmem>>, vector<1x4x128xbf16>
    %20 = vector.shape_cast %19 : vector<1x4x128xbf16> to vector<4x128xbf16>
    %cst_10 = arith.constant dense<0.000000e+00> : vector<256x128xf32>
    %21 = tpu.matmul %18, %20, %cst_10 {dimension_numbers = #tpu.dot_dimension_numbers<[1], [0], [0], [1], [0, 0, 1, 1], [], []>} : vector<256x4xbf16>, vector<4x128xbf16>, vector<256x128xf32> -> vector<256x128xf32>
    %22 = arith.addf %16, %21 : vector<256x128xf32>
    %c1_i32 = arith.constant 1 : i32
    %23 = arith.addi %0, %c1_i32 : i32
    %24 = arith.index_cast %23 : i32 to index
    %c0_11 = arith.constant 0 : index
    %c0_12 = arith.constant 0 : index
    %25 = vector.load %arg2[%24, %c0_11, %c0_12] : memref<18x18x4xbf16, #tpu.memory_space<vmem>>, vector<16x18x4xbf16>
    %26 = vector.extract_strided_slice %25 {offsets = [0, 0, 0], sizes = [16, 16, 4], strides = [1, 1, 1]} : vector<16x18x4xbf16> to vector<16x16x4xbf16>
    %27 = vector.shape_cast %26 : vector<16x16x4xbf16> to vector<256x4xbf16>
    %c3 = arith.constant 3 : index
    %c0_13 = arith.constant 0 : index
    %c0_14 = arith.constant 0 : index
    %28 = vector.load %arg3[%c3, %c0_13, %c0_14] : memref<9x4x128xbf16, #tpu.memory_space<vmem>>, vector<1x4x128xbf16>
    %29 = vector.shape_cast %28 : vector<1x4x128xbf16> to vector<4x128xbf16>
    %cst_15 = arith.constant dense<0.000000e+00> : vector<256x128xf32>
    %30 = tpu.matmul %27, %29, %cst_15 {dimension_numbers = #tpu.dot_dimension_numbers<[1], [0], [0], [1], [0, 0, 1, 1], [], []>} : vector<256x4xbf16>, vector<4x128xbf16>, vector<256x128xf32> -> vector<256x128xf32>
    %31 = arith.addf %22, %30 : vector<256x128xf32>
    %32 = vector.extract_strided_slice %25 {offsets = [0, 1, 0], sizes = [16, 16, 4], strides = [1, 1, 1]} : vector<16x18x4xbf16> to vector<16x16x4xbf16>
    %33 = vector.shape_cast %32 : vector<16x16x4xbf16> to vector<256x4xbf16>
    %c4 = arith.constant 4 : index
    %c0_16 = arith.constant 0 : index
    %c0_17 = arith.constant 0 : index
    %34 = vector.load %arg3[%c4, %c0_16, %c0_17] : memref<9x4x128xbf16, #tpu.memory_space<vmem>>, vector<1x4x128xbf16>
    %35 = vector.shape_cast %34 : vector<1x4x128xbf16> to vector<4x128xbf16>
    %cst_18 = arith.constant dense<0.000000e+00> : vector<256x128xf32>
    %36 = tpu.matmul %33, %35, %cst_18 {dimension_numbers = #tpu.dot_dimension_numbers<[1], [0], [0], [1], [0, 0, 1, 1], [], []>} : vector<256x4xbf16>, vector<4x128xbf16>, vector<256x128xf32> -> vector<256x128xf32>
    %37 = arith.addf %31, %36 : vector<256x128xf32>
    %38 = vector.extract_strided_slice %25 {offsets = [0, 2, 0], sizes = [16, 16, 4], strides = [1, 1, 1]} : vector<16x18x4xbf16> to vector<16x16x4xbf16>
    %39 = vector.shape_cast %38 : vector<16x16x4xbf16> to vector<256x4xbf16>
    %c5 = arith.constant 5 : index
    %c0_19 = arith.constant 0 : index
    %c0_20 = arith.constant 0 : index
    %40 = vector.load %arg3[%c5, %c0_19, %c0_20] : memref<9x4x128xbf16, #tpu.memory_space<vmem>>, vector<1x4x128xbf16>
    %41 = vector.shape_cast %40 : vector<1x4x128xbf16> to vector<4x128xbf16>
    %cst_21 = arith.constant dense<0.000000e+00> : vector<256x128xf32>
    %42 = tpu.matmul %39, %41, %cst_21 {dimension_numbers = #tpu.dot_dimension_numbers<[1], [0], [0], [1], [0, 0, 1, 1], [], []>} : vector<256x4xbf16>, vector<4x128xbf16>, vector<256x128xf32> -> vector<256x128xf32>
    %43 = arith.addf %37, %42 : vector<256x128xf32>
    %c2_i32 = arith.constant 2 : i32
    %44 = arith.addi %0, %c2_i32 : i32
    %45 = arith.index_cast %44 : i32 to index
    %c0_22 = arith.constant 0 : index
    %c0_23 = arith.constant 0 : index
    %46 = vector.load %arg2[%45, %c0_22, %c0_23] : memref<18x18x4xbf16, #tpu.memory_space<vmem>>, vector<16x18x4xbf16>
    %47 = vector.extract_strided_slice %46 {offsets = [0, 0, 0], sizes = [16, 16, 4], strides = [1, 1, 1]} : vector<16x18x4xbf16> to vector<16x16x4xbf16>
    %48 = vector.shape_cast %47 : vector<16x16x4xbf16> to vector<256x4xbf16>
    %c6 = arith.constant 6 : index
    %c0_24 = arith.constant 0 : index
    %c0_25 = arith.constant 0 : index
    %49 = vector.load %arg3[%c6, %c0_24, %c0_25] : memref<9x4x128xbf16, #tpu.memory_space<vmem>>, vector<1x4x128xbf16>
    %50 = vector.shape_cast %49 : vector<1x4x128xbf16> to vector<4x128xbf16>
    %cst_26 = arith.constant dense<0.000000e+00> : vector<256x128xf32>
    %51 = tpu.matmul %48, %50, %cst_26 {dimension_numbers = #tpu.dot_dimension_numbers<[1], [0], [0], [1], [0, 0, 1, 1], [], []>} : vector<256x4xbf16>, vector<4x128xbf16>, vector<256x128xf32> -> vector<256x128xf32>
    %52 = arith.addf %43, %51 : vector<256x128xf32>
    %53 = vector.extract_strided_slice %46 {offsets = [0, 1, 0], sizes = [16, 16, 4], strides = [1, 1, 1]} : vector<16x18x4xbf16> to vector<16x16x4xbf16>
    %54 = vector.shape_cast %53 : vector<16x16x4xbf16> to vector<256x4xbf16>
    %c7 = arith.constant 7 : index
    %c0_27 = arith.constant 0 : index
    %c0_28 = arith.constant 0 : index
    %55 = vector.load %arg3[%c7, %c0_27, %c0_28] : memref<9x4x128xbf16, #tpu.memory_space<vmem>>, vector<1x4x128xbf16>
    %56 = vector.shape_cast %55 : vector<1x4x128xbf16> to vector<4x128xbf16>
    %cst_29 = arith.constant dense<0.000000e+00> : vector<256x128xf32>
    %57 = tpu.matmul %54, %56, %cst_29 {dimension_numbers = #tpu.dot_dimension_numbers<[1], [0], [0], [1], [0, 0, 1, 1], [], []>} : vector<256x4xbf16>, vector<4x128xbf16>, vector<256x128xf32> -> vector<256x128xf32>
    %58 = arith.addf %52, %57 : vector<256x128xf32>
    %59 = vector.extract_strided_slice %46 {offsets = [0, 2, 0], sizes = [16, 16, 4], strides = [1, 1, 1]} : vector<16x18x4xbf16> to vector<16x16x4xbf16>
    %60 = vector.shape_cast %59 : vector<16x16x4xbf16> to vector<256x4xbf16>
    %c8 = arith.constant 8 : index
    %c0_30 = arith.constant 0 : index
    %c0_31 = arith.constant 0 : index
    %61 = vector.load %arg3[%c8, %c0_30, %c0_31] : memref<9x4x128xbf16, #tpu.memory_space<vmem>>, vector<1x4x128xbf16>
    %62 = vector.shape_cast %61 : vector<1x4x128xbf16> to vector<4x128xbf16>
    %cst_32 = arith.constant dense<0.000000e+00> : vector<256x128xf32>
    %63 = tpu.matmul %60, %62, %cst_32 {dimension_numbers = #tpu.dot_dimension_numbers<[1], [0], [0], [1], [0, 0, 1, 1], [], []>} : vector<256x4xbf16>, vector<4x128xbf16>, vector<256x128xf32> -> vector<256x128xf32>
    %64 = arith.addf %58, %63 : vector<256x128xf32>
    %65 = arith.truncf %64 : vector<256x128xf32> to vector<256x128xbf16>
    %c0_33 = arith.constant 0 : index
    %c0_34 = arith.constant 0 : index
    %66 = vector.load %arg4[%c0_33, %c0_34] : memref<256x128xbf16, #tpu.memory_space<vmem>>, vector<256x128xbf16>
    tpu.vector_store %arg4[%c0_33, %c0_34], %65 {strides = array<i32>} : memref<256x128xbf16, #tpu.memory_space<vmem>>, vector<256x128xbf16>,
    %cst_35 = arith.constant dense<0.000000e+00> : vector<128xf32>
    %67 = vector.multi_reduction <add>, %64, %cst_35 [0] : vector<256x128xf32> to vector<128xf32>
    %68 = vector.shape_cast %67 : vector<128xf32> to vector<1x128xf32>
    %69 = arith.mulf %64, %64 : vector<256x128xf32>
    %cst_36 = arith.constant dense<0.000000e+00> : vector<128xf32>
    %70 = vector.multi_reduction <add>, %69, %cst_36 [0] : vector<256x128xf32> to vector<128xf32>
    %71 = vector.shape_cast %70 : vector<128xf32> to vector<1x128xf32>
    %72 = tpu.iota {dimensions = array<i32: 0>} : vector<8x128xi32>
    %c0_i32_37 = arith.constant 0 : i32
    %73 = vector.broadcast %c0_i32_37 : i32 to vector<8x128xi32>
    %74 = arith.cmpi eq, %72, %73 : vector<8x128xi32>
    %cst_38 = arith.constant 0.000000e+00 : f32
    %75 = vector.shape_cast %68 : vector<1x128xf32> to vector<1x128xf32>
    %76 = vector.broadcast %75 : vector<1x128xf32> to vector<8x128xf32>
    %77 = vector.broadcast %cst_38 : f32 to vector<8x128xf32>
    %78 = arith.select %74, %76, %77 : vector<8x128xi1>, vector<8x128xf32>
    %c1_i32_39 = arith.constant 1 : i32
    %79 = vector.broadcast %c1_i32_39 : i32 to vector<8x128xi32>
    %80 = arith.cmpi eq, %72, %79 : vector<8x128xi32>
    %cst_40 = arith.constant 0.000000e+00 : f32
    %81 = vector.shape_cast %71 : vector<1x128xf32> to vector<1x128xf32>
    %82 = vector.broadcast %81 : vector<1x128xf32> to vector<8x128xf32>
    %83 = vector.broadcast %cst_40 : f32 to vector<8x128xf32>
    %84 = arith.select %80, %82, %83 : vector<8x128xi1>, vector<8x128xf32>
    %85 = arith.addf %78, %84 : vector<8x128xf32>
    %c0_41 = arith.constant 0 : index
    %c0_42 = arith.constant 0 : index
    %86 = vector.load %arg5[%c0_41, %c0_42] : memref<8x128xf32, #tpu.memory_space<vmem>>, vector<8x128xf32>
    tpu.vector_store %arg5[%c0_41, %c0_42], %85 {strides = array<i32>} : memref<8x128xf32, #tpu.memory_space<vmem>>, vector<8x128xf32>,
    return
  }
  func.func @transform_0(%arg0: i32, %arg1: i32) -> (i32, i32, i32) {
    %c0_i32 = arith.constant 0 : i32
    %c0_i32_0 = arith.constant 0 : i32
    %c0_i32_1 = arith.constant 0 : i32
    return %arg0, %c0_i32, %c0_i32_0 : i32, i32, i32
  }
  func.func @transform_1(%arg0: i32, %arg1: i32) -> (i32, i32, i32) {
    %c0_i32 = arith.constant 0 : i32
    %c0_i32_0 = arith.constant 0 : i32
    %c0_i32_1 = arith.constant 0 : i32
    %c0_i32_2 = arith.constant 0 : i32
    return %c0_i32, %c0_i32_0, %c0_i32_1 : i32, i32, i32
  }
  func.func @transform_2(%arg0: i32, %arg1: i32) -> (i32, i32) {
    %c1_i32 = arith.constant 1 : i32
    %0 = arith.muli %arg0, %c1_i32 : i32
    %1 = arith.addi %0, %arg1 : i32
    %c0_i32 = arith.constant 0 : i32
    %c0_i32_0 = arith.constant 0 : i32
    return %1, %c0_i32 : i32, i32
  }
  func.func @transform_3(%arg0: i32, %arg1: i32) -> (i32, i32) {
    %c1_i32 = arith.constant 1 : i32
    %0 = arith.muli %arg0, %c1_i32 : i32
    %1 = arith.addi %0, %arg1 : i32
    %c0_i32 = arith.constant 0 : i32
    %c0_i32_0 = arith.constant 0 : i32
    return %1, %c0_i32 : i32, i32
  }
}

</mosaic_0001>

<bundles_post_ra>
// kernel: tpu_custom_call.1
= control target key start
LH: loop header
LB: loop body
LE: loop exit
PB: predicated region body
PF: predicated region fallthrough
CT: control target
= control target key end

     0   :  { %9 = vsyncpa [#allocation3], 0  ;;  %s9212_s0 = inlined_call_operand.vmem [shape: bf16[36,18,4], index: 0, kind: input, shape index: {}]   ;;  %s9213_s1 = inlined_call_operand.vmem [shape: bf16[9,4,128], index: 1, kind: input, shape index: {}]   ;;  %s9214_s2 = inlined_call_operand.hbm [shape: bf16[512,128], index: 2, kind: output, shape index: {0}]   ;;  %s9215_s3 = inlined_call_operand.hbm [shape: f32[16,128], index: 3, kind: output, shape index: {1}]  }
   0x1   :  { %11 = vsyncpa [#allocation3 + $0x1], 0 }
   0x2   :  { %12 = vsyncpa [#allocation5], 0 }
   0x3   :  { %14 = vsyncpa [#allocation5 + $0x1], 0  ;;  %s6333_s12 = smov 0   ;;  %s6335_s13 = smov 0  }
   0x4   :  { %s6337_s14 = smov 0   ;;  %s6339_s15 = smov 0  }
   0x5   :  { %s6341_s16 = smov 0   ;;  %s6343_s17 = smov 0  }
   0x6 LB: > { %s5004_s18 = sadd.s32 4294967295, %s6307_s17   ;;  %s5005_s19 = sadd.s32 4294967294, %s6307_s17   ;;  %s6307_s17 = sphi %s6343_s17, %s20_s17   ;;  %s6303_s16 = sphi %s6341_s16, %s9667_s16   ;;  %s6299_s15 = sphi %s6339_s15, %s9666_s15   ;;  %s6295_s14 = sphi %s6337_s14, %s9665_s14   ;;  %s6291_s13 = sphi %s6335_s13, %s9664_s13   ;;  %s6287_s12 = sphi %s6333_s12, %s9663_s12  }
   0x7   : > { %s32_s20 = sadd.s32 1, %s6303_s16  ;;  %s88_s21 = sadd.s32 1, %s6295_s14 }
   0x8   : > { %p34_p0 = scmp.ge.s32.totalorder %s32_s20, 2  ;;  %p98_p1 = scmp.ne.s32.totalorder %s6295_s14, %s6291_s13 }
   0x9   : > { %p99_p2 = scmp.eq.s32.totalorder %s5004_s18, 1  ;;  %p104_p3 = scmp.ne.s32.totalorder %s6291_s13, %s6287_s12 }
   0xa   : > { %s9669_s20 = smov (%p34_p0, %s32_s20), 0  ;;  %p105_p5 = scmp.eq.s32.totalorder %s5005_s19, 1 }
   0xb   : > { %p6373_p4 = por %p99_p2, %p98_p1  ;;  %s85_s23 = ssub.s32 %s6303_s16, %s9669_s20 }
   0xc   : > { %p5008_p6 = scmp.ge.s32.totalorder %s6307_s17, 1  ;;  %p86_p7 = scmp.eq.s32.totalorder %s85_s23, 0 }
   0xd   : > { %p6380_p8 = por %p105_p5, %p104_p3  ;;  %p164_p9 = scmp.lt.s32.totalorder %s6307_s17, 3 }
   0xe   : > { %s6386_s25 = scalar_select %p86_p7, %s6295_s14, %s88_s21  }
   0xf   : > { %p165_p10 = pnand %p5008_p6, %p164_p9 }
  0x11   : > { %168 = sbr.rel (%p165_p10) target bundleno = 618 (0x26a), region = 28 }
  0x16   : > { %v5012_v0 = vld [vmem:[%s9213_s1 + $0x2] sm:$0x3]  ;;  %vm744_vm0 = vcmask 1041408   ;;  %s194_s28 = smul.u32 18, %s6299_s15  ;;  %v257_v2 = vld [vmem:[%s9213_s1] sm:$0x3] }
  0x17   : > { %6081 = vmatprep.subr.msk.bf16.mxu1 %vm744_vm0, %v5012_v0  ;;  %6080 = vmatprep.subr.msk.bf16.mxu0 %vm744_vm0, %v5012_v0  ;;  %v746_v1 = vsel %vm744_vm0, %v5012_v0, 0  ;;  %v5093_v3 = vld [vmem:[%s9213_s1 + $0x4] sm:$0x3]  ;;  %vm258_vm1 = vsmask.f32 3328  ;;  %v6409_v4 = vsel %vm744_vm0, %v257_v2, 0 }
  0x18   : > { %6079 = vmatpush3.bf16.msra.mxu1 %v746_v1  ;;  %5773 = vmatpush3.bf16.msra.mxu0 %v746_v1  ;;  %p195_p11 = scmp.lt.s32.totalorder %s194_s28, 35  ;;  %vm259_vm2 = vsmask.f32 7440  ;;  %v6412_v5 = vsel %vm744_vm0, %v5093_v3, 0  ;;  %vm695_vm3 = vcmask 31744   ;;  %v9286_v32 = vmov 0 }
  0x19   : > { %6082 = vmatprep.subr.msk.bf16.mxu1 %vm744_vm0, %v257_v2  ;;  %6083 = vmatprep.subr.msk.bf16.mxu0 %vm744_vm0, %v5093_v3  ;;  %vm6451_vm4 = vmor %vm258_vm1, %vm259_vm2  ;;  %vm1217_vm5 = vcmask 1042432   ;;  %vm1218_vm6 = vcmask 1046532   ;;  %s9045_s5 = sand.u32 1, %s6291_s13   ;;  %s5523_s8 = sshll.u32 %s6299_s15, 11 }
  0x1a   : > { %s9671_s28 = smov (!%p195_p11, %s194_s28), 35  ;;  %v9287_v32 = vsel %vm6451_vm4, 4294967295, %v9286_v32  ;;  %vm6736_vm7 = vmor %vm1217_vm5, %vm1218_vm6  ;;  %s9143_s18 = scalar_lea.hbm %s9214_s2, %s5523_s8 }
  0x1b   : > { %s6090_s6 = smul.u32 12, %s9671_s28  ;;  %9288 = vst [vmem:[#allocation8_spill] sm:$0xff] %v9287_v32  ;;  %s4857_s19 = scalar_lea.sflag [#allocation3], %s9045_s5 }
  0x1c   : > { %s6309_s23 = smov [#allocation2]  }
  0x1d   : > { %s6406_s9 = scalar_lea.vmem %s9212_s0, %s6090_s6  ;;  %s5009_s6 = sshll.u32 %s9045_s5, 7 }
  0x1e   : > { %v6415_v6 = vld [vmem:[%s6406_s9] sm:$0xf]  ;;  %v6418_v7 = vld [vmem:[%s6406_s9 + $0x4] sm:$0xf]  ;;  %v6421_v8 = vld [vmem:[%s6406_s9 + $0x8] sm:$0x1] }
  0x1f   : > { %v262_v9 = vshrl.u32 %v6415_v6, 16  ;;  %v265_v10 = vshll.u32 %v6415_v6, 16  ;;  %v271_v11 = vshll.u32 %v6418_v7, 16  ;;  %v275_v12 = vshrl.u32 %v6418_v7, 16  ;;  %v6428_v13 = vld [vmem:[%s6406_s9 + $0x60] sm:$0xf] }
  0x20   : > { %v281_v14 = vshll.u32 %v6421_v8, 16  ;;  %v6433_v16 = vld [vmem:[%s6406_s9 + $0x64] sm:$0xf]  ;;  %v6436_v17 = vld [vmem:[%s6406_s9 + $0x68] sm:$0x1]  ;;  %v454_v23 = vshrl.u32 %v6428_v13, 16 }
  0x21   : > { %v264_v18 = vrot.slane %v262_v9, 4  ;;  %v267_v19 = vrot.slane %v265_v10, 5  ;;  %v273_v20 = vrot.slane %v271_v11, 5  ;;  %v277_v21 = vrot.slane %v275_v12, 4  ;;  %v6444_v30 = vld [vmem:[%s6406_s9 + $0xc] sm:$0xf] }
  0x22   : > { %v283_v22 = vrot.slane %v281_v14, 5  ;;  %v457_v24 = vshll.u32 %v6428_v13, 16  ;;  %v463_v25 = vshll.u32 %v6433_v16, 16  ;;  %v467_v28 = vshrl.u32 %v6433_v16, 16  ;;  %v6447_v31 = vld [vmem:[%s6406_s9 + $0x10] sm:$0xf] }
  0x23   : > { %v268_v26 = vor.u32 %v267_v19, %v264_v18  ;;  %v278_v27 = vor.u32 %v277_v21, %v273_v20  ;;  %v473_v29 = vshll.u32 %v6436_v17, 16  ;;  %v456_v33 = vrot.slane %v454_v23, 4  ;;  %v6458_v42 = vld [vmem:[%s6406_s9 + $0x14] sm:$0x1]  ;;  %v6469_v54 = vld [vmem:[%s6406_s9 + $0x6c] sm:$0xf] }
  0x24   : > { %v459_v34 = vrot.slane %v457_v24, 5  ;;  %v465_v35 = vrot.slane %v463_v25, 5  ;;  %v469_v39 = vrot.slane %v467_v28, 4  ;;  %v286_v43 = vshrl.u32 %v6444_v30, 16  ;;  %9289 = vst [vmem:[#allocation9_spill] sm:$0xff] %v6469_v54  ;;  %s9061_s7 = scalar_lea.vmem [#allocation2], %s5009_s6 }
  0x25   : > { %v269_v37 = vrot.slane %v268_v26, 4  ;;  %v279_v38 = vrot.slane %v278_v27, 4  ;;  %v475_v40 = vrot.slane %v473_v29, 5  ;;  %v289_v44 = vshll.u32 %v6444_v30, 16  ;;  %v6473_v59 = vld [vmem:[%s6406_s9 + $0x70] sm:$0xf] }
  0x26   : > { %v460_v41 = vor.u32 %v459_v34, %v456_v33  ;;  %v295_v45 = vshll.u32 %v6447_v31, 16  ;;  %v470_v48 = vor.u32 %v469_v39, %v465_v35  ;;  %v299_v49 = vshrl.u32 %v6447_v31, 16  ;;  %v6481_v0 = vld [vmem:[%s6406_s9 + $0x74] sm:$0x1]  ;;  %v6487_v10 = vld [vmem:[%s6406_s9 + $0x18] sm:$0xf] }
  0x27   : > { %v274_v46 = vsel %vm6451_vm4, %v269_v37, %v273_v20  ;;  %v284_v47 = vsel %vm6451_vm4, %v279_v38, %v283_v22  ;;  %v288_v52 = vrot.slane %v286_v43, 4  ;;  %v291_v53 = vrot.slane %v289_v44, 5  ;;  %9290 = vst [vmem:[#allocation10_spill] sm:$0xff] %v6481_v0  ;;  %v6494_v23 = vld [vmem:[%s6406_s9 + $0x1c] sm:$0xf]  ;;  %s6205_s26 = sshll.u32 %s6309_s23, 4  ;;  %s6206_s26 = int_to_ptr.vmem [resolvable:$false] %s6205_s26 }
  0x28   : > { %v5013_v50 = vcombine.low %v274_v46, %v284_v47  ;;  %v461_v51 = vrot.slane %v460_v41, 4  ;;  %v471_v55 = vrot.slane %v470_v48, 4  ;;  %v297_v56 = vrot.slane %v295_v45, 5  ;;  %v6500_v27 = vld [vmem:[%s6406_s9 + $0x20] sm:$0x1]  ;;  %s6207_s27 = scalar_lea.vmem %s6206_s26, 4096 }
  0x29   : > { %v301_v57 = vrot.slane %v299_v49, 4  ;;  %v305_v58 = vshll.u32 %v6458_v42, 16  ;;  %v292_v61 = vor.u32 %v291_v53, %v288_v52  ;;  %v478_v9 = vshrl.u32 %v6469_v54, 16  ;;  %v6507_v37 = vld [vmem:[%s6406_s9 + $0x78] sm:$0xf] }
  0x2a   : > { %5774 = vmatprep.mubr.msk.bf16.mxu0 %vm695_vm3, %v5013_v50  ;;  %v466_v60 = vsel %vm6451_vm4, %v461_v51, %v465_v35  ;;  %v476_v1 = vsel %vm6451_vm4, %v471_v55, %v475_v40  ;;  %v481_v14 = vshll.u32 %v6469_v54, 16  ;;  %v487_v18 = vshll.u32 %v6473_v59, 16  ;;  %9291 = vst [vmem:[#allocation11_spill] sm:$0xff] %v6507_v37  ;;  %v6513_v43 = vld [vmem:[%s9213_s1 + $0x8] sm:$0x3] }
  0x2b   : > { %v302_v2 = vor.u32 %v301_v57, %v297_v56  ;;  %v307_v3 = vrot.slane %v305_v58, 5  ;;  %v5021_v11 = vcombine.low %v466_v60, %v476_v1  ;;  %v293_v12 = vrot.slane %v292_v61, 4  ;;  %v6518_v48 = vld [vmem:[%s6406_s9 + $0x7c] sm:$0xf]  ;;  %v6525_v58 = vld [vmem:[%s6406_s9 + $0x80] sm:$0x1] }
  0x2c   : > { %v480_v20 = vrot.slane %v478_v9, 4  ;;  %v491_v21 = vshrl.u32 %v6473_v59, 16  ;;  %v497_v22 = vshll.u32 %v6481_v0, 16  ;;  %v483_v25 = vrot.slane %v481_v14, 5  ;;  %9292 = vst [vmem:[#allocation12_spill] sm:$0xff] %v6518_v48  ;;  %9293 = vst [vmem:[#allocation13_spill] sm:$0xff] %v6525_v58 }
  0x2d   : > { %v303_v19 = vrot.slane %v302_v2, 4  ;;  %5790 = vmatprep.mubr.msk.bf16.mxu1 %vm695_vm3, %v5021_v11  ;;  %v298_v24 = vsel %vm6451_vm4, %v293_v12, %v297_v56  ;;  %v489_v26 = vrot.slane %v487_v18, 5  ;;  %v310_v28 = vshrl.u32 %v6487_v10, 16  ;;  %v6539_v14 = vld [vmem:[%s6406_s9 + $0x28] sm:$0xf] }
  0x2e   : > { %v493_v33 = vrot.slane %v491_v21, 4  ;;  %v499_v34 = vrot.slane %v497_v22, 5  ;;  %v313_v35 = vshll.u32 %v6487_v10, 16  ;;  %v484_v39 = vor.u32 %v483_v25, %v480_v20  ;;  %v6545_v22 = vld [vmem:[%s9213_s1 + $0x6] sm:$0x3] }
  0x2f   : > { %v308_v29 = vsel %vm6451_vm4, %v303_v19, %v307_v3  ;;  %v312_v40 = vrot.slane %v310_v28, 4  ;;  %v319_v41 = vshll.u32 %v6494_v23, 16  ;;  %v323_v46 = vshrl.u32 %v6494_v23, 16  ;;  %v6531_v3 = vld [vmem:[%s6406_s9 + $0x24] sm:$0xf] }
  0x30   : > { %v5014_v38 = vcombine.low %v298_v24, %v308_v29  ;;  %v494_v44 = vor.u32 %v493_v33, %v489_v26  ;;  %v315_v45 = vrot.slane %v313_v35, 5  ;;  %v329_v47 = vshll.u32 %v6500_v27, 16  ;;  %v6550_v28 = vld [vmem:[%s6406_s9 + $0x2c] sm:$0x1] }
  0x31   : > { %v485_v49 = vrot.slane %v484_v39, 4  ;;  %v321_v50 = vrot.slane %v319_v41, 5  ;;  %v502_v51 = vshrl.u32 %v6507_v37, 16  ;;  %v505_v52 = vshll.u32 %v6507_v37, 16  ;;  %v6557_v39 = vld [vmem:[%s6406_s9 + $0x84] sm:$0xf] }
  0x32   : > { %5775 = vmatmul.mubr.msk.bf16.vlgmr.msra.gmra.mxu0 %vm695_vm3, %v5014_v38  ;;  %v495_v53 = vrot.slane %v494_v44, 4  ;;  %v316_v55 = vor.u32 %v315_v45, %v312_v40  ;;  %v325_v56 = vrot.slane %v323_v46, 4  ;;  %v331_v57 = vrot.slane %v329_v47, 5  ;;  %v6564_v46 = vld [vmem:[%s6406_s9 + $0x88] sm:$0xf] }
  0x33   : > { %5841 = vmatpush3.bf16.msra.mxu0 %v6412_v5  ;;  %v490_v60 = vsel %vm6451_vm4, %v485_v49, %v489_v26  ;;  %v504_v61 = vrot.slane %v502_v51, 4  ;;  %v507_v1 = vrot.slane %v505_v52, 5  ;;  %v511_v2 = vshll.u32 %v6518_v48, 16 }
  0x34   : > { %6085 = vmatprep.subr.msk.bf16.mxu0 %vm744_vm0, %v6513_v43  ;;  %v500_v5 = vsel %vm6451_vm4, %v495_v53, %v499_v34  ;;  %v317_v9 = vrot.slane %v316_v55, 4  ;;  %v326_v11 = vor.u32 %v325_v56, %v321_v50  ;;  %v515_v12 = vshrl.u32 %v6518_v48, 16  ;;  %v6572_v55 = vld [vmem:[%s6406_s9 + $0x8c] sm:$0x1]  ;;  %v6703_v48 = vld [vmem:[%s6406_s9 + $0x5c] sm:$0x1] }
  0x35   : > { %v5022_v18 = vcombine.low %v490_v60, %v500_v5  ;;  %v508_v19 = vor.u32 %v507_v1, %v504_v61  ;;  %v513_v20 = vrot.slane %v511_v2, 5  ;;  %v521_v21 = vshll.u32 %v6525_v58, 16  ;;  %v6580_v2 = vld [vmem:[%s6406_s9 + $0x30] sm:$0xf] }
  0x36   : > { %v322_v24 = vsel %vm6451_vm4, %v317_v9, %v321_v50  ;;  %v327_v25 = vrot.slane %v326_v11, 4  ;;  %v517_v26 = vrot.slane %v515_v12, 4  ;;  %v334_v29 = vshrl.u32 %v6531_v3, 16 }
  0x37   : > { %5791 = vmatmul.mubr.msk.bf16.vlgmr.msra.gmra.mxu1 %vm695_vm3, %v5022_v18  ;;  %v509_v33 = vrot.slane %v508_v19, 4  ;;  %v523_v34 = vrot.slane %v521_v21, 5  ;;  %v337_v35 = vshll.u32 %v6531_v3, 16  ;;  %v343_v38 = vshll.u32 %v6539_v14, 16  ;;  %v6585_v18 = vld [vmem:[%s6406_s9 + $0x34] sm:$0xf] }
  0x38   : > { %5807 = vmatpush3.bf16.msra.mxu1 %v6409_v4  ;;  %v332_v40 = vsel %vm6451_vm4, %v327_v25, %v331_v57  ;;  %v518_v41 = vor.u32 %v517_v26, %v513_v20  ;;  %v336_v44 = vrot.slane %v334_v29, 4  ;;  %v347_v45 = vshrl.u32 %v6539_v14, 16 }
  0x39   : > { %v5015_v47 = vcombine.low %v322_v24, %v332_v40  ;;  %v514_v49 = vsel %vm6451_vm4, %v509_v33, %v513_v20  ;;  %v339_v50 = vrot.slane %v337_v35, 5  ;;  %v345_v51 = vrot.slane %v343_v38, 5  ;;  %6084 = vmatprep.subr.msk.bf16.mxu1 %vm744_vm0, %v6545_v22  ;;  %v6593_v38 = vld [vmem:[%s6406_s9 + $0x38] sm:$0x1] }
  0x3a   : > { %v519_v4 = vrot.slane %v518_v41, 4  ;;  %v349_v52 = vrot.slane %v347_v45, 4  ;;  %v353_v53 = vshll.u32 %v6550_v28, 16  ;;  %v526_v56 = vshrl.u32 %v6557_v39, 16 }
  0x3b   : > { %5778 = vmatprep.mubr.msk.bf16.mxu0 %vm695_vm3, %v5015_v47  ;;  %v340_v57 = vor.u32 %v339_v50, %v336_v44  ;;  %v529_v60 = vshll.u32 %v6557_v39, 16  ;;  %v535_v61 = vshll.u32 %v6564_v46, 16  ;;  %v539_v1 = vshrl.u32 %v6564_v46, 16  ;;  %v6598_v44 = vld [vmem:[%s6406_s9 + $0x90] sm:$0xf] }
  0x3c   : > { %v524_v5 = vsel %vm6451_vm4, %v519_v4, %v523_v34  ;;  %v350_v9 = vor.u32 %v349_v52, %v345_v51  ;;  %v355_v11 = vrot.slane %v353_v53, 5  ;;  %v528_v12 = vrot.slane %v526_v56, 4  ;;  %v6603_v4 = vld [vmem:[%s6406_s9 + $0x94] sm:$0xf] }
  0x3d   : > { %v5023_v19 = vcombine.low %v514_v49, %v524_v5  ;;  %v341_v20 = vrot.slane %v340_v57, 4  ;;  %v531_v21 = vrot.slane %v529_v60, 5  ;;  %v537_v24 = vrot.slane %v535_v61, 5 }
  0x3e   : > { %v351_v25 = vrot.slane %v350_v9, 4  ;;  %v541_v26 = vrot.slane %v539_v1, 4  ;;  %v545_v29 = vshll.u32 %v6572_v55, 16  ;;  %v358_v33 = vshrl.u32 %v6580_v2, 16 }
  0x3f   : > { %5794 = vmatprep.mubr.msk.bf16.mxu1 %vm695_vm3, %v5023_v19  ;;  %v346_v34 = vsel %vm6451_vm4, %v341_v20, %v345_v51  ;;  %v532_v35 = vor.u32 %v531_v21, %v528_v12  ;;  %v361_v40 = vshll.u32 %v6580_v2, 16  ;;  %v367_v41 = vshll.u32 %v6585_v18, 16  ;;  %v6617_v20 = vld [vmem:[%s6406_s9 + $0x3c] sm:$0xf] }
  0x40   : > { %v356_v45 = vsel %vm6451_vm4, %v351_v25, %v355_v11  ;;  %v542_v47 = vor.u32 %v541_v26, %v537_v24  ;;  %v547_v49 = vrot.slane %v545_v29, 5  ;;  %v360_v50 = vrot.slane %v358_v33, 4  ;;  %v6612_v11 = vld [vmem:[%s6406_s9 + $0x98] sm:$0x1]  ;;  %v6622_v33 = vld [vmem:[%s6406_s9 + $0x40] sm:$0xf] }
  0x41   : > { %v5016_v51 = vcombine.low %v346_v34, %v356_v45  ;;  %v533_v52 = vrot.slane %v532_v35, 4  ;;  %v363_v53 = vrot.slane %v361_v40, 5  ;;  %v369_v56 = vrot.slane %v367_v41, 5 }
  0x42   : > { %v543_v57 = vrot.slane %v542_v47, 4  ;;  %v371_v60 = vshrl.u32 %v6585_v18, 16  ;;  %v377_v61 = vshll.u32 %v6593_v38, 16  ;;  %v550_v1 = vshrl.u32 %v6598_v44, 16 }
  0x43   : > { %5779 = vmatmul.mubr.msk.bf16.gmra.mxu0 %vm695_vm3, %v5016_v51  ;;  %v538_v5 = vsel %vm6451_vm4, %v533_v52, %v537_v24  ;;  %v364_v9 = vor.u32 %v363_v53, %v360_v50  ;;  %v553_v12 = vshll.u32 %v6598_v44, 16  ;;  %v559_v19 = vshll.u32 %v6603_v4, 16  ;;  %v6631_v52 = vld [vmem:[%s6406_s9 + $0x44] sm:$0x1] }
  0x44   : > { %v548_v21 = vsel %vm6451_vm4, %v543_v57, %v547_v49  ;;  %v373_v25 = vrot.slane %v371_v60, 4  ;;  %v379_v26 = vrot.slane %v377_v61, 5  ;;  %v552_v29 = vrot.slane %v550_v1, 4  ;;  %v6636_v60 = vld [vmem:[%s6406_s9 + $0x9c] sm:$0xf] }
  0x45   : > { %v5024_v24 = vcombine.low %v538_v5, %v548_v21  ;;  %v365_v34 = vrot.slane %v364_v9, 4  ;;  %v555_v35 = vrot.slane %v553_v12, 5  ;;  %v561_v40 = vrot.slane %v559_v19, 5  ;;  %9294 = vst [vmem:[#allocation14_spill] sm:$0xff] %v6636_v60 }
  0x46   : > { %v374_v41 = vor.u32 %v373_v25, %v369_v56  ;;  %v563_v45 = vshrl.u32 %v6603_v4, 16  ;;  %v569_v47 = vshll.u32 %v6612_v11, 16  ;;  %v382_v50 = vshrl.u32 %v6617_v20, 16 }
  0x47   : > { %5795 = vmatmul.mubr.msk.bf16.gmra.mxu1 %vm695_vm3, %v5024_v24  ;;  %v370_v49 = vsel %vm6451_vm4, %v365_v34, %v369_v56  ;;  %v556_v51 = vor.u32 %v555_v35, %v552_v29  ;;  %v385_v53 = vshll.u32 %v6617_v20, 16  ;;  %v391_v57 = vshll.u32 %v6622_v33, 16  ;;  %v6643_v34 = vld [vmem:[%s6406_s9 + $0xa0] sm:$0xf] }
  0x48   : > { %v375_v61 = vrot.slane %v374_v41, 4  ;;  %v565_v1 = vrot.slane %v563_v45, 4  ;;  %v571_v5 = vrot.slane %v569_v47, 5  ;;  %v384_v9 = vrot.slane %v382_v50, 4 }
  0x49   : > { %v557_v12 = vrot.slane %v556_v51, 4  ;;  %v387_v19 = vrot.slane %v385_v53, 5  ;;  %v393_v21 = vrot.slane %v391_v57, 5  ;;  %v395_v56 = vshrl.u32 %v6622_v33, 16  ;;  %v6649_v51 = vld [vmem:[%s6406_s9 + $0xa4] sm:$0x1] }
  0x4a   : > { %v380_v25 = vsel %vm6451_vm4, %v375_v61, %v379_v26  ;;  %v566_v29 = vor.u32 %v565_v1, %v561_v40  ;;  %v401_v24 = vshll.u32 %v6631_v52, 16  ;;  %v574_v35 = vshrl.u32 %v6636_v60, 16  ;;  %9295 = vst [vmem:[#allocation15_spill] sm:$0xff] %v6649_v51  ;;  %v6652_v53 = vld [vmem:[%s6406_s9 + $0x48] sm:$0xf] }
  0x4b   : > { %v5017_v41 = vcombine.low %v370_v49, %v380_v25  ;;  %v562_v45 = vsel %vm6451_vm4, %v557_v12, %v561_v40  ;;  %v388_v47 = vor.u32 %v387_v19, %v384_v9  ;;  %v397_v50 = vrot.slane %v395_v56, 4  ;;  %v6662_v56 = vld [vmem:[%s6406_s9 + $0x4c] sm:$0xf] }
  0x4c   : > { %v567_v57 = vrot.slane %v566_v29, 4  ;;  %v403_v26 = vrot.slane %v401_v24, 5  ;;  %v576_v61 = vrot.slane %v574_v35, 4  ;;  %v577_v1 = vshll.u32 %v6636_v60, 16 }
  0x4d   : > { %5782 = vmatprep.mubr.msk.bf16.mxu0 %vm695_vm3, %v5017_v41  ;;  %v389_v36 = vrot.slane %v388_v47, 4  ;;  %v398_v49 = vor.u32 %v397_v50, %v393_v21  ;;  %v583_v25 = vshll.u32 %v6643_v34, 16  ;;  %v587_v40 = vshrl.u32 %v6643_v34, 16  ;;  %v6668_v50 = vld [vmem:[%s6406_s9 + $0x50] sm:$0x1] }
  0x4e   : > { %v572_v9 = vsel %vm6451_vm4, %v567_v57, %v571_v5  ;;  %v579_v12 = vrot.slane %v577_v1, 5  ;;  %v593_v19 = vshll.u32 %v6649_v51, 16  ;;  %v406_v29 = vshrl.u32 %v6652_v53, 16  ;;  %v6671_v57 = vld [vmem:[%s6406_s9 + $0xa8] sm:$0xf] }
  0x4f   : > { %v5025_v24 = vcombine.low %v562_v45, %v572_v9  ;;  %v394_v35 = vsel %vm6451_vm4, %v389_v36, %v393_v21  ;;  %v399_v41 = vrot.slane %v398_v49, 4  ;;  %v585_v47 = vrot.slane %v583_v25, 5  ;;  %9296 = vst [vmem:[#allocation16_spill] sm:$0xff] %v6671_v57  ;;  %v6681_v9 = vld [vmem:[%s6406_s9 + $0xac] sm:$0xf] }
  0x50   : > { %v580_v63 = vor.u32 %v579_v12, %v576_v61  ;;  %v589_v15 = vrot.slane %v587_v40, 4  ;;  %v595_v62 = vrot.slane %v593_v19, 5  ;;  %v408_v5 = vrot.slane %v406_v29, 4  ;;  %9297 = vst [vmem:[#allocation17_spill] sm:$0xff] %v6681_v9 }
  0x51   : > { %5798 = vmatprep.mubr.msk.bf16.mxu1 %vm695_vm3, %v5025_v24  ;;  %v404_v45 = vsel %vm6451_vm4, %v399_v41, %v403_v26  ;;  %v409_v1 = vshll.u32 %v6652_v53, 16  ;;  %v415_v36 = vshll.u32 %v6662_v56, 16  ;;  %v419_v21 = vshrl.u32 %v6662_v56, 16  ;;  %v6684_v24 = vld [vmem:[%s6406_s9 + $0xb0] sm:$0x1] }
  0x52   : > { %v5018_v49 = vcombine.low %v394_v35, %v404_v45  ;;  %v581_v25 = vrot.slane %v580_v63, 4  ;;  %v590_v61 = vor.u32 %v589_v15, %v585_v47  ;;  %v425_v40 = vshll.u32 %v6668_v50, 16  ;;  %9298 = vst [vmem:[#allocation18_spill] sm:$0xff] %v6684_v24 }
  0x53   : > { %v411_v12 = vrot.slane %v409_v1, 5  ;;  %v417_v19 = vrot.slane %v415_v36, 5  ;;  %v421_v29 = vrot.slane %v419_v21, 4  ;;  %v598_v26 = vshrl.u32 %v6671_v57, 16  ;;  %v6693_v36 = vld [vmem:[%s6406_s9 + $0x54] sm:$0xf] }
  0x54   : > { %5783 = vmatmul.mubr.msk.bf16.gmra.mxu0 %vm695_vm3, %v5018_v49  ;;  %v586_v35 = vsel %vm6451_vm4, %v581_v25, %v585_v47  ;;  %v591_v63 = vrot.slane %v590_v61, 4  ;;  %v427_v15 = vrot.slane %v425_v40, 5  ;;  %v601_v41 = vshll.u32 %v6671_v57, 16  ;;  %v6700_v61 = vld [vmem:[%s6406_s9 + $0x58] sm:$0xf] }
  0x55   : > { %v412_v45 = vor.u32 %v411_v12, %v408_v5  ;;  %v422_v58 = vor.u32 %v421_v29, %v417_v19  ;;  %v600_v37 = vrot.slane %v598_v26, 4  ;;  %v607_v1 = vshll.u32 %v6681_v9, 16 }
  0x56   : > { %v596_v21 = vsel %vm6451_vm4, %v591_v63, %v595_v62  ;;  %v603_v49 = vrot.slane %v601_v41, 5  ;;  %v611_v47 = vshrl.u32 %v6681_v9, 16  ;;  %v617_v25 = vshll.u32 %v6684_v24, 16  ;;  %v6727_v24 = vld [vmem:[%s6406_s9 + $0xbc] sm:$0x1] }
  0x57   : > { %v5026_v5 = vcombine.low %v586_v35, %v596_v21  ;;  %v413_v40 = vrot.slane %v412_v45, 4  ;;  %v423_v12 = vrot.slane %v422_v58, 4  ;;  %v609_v29 = vrot.slane %v607_v1, 5  ;;  %v6714_v45 = vld [vmem:[%s6406_s9 + $0xb4] sm:$0xf] }
  0x58   : > { %v604_v26 = vor.u32 %v603_v49, %v600_v37  ;;  %v613_v0 = vrot.slane %v611_v47, 4  ;;  %v619_v54 = vrot.slane %v617_v25, 5  ;;  %v430_v62 = vshrl.u32 %v6693_v36, 16  ;;  %9299 = vst [vmem:[#allocation19_spill] sm:$0xff] %v6714_v45  ;;  %v6717_v47 = vld [vmem:[%s6406_s9 + $0xb8] sm:$0xf] }
  0x59   : > { %5799 = vmatmul.mubr.msk.bf16.gmra.mxu1 %vm695_vm3, %v5026_v5  ;;  %v418_v63 = vsel %vm6451_vm4, %v413_v40, %v417_v19  ;;  %v428_v41 = vsel %vm6451_vm4, %v423_v12, %v427_v15  ;;  %v433_v35 = vshll.u32 %v6693_v36, 16  ;;  %v439_v58 = vshll.u32 %v6700_v61, 16 }
  0x5a   : > { %v5019_v37 = vcombine.low %v418_v63, %v428_v41  ;;  %v605_v1 = vrot.slane %v604_v26, 4  ;;  %v614_v21 = vor.u32 %v613_v0, %v609_v29  ;;  %v432_v49 = vrot.slane %v430_v62, 4 }
  0x5b   : > { %v435_v25 = vrot.slane %v433_v35, 5  ;;  %v441_v5 = vrot.slane %v439_v58, 5  ;;  %v443_v19 = vshrl.u32 %v6700_v61, 16  ;;  %v449_v40 = vshll.u32 %v6703_v48, 16 }
  0x5c   : > { %5786 = vmatprep.mubr.msk.bf16.mxu0 %vm695_vm3, %v5019_v37  ;;  %v610_v15 = vsel %vm6451_vm4, %v605_v1, %v609_v29  ;;  %v615_v12 = vrot.slane %v614_v21, 4  ;;  %v622_v63 = vshrl.u32 %v6714_v45, 16  ;;  %v625_v26 = vshll.u32 %v6714_v45, 16 }
  0x5d   : > { %v436_v0 = vor.u32 %v435_v25, %v432_v49  ;;  %v445_v62 = vrot.slane %v443_v19, 4  ;;  %v451_v41 = vrot.slane %v449_v40, 5  ;;  %v631_v35 = vshll.u32 %v6717_v47, 16 }
  0x5e   : > { %v620_v58 = vsel %vm6451_vm4, %v615_v12, %v619_v54  ;;  %v624_v57 = vrot.slane %v622_v63, 4  ;;  %v627_v37 = vrot.slane %v625_v26, 5  ;;  %v635_v9 = vshrl.u32 %v6717_v47, 16 }
  0x5f   : > { %v5027_v29 = vcombine.low %v610_v15, %v620_v58  ;;  %v437_v1 = vrot.slane %v436_v0, 4  ;;  %v446_v21 = vor.u32 %v445_v62, %v441_v5  ;;  %v633_v51 = vrot.slane %v631_v35, 5 }
  0x60   : > { %v628_v60 = vor.u32 %v627_v37, %v624_v57  ;;  %v637_v45 = vrot.slane %v635_v9, 4  ;;  %v641_v49 = vshll.u32 %v6727_v24, 16  ;;  %v9300_v25 = vmov 0 }
  0x61   : > { %v9301_v25 = vsel %vm6736_vm7, 4294967295, %v9300_v25  ;;  %v5077_v54 = vrot.slane %v6415_v6, 9  ;;  %5802 = vmatprep.mubr.msk.bf16.mxu1 %vm695_vm3, %v5027_v29  ;;  %v442_v19 = vsel %vm6451_vm4, %v437_v1, %v441_v5  ;;  %v447_v40 = vrot.slane %v446_v21, 4 }
  0x62   : > { %9302 = vst [vmem:[#allocation20_spill] sm:$0xff] %v9301_v25  ;;  %v1222_v15 = vrot.slane %v6418_v7, 5  ;;  %v5046_v57 = vcombine.low %v6444_v30, %v6447_v31  ;;  %v629_v9 = vrot.slane %v628_v60, 4  ;;  %v638_v12 = vor.u32 %v637_v45, %v633_v51 }
  0x63   : > { %v643_v63 = vrot.slane %v641_v49, 5  ;;  %v5078_v26 = vrot.slane %v6444_v30, 9  ;;  %v452_v0 = vsel %vm6451_vm4, %v447_v40, %v451_v41  ;;  %v9303_v5 = vrot.slane %v6447_v31, 5 }
  0x64   : > { %v1223_v62 = vsel %vm6736_vm7, %v5077_v54, %v1222_v15  ;;  %v1224_v35 = vrot.slane %v1222_v15, 4  ;;  %v5020_v37 = vcombine.low %v442_v19, %v452_v0  ;;  %v634_v29 = vsel %vm6451_vm4, %v629_v9, %v633_v51 }
  0x65   : > { %v1231_v58 = vrot.slane %v9303_v5, 4  ;;  %v639_v1 = vrot.slane %v638_v12, 4  ;;  %v9304_v60 = vmov %v9303_v5  ;;  %v9305_v45 = vrot.slane %v6421_v8, 5 }
  0x66   : > { %v1230_v30 = vsel %vm6736_vm7, %v5078_v26, %v9304_v60  ;;  %v9306_v21 = vrot.slane %v6458_v42, 5  ;;  %v5047_v54 = vcombine.low %v6487_v10, %v6494_v23  ;;  %v5079_v51 = vrot.slane %v6487_v10, 9  ;;  %5787 = vmatmul.mubr.msk.bf16.gmra.mxu0 %vm695_vm3, %v5020_v37 }
  0x67   : > { %v1226_v41 = vsel %vm6736_vm7, %v1224_v35, %v9305_v45  ;;  %v644_v31 = vsel %vm6451_vm4, %v639_v1, %v643_v63  ;;  %v1236_v40 = vrot.slane %v6494_v23, 5  ;;  %v1239_v42 = vrot.slane %v6500_v27, 5 }
  0x68   : > { %v1233_v49 = vsel %vm6736_vm7, %v1231_v58, %v9306_v21  ;;  %v5094_v19 = vcombine.low %v1223_v62, %v1226_v41  ;;  %v5028_v15 = vcombine.low %v634_v29, %v644_v31  ;;  %v1243_v10 = vrot.slane %v6539_v14, 5  ;;  %v6820_v31 = vld [vmem:[%s9213_s1 + $0xa] sm:$0x3] }
  0x69   : > { %v5095_v8 = vcombine.low %v1230_v30, %v1233_v49  ;;  %v1237_v9 = vsel %vm6736_vm7, %v5079_v51, %v1236_v40  ;;  %v1238_v12 = vrot.slane %v1236_v40, 4  ;;  %v5080_v26 = vrot.slane %v6531_v3, 9 }
  0x6a   : > { %5842 = vmatprep.mubr.msk.bf16.mxu0 %vm695_vm3, %v5094_v19  ;;  %5803 = vmatmul.mubr.msk.bf16.gmra.mxu1 %vm695_vm3, %v5028_v15  ;;  %v5081_v63 = vrot.slane %v6580_v2, 9  ;;  %v1250_v0 = vrot.slane %v6585_v18, 5  ;;  %v9307_v23 = vcombine.low %v6415_v6, %v6418_v7  ;;  %v1245_v62 = vrot.slane %v1243_v10, 4 }
  0x6b   : > { %v1240_v27 = vsel %vm6736_vm7, %v1238_v12, %v1239_v42  ;;  %v1246_v35 = vrot.slane %v6550_v28, 5  ;;  %v1253_v5 = vrot.slane %v6593_v38, 5  ;;  %v2487_v29 = vsel %vm744_vm0, %v6513_v43, 0  ;;  %v6805_v38 = vld [vmem:[%s9213_s1 + $0xc] sm:$0x3] }
  0x6c   : > { %5808 = vmatprep.mubr.msk.bf16.mxu1 %vm695_vm3, %v9307_v23  ;;  %v5096_v58 = vcombine.low %v1237_v9, %v1240_v27  ;;  %v1252_v37 = vrot.slane %v1250_v0, 4  ;;  %v1257_v1 = vrot.slane %v6622_v33, 5  ;;  %v1809_v6 = vsel %vm744_vm0, %v6545_v22, 0 }
  0x6d   : > { %v1244_v7 = vsel %vm6736_vm7, %v5080_v26, %v1243_v10  ;;  %v1251_v60 = vsel %vm6736_vm7, %v5081_v63, %v1250_v0  ;;  %v1264_v28 = vrot.slane %v6662_v56, 5  ;;  %v1247_v43 = vsel %vm6736_vm7, %v1245_v62, %v1246_v35 }
  0x6e   : > { %5843 = vmatmul.mubr.msk.bf16.vlgmr.msra.gmra.mxu0 %vm695_vm3, %v5095_v8  ;;  %v1254_v22 = vsel %vm6736_vm7, %v1252_v37, %v1253_v5  ;;  %v5082_v30 = vrot.slane %v6617_v20, 9  ;;  %v1260_v45 = vrot.slane %v6631_v52, 5  ;;  %v1259_v41 = vrot.slane %v1257_v1, 4 }
  0x6f   : > { %5909 = vmatpush3.bf16.msra.mxu0 %v2487_v29  ;;  %5846 = vmatprep.mubr.msk.bf16.mxu0 %vm695_vm3, %v5096_v58  ;;  %v5083_v21 = vrot.slane %v6652_v53, 9  ;;  %v1266_v49 = vrot.slane %v1264_v28, 4  ;;  %v1267_v51 = vrot.slane %v6668_v50, 5  ;;  %v5097_v52 = vcombine.low %v1244_v7, %v1247_v43  ;;  %v9308_v29 = vld [vmem:[#allocation14_spill] sm:$0xff] }
  0x70   : > { %6087 = vmatprep.subr.msk.bf16.mxu0 %vm744_vm0, %v6805_v38  ;;  %v5098_v19 = vcombine.low %v1251_v60, %v1254_v22  ;;  %v1258_v8 = vsel %vm6736_vm7, %v5082_v30, %v1257_v1  ;;  %v1261_v50 = vsel %vm6736_vm7, %v1259_v41, %v1260_v45  ;;  %v1271_v42 = vrot.slane %v6700_v61, 5  ;;  %v9309_v30 = vld [vmem:[#allocation15_spill] sm:$0xff]  ;;  %v9310_v41 = vld [vmem:[#allocation17_spill] sm:$0xff] }
  0x71   : > { %v1265_v40 = vsel %vm6736_vm7, %v5083_v21, %v1264_v28  ;;  %v1268_v15 = vsel %vm6736_vm7, %v1266_v49, %v1267_v51  ;;  %v5085_v9 = vrot.slane %v6428_v13, 9  ;;  %v1278_v12 = vrot.slane %v6433_v16, 5  ;;  %v9311_v21 = vld [vmem:[#allocation16_spill] sm:$0xff]  ;;  %v7033_v49 = vld [vmem:[%s6406_s9 + $0x2c] sm:$0x1] }
  0x72   : > { %5809 = vmatmul.mubr.msk.bf16.vlgmr.msra.gmra.mxu1 %vm695_vm3, %v5046_v57  ;;  %v1281_v57 = vrot.slane %v6436_v17, 5  ;;  %v5048_v10 = vcombine.low %v6531_v3, %v6539_v14  ;;  %v5049_v26 = vcombine.low %v6580_v2, %v6585_v18  ;;  %v5050_v63 = vcombine.low %v6617_v20, %v6622_v33 }
  0x73   : > { %5875 = vmatpush3.bf16.msra.mxu1 %v1809_v6  ;;  %5812 = vmatprep.mubr.msk.bf16.mxu1 %vm695_vm3, %v5047_v54  ;;  %v5084_v54 = vrot.slane %v6693_v36, 9  ;;  %v5051_v0 = vcombine.low %v6652_v53, %v6662_v56  ;;  %v5099_v17 = vcombine.low %v1258_v8, %v1261_v50  ;;  %v5100_v23 = vcombine.low %v1265_v40, %v1268_v15  ;;  %v9312_v8 = vld [vmem:[#allocation18_spill] sm:$0xff] }
  0x74   : > { %6086 = vmatprep.subr.msk.bf16.mxu1 %vm744_vm0, %v6820_v31  ;;  %v1274_v27 = vrot.slane %v6703_v48, 5  ;;  %v1273_v3 = vrot.slane %v1271_v42, 4  ;;  %v5088_v14 = vrot.slane %v6557_v39, 9  ;;  %v1299_v2 = vrot.slane %v6564_v46, 5 }
  0x75   : > { %v1302_v18 = vrot.slane %v6572_v55, 5  ;;  %v1272_v20 = vsel %vm6736_vm7, %v5084_v54, %v1271_v42  ;;  %v1279_v33 = vsel %vm6736_vm7, %v5085_v9, %v1278_v12  ;;  %v1280_v53 = vrot.slane %v1278_v12, 4  ;;  %v9313_v54 = vld [vmem:[#allocation19_spill] sm:$0xff] }
  0x76   : > { %5847 = vmatmul.mubr.msk.bf16.gmra.mxu0 %vm695_vm3, %v5097_v52  ;;  %v6866_v56 = vsel %vm6736_vm7, %v5088_v14, %v1299_v2  ;;  %v1301_v35 = vrot.slane %v1299_v2, 4  ;;  %v5089_v5 = vrot.slane %v6598_v44, 9  ;;  %v1306_v55 = vrot.slane %v6603_v4, 5 }
  0x77   : > { %5850 = vmatprep.mubr.msk.bf16.mxu0 %vm695_vm3, %v5098_v19  ;;  %v1285_v58 = vrot.slane %v6473_v59, 5  ;;  %v1309_v37 = vrot.slane %v6612_v11, 5  ;;  %v5090_v6 = vrot.slane %v9308_v29, 9  ;;  %v1275_v7 = vsel %vm6736_vm7, %v1273_v3, %v1274_v27  ;;  %v9314_v3 = vld [vmem:[#allocation12_spill] sm:$0xff]  ;;  %v7039_v11 = vld [vmem:[%s6406_s9 + $0x40] sm:$0xf] }
  0x78   : > { %v6880_v60 = vsel %vm6736_vm7, %v1301_v35, %v1302_v18  ;;  %v6884_v28 = vsel %vm6736_vm7, %v5089_v5, %v1306_v55  ;;  %v1308_v43 = vrot.slane %v1306_v55, 4  ;;  %v1313_v22 = vrot.slane %v6643_v34, 5  ;;  %9322 = vst [vmem:[#allocation16_spill] sm:$0xff] %v7039_v11 }
  0x79   : > { %v1316_v45 = vrot.slane %v9309_v30, 5  ;;  %v5091_v52 = vrot.slane %v9311_v21, 9  ;;  %v1320_v19 = vrot.slane %v9310_v41, 5  ;;  %v1323_v50 = vrot.slane %v9312_v8, 5  ;;  %v9318_v8 = vld [vmem:[#allocation13_spill] sm:$0xff] }
  0x7a   : > { %5813 = vmatmul.mubr.msk.bf16.gmra.mxu1 %vm695_vm3, %v5048_v10  ;;  %v6894_v51 = vsel %vm6736_vm7, %v1308_v43, %v1309_v37  ;;  %v6904_v15 = vsel %vm6736_vm7, %v5090_v6, %v1313_v22  ;;  %v1315_v42 = vrot.slane %v1313_v22, 4  ;;  %v1282_v27 = vsel %vm6736_vm7, %v1280_v53, %v1281_v57  ;;  %v9316_v43 = vld [vmem:[#allocation10_spill] sm:$0xff] }
  0x7b   : > { %5816 = vmatprep.mubr.msk.bf16.mxu1 %vm695_vm3, %v5049_v26  ;;  %v6911_v12 = vsel %vm6736_vm7, %v5091_v52, %v1320_v19  ;;  %v1322_v10 = vrot.slane %v1320_v19, 4  ;;  %v5092_v26 = vrot.slane %v9313_v54, 9  ;;  %v1292_v14 = vrot.slane %v9314_v3, 5 }
  0x7c   : > { %v6920_v2 = vsel %vm6736_vm7, %v1315_v42, %v1316_v45  ;;  %v5101_v5 = vcombine.low %v1272_v20, %v1275_v7  ;;  %v5102_v37 = vcombine.low %v1279_v33, %v1282_v27  ;;  %v1287_v6 = vrot.slane %v1285_v58, 4  ;;  %v9317_v45 = vld [vmem:[#allocation11_spill] sm:$0xff]  ;;  %v6956_v42 = vld [vmem:[%s6406_s9 + $0x10] sm:$0xf]  ;;  %v6972_v27 = vld [vmem:[%s6406_s9 + $0x14] sm:$0x1] }
  0x7d   : > { %v6928_v35 = vsel %vm6736_vm7, %v1322_v10, %v1323_v50  ;;  %v1288_v22 = vrot.slane %v9316_v43, 5  ;;  %v5087_v52 = vrot.slane %v9317_v45, 9  ;;  %v1294_v19 = vrot.slane %v1292_v14, 4  ;;  %v6950_v7 = vld [vmem:[%s6406_s9 + $0xc] sm:$0xf]  ;;  %9319 = vst [vmem:[#allocation14_spill] sm:$0xff] %v6972_v27 }
  0x7e   : > { %5851 = vmatmul.mubr.msk.bf16.gmra.mxu0 %vm695_vm3, %v5099_v17  ;;  %v1327_v17 = vrot.slane %v6717_v47, 5  ;;  %v5052_v33 = vcombine.low %v6693_v36, %v6700_v61  ;;  %v5053_v50 = vcombine.low %v6428_v13, %v6433_v16  ;;  %v2005_v13 = vshrl.u32 %v6950_v7, 16 }
  0x7f   : > { %5854 = vmatprep.mubr.msk.bf16.mxu0 %vm695_vm3, %v5100_v23  ;;  %v1330_v23 = vrot.slane %v6727_v24, 5  ;;  %v9315_v24 = vld [vmem:[#allocation9_spill] sm:$0xff]  ;;  %v1293_v36 = vsel %vm6736_vm7, %v5087_v52, %v1292_v14  ;;  %v2008_v16 = vshll.u32 %v6950_v7, 16  ;;  %v2024_v43 = vshll.u32 %v6972_v27, 16  ;;  %v6988_v52 = vld [vmem:[%s6406_s9 + $0x28] sm:$0xf] }
  0x80   : > { %v6932_v57 = vsel %vm6736_vm7, %v5092_v26, %v1327_v17  ;;  %v1329_v53 = vrot.slane %v1327_v17, 4  ;;  %v5086_v55 = vrot.slane %v9315_v24, 9  ;;  %v1289_v26 = vsel %vm6736_vm7, %v1287_v6, %v1288_v22 }
  0x81   : > { %v2018_v17 = vshrl.u32 %v6956_v42, 16  ;;  %v2010_v6 = vrot.slane %v2008_v16, 5  ;;  %v9325_v27 = vcombine.low %v6884_v28, %v6894_v51  ;;  %v9326_v28 = vcombine.low %v6557_v39, %v6564_v46 }
  0x82   : > { %5817 = vmatmul.mubr.msk.bf16.gmra.mxu1 %vm695_vm3, %v5050_v63  ;;  %v6941_v30 = vsel %vm6736_vm7, %v1329_v53, %v1330_v23  ;;  %v1286_v10 = vsel %vm6736_vm7, %v5086_v55, %v1285_v58  ;;  %v6975_v58 = vld [vmem:[%s6406_s9 + $0x18] sm:$0xf]  ;;  %v2014_v23 = vshll.u32 %v6956_v42, 16  ;;  %v6983_v55 = vld [vmem:[%s6406_s9 + $0x24] sm:$0xf] }
  0x83   : > { %5820 = vmatprep.mubr.msk.bf16.mxu1 %vm695_vm3, %v5051_v0  ;;  %v1295_v0 = vrot.slane %v9318_v8, 5  ;;  %v5103_v14 = vcombine.low %v1286_v10, %v1289_v26  ;;  %v2029_v22 = vshrl.u32 %v6975_v58, 16  ;;  %v5055_v8 = vcombine.low %v9317_v45, %v9314_v3 }
  0x84   : > { %v7000_v10 = vrot.slane %v2014_v23, 5  ;;  %v2032_v26 = vshll.u32 %v6975_v58, 16  ;;  %v2053_v3 = vshrl.u32 %v6983_v55, 16  ;;  %v2056_v45 = vshll.u32 %v6983_v55, 16  ;;  %v7018_v23 = vld [vmem:[%s6406_s9 + $0x20] sm:$0x1] }
  0x85   : > { %v1296_v61 = vsel %vm6736_vm7, %v1294_v19, %v1295_v0  ;;  %v5054_v19 = vcombine.low %v9315_v24, %v6473_v59  ;;  %v7006_v24 = vld [vmem:[%s6406_s9 + $0x34] sm:$0xf]  ;;  %9320 = vst [vmem:[#allocation15_spill] sm:$0xff] %v7018_v23  ;;  %v2031_v0 = vrot.slane %v2029_v22, 4  ;;  %v2048_v40 = vshll.u32 %v7018_v23, 16 }
  0x86   : > { %5855 = vmatmul.mubr.msk.bf16.gmra.mxu0 %vm695_vm3, %v5101_v5  ;;  %v5104_v53 = vcombine.low %v1293_v36, %v1296_v61  ;;  %v6980_v5 = vld [vmem:[%s6406_s9 + $0x1c] sm:$0xf]  ;;  %v2066_v61 = vshrl.u32 %v6988_v52, 16  ;;  %v2090_v20 = vshrl.u32 %v7006_v24, 16  ;;  %v2055_v1 = vrot.slane %v2053_v3, 4 }
  0x87   : > { %5858 = vmatprep.mubr.msk.bf16.mxu0 %vm695_vm3, %v5102_v37  ;;  %v2007_v37 = vrot.slane %v2005_v13, 4  ;;  %v2042_v36 = vshrl.u32 %v6980_v5, 16  ;;  %v2038_v59 = vshll.u32 %v6980_v5, 16  ;;  %v2062_v13 = vshll.u32 %v6988_v52, 16 }
  0x88   : > { %v2058_v63 = vrot.slane %v2056_v45, 5  ;;  %v2068_v48 = vrot.slane %v2066_v61, 4  ;;  %v2092_v3 = vrot.slane %v2090_v20, 4  ;;  %v9324_v45 = vcombine.low %v6866_v56, %v6880_v60 }
  0x89   : > { %v2011_v16 = vor.u32 %v2010_v6, %v2007_v37  ;;  %v2086_v37 = vshll.u32 %v7006_v24, 16  ;;  %v7026_v6 = vld [vmem:[%s6406_s9 + $0x3c] sm:$0xf]  ;;  %v7030_v22 = vrot.slane %v2038_v59, 5  ;;  %v7035_v18 = vrot.slane %v2062_v13, 5 }
  0x8a   : > { %5821 = vmatmul.mubr.msk.bf16.gmra.mxu1 %vm695_vm3, %v5052_v33  ;;  %v2020_v33 = vrot.slane %v2018_v17, 4  ;;  %v7013_v17 = vrot.slane %v2024_v43, 5  ;;  %9321 = vst [vmem:[#allocation17_spill] sm:$0xff] %v7026_v6  ;;  %v2072_v23 = vshll.u32 %v7033_v49, 16  ;;  %v2110_v56 = vshll.u32 %v7039_v11, 16 }
  0x8b   : > { %5824 = vmatprep.mubr.msk.bf16.mxu1 %vm695_vm3, %v5053_v50  ;;  %v6997_v50 = vld [vmem:[%s6406_s9 + $0x30] sm:$0xf]  ;;  %v2012_v62 = vrot.slane %v2011_v16, 4  ;;  %v7046_v25 = vrot.slane %v2086_v37, 5  ;;  %v2069_v20 = vor.u32 %v2068_v48, %v7035_v18  ;;  %v7063_v60 = vsel %vm744_vm0, %v6820_v31, 0 }
  0x8c   : > { %v2080_v9 = vshll.u32 %v6997_v50, 16  ;;  %v2021_v43 = vor.u32 %v2020_v33, %v7000_v10  ;;  %v2104_v33 = vshll.u32 %v7026_v6, 16  ;;  %v7075_v31 = vld [vmem:[%s6406_s9 + $0x48] sm:$0xf] }
  0x8d   : > { %v2017_v48 = vsel %vm6451_vm4, %v2012_v62, %v7000_v10  ;;  %9327 = vst [vmem:[#allocation19_spill] sm:$0xff] %v7075_v31  ;;  %v7085_v62 = vld [vmem:[%s6406_s9 + $0x4c] sm:$0xf]  ;;  %v2070_v10 = vrot.slane %v2069_v20, 4  ;;  %v7107_v20 = vsel %vm744_vm0, %v6805_v38, 0 }
  0x8e   : > { %5859 = vmatmul.mubr.msk.bf16.gmra.mxu0 %vm695_vm3, %v5103_v14  ;;  %v2034_v14 = vrot.slane %v2032_v26, 5  ;;  %v7044_v26 = vld [vmem:[%s6406_s9 + $0x38] sm:$0x1]  ;;  %v2022_v61 = vrot.slane %v2021_v43, 4  ;;  %v2106_v37 = vrot.slane %v2104_v33, 5  ;;  %9329 = vst [vmem:[#allocation12_spill] sm:$0xff] %v7085_v62 }
  0x8f   : > { %5862 = vmatprep.mubr.msk.bf16.mxu0 %vm695_vm3, %v5104_v53  ;;  %v2077_v53 = vshrl.u32 %v6997_v50, 16  ;;  %9323 = vst [vmem:[#allocation18_spill] sm:$0xff] %v7044_v26 }
  0x90   : > { %v2035_v13 = vor.u32 %v2034_v14, %v2031_v0  ;;  %v2096_v0 = vshll.u32 %v7044_v26, 16  ;;  %v2027_v39 = vsel %vm6451_vm4, %v2022_v61, %v7013_v17  ;;  %v2134_v61 = vshll.u32 %v7085_v62, 16  ;;  %v7419_v26 = vld [vmem:[%s6406_s9 + $0xc0] sm:$0xf] }
  0x91   : > { %v2079_v59 = vrot.slane %v2077_v53, 4  ;;  %v2114_v53 = vshrl.u32 %v7039_v11, 16 }
  0x92   : > { %5825 = vmatmul.mubr.msk.bf16.gmra.mxu1 %vm695_vm3, %v5054_v19  ;;  %v2044_v19 = vrot.slane %v2042_v36, 4  ;;  %v2082_v36 = vrot.slane %v2080_v9, 5  ;;  %v2059_v9 = vor.u32 %v2058_v63, %v2055_v1  ;;  %v2050_v1 = vrot.slane %v2048_v40, 5 }
  0x93   : > { %5828 = vmatprep.mubr.msk.bf16.mxu1 %vm695_vm3, %v5055_v8  ;;  %v2101_v8 = vshrl.u32 %v7026_v6, 16  ;;  %v2093_v63 = vor.u32 %v2092_v3, %v7046_v25  ;;  %v2036_v46 = vrot.slane %v2035_v13, 4  ;;  %v2116_v33 = vrot.slane %v2114_v53, 4 }
  0x94   : > { %v2045_v16 = vor.u32 %v2044_v19, %v7030_v22  ;;  %v2083_v51 = vor.u32 %v2082_v36, %v2079_v59  ;;  %v2074_v19 = vrot.slane %v2072_v23, 5  ;;  %v2060_v40 = vrot.slane %v2059_v9, 4  ;;  %v7090_v36 = vld [vmem:[%s6406_s9 + $0x44] sm:$0x1] }
  0x95   : > { %v2103_v14 = vrot.slane %v2101_v8, 4  ;;  %v7087_v8 = vrot.slane %v2110_v56, 5  ;;  %v2098_v59 = vrot.slane %v2096_v0, 5  ;;  %9330 = vst [vmem:[#allocation9_spill] sm:$0xff] %v7090_v36  ;;  %v2128_v3 = vshll.u32 %v7075_v31, 16 }
  0x96   : > { %5863 = vmatmul.mubr.msk.bf16.gmra.mxu0 %vm695_vm3, %v9324_v45  ;;  %v2046_v43 = vrot.slane %v2045_v16, 4  ;;  %v2084_v45 = vrot.slane %v2083_v51, 4  ;;  %v2094_v17 = vrot.slane %v2093_v63, 4  ;;  %v2138_v23 = vshrl.u32 %v7085_v62, 16  ;;  %v7139_v63 = vld [vmem:[%s6406_s9 + $0x54] sm:$0xf] }
  0x97   : > { %5866 = vmatprep.mubr.msk.bf16.mxu0 %vm695_vm3, %v9325_v27  ;;  %v9328_v27 = vcombine.low %v6598_v44, %v6603_v4  ;;  %v2107_v44 = vor.u32 %v2106_v37, %v2103_v14  ;;  %v2125_v4 = vshrl.u32 %v7075_v31, 16  ;;  %v9331_v13 = vcombine.low %v6904_v15, %v6920_v2  ;;  %9335 = vst [vmem:[#allocation11_spill] sm:$0xff] %v7139_v63 }
  0x98   : > { %v2041_v16 = vsel %vm6451_vm4, %v2036_v46, %v7030_v22  ;;  %v2051_v9 = vsel %vm6451_vm4, %v2046_v43, %v2050_v1  ;;  %v5177_v53 = vcombine.low %v6983_v55, %v6988_v52  ;;  %v9332_v56 = vcombine.low %v6911_v12, %v6928_v35  ;;  %v7125_v12 = vld [vmem:[%s6406_s9 + $0x50] sm:$0x1]  ;;  %v7154_v46 = vld [vmem:[%s6406_s9 + $0x58] sm:$0xf]  ;;  %v7157_v43 = vld [vmem:[%s6406_s9 + $0x60] sm:$0xf] }
  0x99   : > { %v2065_v15 = vsel %vm6451_vm4, %v2060_v40, %v7035_v18  ;;  %v2075_v2 = vsel %vm6451_vm4, %v2070_v10, %v2074_v19  ;;  %v2117_v22 = vor.u32 %v2116_v33, %v7087_v8  ;;  %v2120_v38 = vshll.u32 %v7090_v36, 16  ;;  %9333 = vst [vmem:[#allocation10_spill] sm:$0xff] %v7125_v12  ;;  %9337 = vst [vmem:[#allocation13_spill] sm:$0xff] %v7154_v46  ;;  %v7163_v10 = vld [vmem:[%s6406_s9 + $0x64] sm:$0xf] }
  0x9a   : > { %5829 = vmatmul.mubr.msk.bf16.gmra.mxu1 %vm695_vm3, %v9326_v28  ;;  %v5208_v0 = vcombine.low %v2017_v48, %v2027_v39  ;;  %v7122_v14 = vrot.slane %v2107_v44, 4  ;;  %v2127_v35 = vrot.slane %v2125_v4, 4  ;;  %v2130_v37 = vrot.slane %v2128_v3, 5  ;;  %9338 = vst [vmem:[#allocation21_spill] sm:$0xff] %v7157_v43  ;;  %9339 = vst [vmem:[#allocation22_spill] sm:$0xff] %v7163_v10 }
  0x9b   : > { %5832 = vmatprep.mubr.msk.bf16.mxu1 %vm695_vm3, %v9328_v27  ;;  %v9334_v28 = vcombine.low %v9308_v29, %v6643_v34  ;;  %v2089_v18 = vsel %vm6451_vm4, %v2084_v45, %v7046_v25  ;;  %v2099_v48 = vsel %vm6451_vm4, %v2094_v17, %v2098_v59  ;;  %v7136_v1 = vrot.slane %v2134_v61, 5  ;;  %v7173_v3 = vld [vmem:[%s6406_s9 + $0x6c] sm:$0xf]  ;;  %v7385_v36 = vld [vmem:[%s6406_s9 + $0xb8] sm:$0xf] }
  0x9c   : > { %v2140_v51 = vrot.slane %v2138_v23, 4  ;;  %v9336_v27 = vcombine.low %v9311_v21, %v9310_v41  ;;  %v7145_v34 = vcombine.low %v2041_v16, %v2051_v9  ;;  %v7147_v29 = vcombine.low %v2065_v15, %v2075_v2 }
  0x9d   : > { %v2118_v19 = vrot.slane %v2117_v22, 4  ;;  %v2122_v41 = vrot.slane %v2120_v38, 5  ;;  %v2144_v40 = vshll.u32 %v7125_v12, 16  ;;  %v7165_v33 = vcombine.low %v2089_v18, %v2099_v48 }
  0x9e   : > { %5867 = vmatmul.mubr.msk.bf16.gmra.mxu0 %vm695_vm3, %v9331_v13  ;;  %v2113_v59 = vsel %vm6451_vm4, %v7122_v14, %v7087_v8  ;;  %v2131_v44 = vor.u32 %v2130_v37, %v2127_v35  ;;  %v2149_v4 = vshrl.u32 %v7139_v63, 16  ;;  %v2141_v45 = vor.u32 %v2140_v51, %v7136_v1  ;;  %v7180_v13 = vld [vmem:[%s6406_s9 + $0x70] sm:$0xf]  ;;  %v7200_v14 = vld [vmem:[%s6406_s9 + $0x5c] sm:$0x1] }
  0x9f   : > { %5870 = vmatprep.mubr.msk.bf16.mxu0 %vm695_vm3, %v9332_v56  ;;  %v2152_v17 = vshll.u32 %v7139_v63, 16  ;;  %v2162_v23 = vshrl.u32 %v7154_v46, 16  ;;  %v2158_v61 = vshll.u32 %v7154_v46, 16  ;;  %v9340_v16 = vcombine.low %v6932_v57, %v6941_v30  ;;  %9341 = vst [vmem:[#allocation23_spill] sm:$0xff] %v7200_v14 }
  0xa0   : > { %v2173_v8 = vshrl.u32 %v7157_v43, 16  ;;  %v2176_v9 = vshll.u32 %v7157_v43, 16  ;;  %v2186_v56 = vshrl.u32 %v7163_v10, 16  ;;  %v2182_v15 = vshll.u32 %v7163_v10, 16 }
  0xa1   : > { %v2123_v2 = vsel %vm6451_vm4, %v2118_v19, %v2122_v41  ;;  %v7193_v22 = vrot.slane %v2144_v40, 5  ;;  %v2197_v57 = vshrl.u32 %v7173_v3, 16  ;;  %v2200_v30 = vshll.u32 %v7173_v3, 16  ;;  %v7216_v41 = vld [vmem:[%s6406_s9 + $0x7c] sm:$0xf] }
  0xa2   : > { %5833 = vmatmul.mubr.msk.bf16.gmra.mxu1 %vm695_vm3, %v9334_v28  ;;  %v7197_v38 = vrot.slane %v2131_v44, 4  ;;  %v2151_v35 = vrot.slane %v2149_v4, 4  ;;  %v2210_v37 = vshrl.u32 %v7180_v13, 16  ;;  %v7205_v28 = vld [vmem:[%s6406_s9 + $0x78] sm:$0xf]  ;;  %v9342_v18 = vcombine.low %v9313_v54, %v6717_v47 }
  0xa3   : > { %5836 = vmatprep.mubr.msk.bf16.mxu1 %vm695_vm3, %v9336_v27  ;;  %v7211_v48 = vrot.slane %v2141_v45, 4  ;;  %v2154_v51 = vrot.slane %v2152_v17, 5  ;;  %v7213_v27 = vrot.slane %v2158_v61, 5  ;;  %v2164_v19 = vrot.slane %v2162_v23, 4  ;;  %v7223_v44 = vld [vmem:[%s6406_s9 + $0x68] sm:$0x1] }
  0xa4   : > { %v9343_v40 = vcombine.low %v6950_v7, %v6956_v42  ;;  %9344 = vst [vmem:[#allocation24_spill] sm:$0xff] %v7223_v44  ;;  %v2175_v4 = vrot.slane %v2173_v8, 4  ;;  %v2178_v47 = vrot.slane %v2176_v9, 5  ;;  %v7225_v54 = vrot.slane %v2182_v15, 5  ;;  %v7230_v61 = vld [vmem:[%s6406_s9 + $0x74] sm:$0x1] }
  0xa5   : > { %v2199_v45 = vrot.slane %v2197_v57, 4  ;;  %v2221_v17 = vshrl.u32 %v7205_v28, 16  ;;  %v2224_v23 = vshll.u32 %v7205_v28, 16  ;;  %9345 = vst [vmem:[#allocation25_spill] sm:$0xff] %v7230_v61  ;;  %v2212_v39 = vrot.slane %v2210_v37, 4 }
  0xa6   : > { %5871 = vmatmul.mubr.msk.bf16.gmra.mxu0 %vm695_vm3, %v9340_v16  ;;  %v2188_v16 = vrot.slane %v2186_v56, 4  ;;  %v2230_v25 = vshll.u32 %v7216_v41, 16  ;;  %v2155_v8 = vor.u32 %v2154_v51, %v2151_v35  ;;  %v2165_v9 = vor.u32 %v2164_v19, %v7213_v27  ;;  %v7242_v57 = vld [vmem:[%s9213_s1 + $0x10] sm:$0x3]  ;;  %v7260_v19 = vld [vmem:[%s6406_s9 + $0x84] sm:$0xf] }
  0xa7   : > { %5910 = vmatprep.mubr.msk.bf16.mxu0 %vm695_vm3, %v5208_v0  ;;  %v2206_v0 = vshll.u32 %v7180_v13, 16  ;;  %v2168_v56 = vshll.u32 %v7200_v14, 16  ;;  %v2192_v15 = vshll.u32 %v7223_v44, 16  ;;  %v2137_v35 = vsel %vm6451_vm4, %v7197_v38, %v7136_v1 }
  0xa8   : > { %v2179_v37 = vor.u32 %v2178_v47, %v2175_v4  ;;  %v2226_v51 = vrot.slane %v2224_v23, 5  ;;  %v7263_v4 = vrot.slane %v2230_v25, 5  ;;  %v7266_v47 = vld [vmem:[%s6406_s9 + $0x88] sm:$0xf]  ;;  %v2245_v23 = vshrl.u32 %v7260_v19, 16 }
  0xa9   : > { %v7232_v21 = vrot.slane %v2206_v0, 5  ;;  %v2189_v0 = vor.u32 %v2188_v16, %v7225_v54  ;;  %v2170_v25 = vrot.slane %v2168_v56, 5  ;;  %v2194_v16 = vrot.slane %v2192_v15, 5 }
  0xaa   : > { %5837 = vmatmul.mubr.msk.bf16.gmra.mxu1 %vm695_vm3, %v9342_v18  ;;  %v2202_v18 = vrot.slane %v2200_v30, 5  ;;  %v5212_v30 = vcombine.low %v2113_v59, %v2123_v2  ;;  %v2216_v59 = vshll.u32 %v7230_v61, 16  ;;  %v2223_v2 = vrot.slane %v2221_v17, 4 }
  0xab   : > { %5876 = vmatprep.mubr.msk.bf16.mxu1 %vm695_vm3, %v9343_v40  ;;  %v2234_v40 = vshrl.u32 %v7216_v41, 16  ;;  %v2213_v38 = vor.u32 %v2212_v39, %v7232_v21  ;;  %v2166_v39 = vrot.slane %v2165_v9, 4  ;;  %v2190_v17 = vrot.slane %v2189_v0, 4  ;;  %v7320_v0 = vld [vmem:[%s6406_s9 + $0x90] sm:$0xf] }
  0xac   : > { %v2203_v1 = vor.u32 %v2202_v18, %v2199_v45  ;;  %v7280_v45 = vld [vmem:[%s6406_s9 + $0x80] sm:$0x1]  ;;  %v2180_v18 = vrot.slane %v2179_v37, 4  ;;  %v2258_v9 = vshrl.u32 %v7266_v47, 16  ;;  %v2254_v56 = vshll.u32 %v7266_v47, 16 }
  0xad   : > { %9347 = vst [vmem:[#allocation26_spill] sm:$0xff] %v7280_v45  ;;  %v2214_v15 = vrot.slane %v2213_v38, 4  ;;  %v2240_v37 = vshll.u32 %v7280_v45, 16  ;;  %v2195_v38 = vsel %vm6451_vm4, %v2190_v17, %v2194_v16  ;;  %v7328_v17 = vld [vmem:[%s6406_s9 + $0x94] sm:$0xf] }
  0xae   : > { %5911 = vmatmul.mubr.msk.bf16.vlgmr.msra.gmra.mxu0 %vm695_vm3, %v7145_v34  ;;  %v2147_v34 = vsel %vm6451_vm4, %v7211_v48, %v7193_v22  ;;  %v9346_v22 = vcombine.low %v6975_v58, %v6980_v5  ;;  %v2156_v48 = vrot.slane %v2155_v8, 4  ;;  %v2227_v8 = vor.u32 %v2226_v51, %v2223_v2  ;;  %v7379_v45 = vld [vmem:[%s6406_s9 + $0xb4] sm:$0xf] }
  0xaf   : > { %5977 = vmatpush3.bf16.msra.mxu0 %v7107_v20  ;;  %5914 = vmatprep.mubr.msk.bf16.mxu0 %vm695_vm3, %v7147_v29  ;;  %v2236_v20 = vrot.slane %v2234_v40, 4  ;;  %v7271_v29 = vld [vmem:[%s9213_s1 + $0xe] sm:$0x3]  ;;  %v2248_v40 = vshll.u32 %v7260_v19, 16  ;;  %v2171_v2 = vsel %vm6451_vm4, %v2166_v39, %v2170_v25  ;;  %v5213_v39 = vcombine.low %v2137_v35, %v2147_v34 }
  0xb0   : > { %6089 = vmatprep.subr.msk.bf16.mxu0 %vm744_vm0, %v7242_v57  ;;  %v7315_v25 = vrot.slane %v2227_v8, 4  ;;  %v2260_v51 = vrot.slane %v2258_v9, 4  ;;  %v9349_v35 = vcombine.low %v6997_v50, %v7006_v24  ;;  %v7344_v8 = vld [vmem:[%s6406_s9 + $0xa0] sm:$0xf]  ;;  %v9350_v9 = vcombine.low %v7026_v6, %v7039_v11 }
  0xb1   : > { %v9353_v11 = vcombine.low %v7139_v63, %v7154_v46 }
  0xb2   : > { %5877 = vmatmul.mubr.msk.bf16.vlgmr.msra.gmra.mxu1 %vm695_vm3, %v9346_v22  ;;  %v2218_v22 = vrot.slane %v2216_v59, 5  ;;  %v2161_v59 = vsel %vm6451_vm4, %v2156_v48, %v7213_v27  ;;  %v2247_v27 = vrot.slane %v2245_v23, 4  ;;  %v2250_v48 = vrot.slane %v2248_v40, 5 }
  0xb3   : > { %5943 = vmatpush3.bf16.msra.mxu1 %v7063_v60  ;;  %5880 = vmatprep.mubr.msk.bf16.mxu1 %vm695_vm3, %v5177_v53  ;;  %v2204_v60 = vrot.slane %v2203_v1, 4  ;;  %v2237_v53 = vor.u32 %v2236_v20, %v7263_v4  ;;  %v2185_v1 = vsel %vm6451_vm4, %v2180_v18, %v7225_v54  ;;  %v7312_v20 = vld [vmem:[%s6406_s9 + $0x8c] sm:$0x1]  ;;  %v5214_v34 = vcombine.low %v2161_v59, %v2171_v2 }
  0xb4   : > { %6088 = vmatprep.subr.msk.bf16.mxu1 %vm744_vm0, %v7271_v29  ;;  %9348 = vst [vmem:[#allocation27_spill] sm:$0xff] %v7312_v20  ;;  %v2219_v16 = vsel %vm6451_vm4, %v2214_v15, %v2218_v22  ;;  %v7334_v23 = vcombine.low %v2185_v1, %v2195_v38  ;;  %v7341_v22 = vld [vmem:[%s6406_s9 + $0x9c] sm:$0xf]  ;;  %v2269_v15 = vshrl.u32 %v7320_v0, 16  ;;  %v2233_v2 = vsel %vm6451_vm4, %v7315_v25, %v7263_v4 }
  0xb5   : > { %v2209_v54 = vsel %vm6451_vm4, %v2204_v60, %v7232_v21  ;;  %v2238_v18 = vrot.slane %v2237_v53, 4  ;;  %v2264_v60 = vshll.u32 %v7312_v20, 16  ;;  %v2272_v53 = vshll.u32 %v7320_v0, 16 }
  0xb6   : > { %5915 = vmatmul.mubr.msk.bf16.gmra.mxu0 %vm695_vm3, %v7165_v33  ;;  %v7317_v33 = vrot.slane %v2254_v56, 5  ;;  %v2251_v56 = vor.u32 %v2250_v48, %v2247_v27  ;;  %v5216_v59 = vcombine.low %v2209_v54, %v2219_v16  ;;  %v2282_v38 = vshrl.u32 %v7328_v17, 16  ;;  %v7368_v54 = vld [vmem:[%s6406_s9 + $0xac] sm:$0xf]  ;;  %v7371_v16 = vld [vmem:[%s6406_s9 + $0x98] sm:$0x1] }
  0xb7   : > { %5918 = vmatprep.mubr.msk.bf16.mxu0 %vm695_vm3, %v5212_v30  ;;  %v2242_v30 = vrot.slane %v2240_v37, 5  ;;  %v7354_v37 = vld [vmem:[%s6406_s9 + $0xa8] sm:$0xf]  ;;  %v2278_v48 = vshll.u32 %v7328_v17, 16  ;;  %9351 = vst [vmem:[#allocation28_spill] sm:$0xff] %v7371_v16  ;;  %v2306_v4 = vshrl.u32 %v7344_v8, 16 }
  0xb8   : > { %v2261_v1 = vor.u32 %v2260_v51, %v7317_v33  ;;  %v2302_v51 = vshll.u32 %v7344_v8, 16  ;;  %v2317_v25 = vshrl.u32 %v7354_v37, 16  ;;  %v2320_v21 = vshll.u32 %v7354_v37, 16 }
  0xb9   : > { %v2243_v27 = vsel %vm6451_vm4, %v2238_v18, %v2242_v30  ;;  %v2252_v18 = vrot.slane %v2251_v56, 4  ;;  %v2266_v30 = vrot.slane %v2264_v60, 5  ;;  %v2271_v40 = vrot.slane %v2269_v15, 4 }
  0xba   : > { %5881 = vmatmul.mubr.msk.bf16.gmra.mxu1 %vm695_vm3, %v9349_v35  ;;  %v2293_v35 = vshrl.u32 %v7341_v22, 16  ;;  %v2274_v20 = vrot.slane %v2272_v53, 5  ;;  %v2262_v61 = vrot.slane %v2261_v1, 4  ;;  %v2284_v44 = vrot.slane %v2282_v38, 4 }
  0xbb   : > { %5884 = vmatprep.mubr.msk.bf16.mxu1 %vm695_vm3, %v9350_v9  ;;  %v2296_v9 = vshll.u32 %v7341_v22, 16  ;;  %v2330_v14 = vshrl.u32 %v7368_v54, 16  ;;  %v2326_v12 = vshll.u32 %v7368_v54, 16  ;;  %v7387_v6 = vrot.slane %v2278_v48, 5  ;;  %v7401_v48 = vld [vmem:[%s6406_s9 + $0xa4] sm:$0x1] }
  0xbc   : > { %v2295_v56 = vrot.slane %v2293_v35, 4  ;;  %v9352_v15 = vcombine.low %v7075_v31, %v7085_v62  ;;  %v2308_v53 = vrot.slane %v2306_v4, 4  ;;  %v2319_v1 = vrot.slane %v2317_v25, 4  ;;  %9354 = vst [vmem:[#allocation29_spill] sm:$0xff] %v7401_v48  ;;  %v7416_v62 = vld [vmem:[%s6406_s9 + $0xb0] sm:$0x1] }
  0xbd   : > { %v2298_v60 = vrot.slane %v2296_v9, 5  ;;  %v2322_v38 = vrot.slane %v2320_v21, 5  ;;  %v2341_v35 = vshrl.u32 %v7379_v45, 16  ;;  %v2344_v9 = vshll.u32 %v7379_v45, 16  ;;  %9355 = vst [vmem:[#allocation30_spill] sm:$0xff] %v7416_v62 }
  0xbe   : > { %5919 = vmatmul.mubr.msk.bf16.gmra.mxu0 %vm695_vm3, %v5213_v39  ;;  %v2288_v39 = vshll.u32 %v7371_v16, 16  ;;  %v2350_v4 = vshll.u32 %v7385_v36, 16  ;;  %v2257_v21 = vsel %vm6451_vm4, %v2252_v18, %v7317_v33  ;;  %v7410_v25 = vrot.slane %v2326_v12, 5  ;;  %v7424_v18 = vld [vmem:[%s6406_s9 + $0xc4] sm:$0xf] }
  0xbf   : > { %5922 = vmatprep.mubr.msk.bf16.mxu0 %vm695_vm3, %v5214_v34  ;;  %v7394_v34 = vrot.slane %v2302_v51, 5  ;;  %v5217_v51 = vcombine.low %v2233_v2, %v2243_v27  ;;  %v2332_v16 = vrot.slane %v2330_v14, 4  ;;  %v2275_v63 = vor.u32 %v2274_v20, %v2271_v40 }
  0xc0   : > { %v2285_v46 = vor.u32 %v2284_v44, %v7387_v6  ;;  %v2290_v31 = vrot.slane %v2288_v39, 5  ;;  %v2299_v2 = vor.u32 %v2298_v60, %v2295_v56  ;;  %v2312_v33 = vshll.u32 %v7401_v48, 16  ;;  %v7434_v39 = vld [vmem:[%s6406_s9 + $0xbc] sm:$0x1] }
  0xc1   : > { %v2309_v27 = vor.u32 %v2308_v53, %v7394_v34  ;;  %v2323_v12 = vor.u32 %v2322_v38, %v2319_v1  ;;  %v2343_v14 = vrot.slane %v2341_v35, 4  ;;  %v7428_v44 = vrot.slane %v2350_v4, 5 }
  0xc2   : > { %5885 = vmatmul.mubr.msk.bf16.gmra.mxu1 %vm695_vm3, %v9352_v15  ;;  %v2354_v15 = vshrl.u32 %v7385_v36, 16  ;;  %v2333_v40 = vor.u32 %v2332_v16, %v7410_v25  ;;  %v2365_v56 = vshrl.u32 %v7419_v26, 16  ;;  %v2368_v60 = vshll.u32 %v7419_v26, 16 }
  0xc3   : > { %5888 = vmatprep.mubr.msk.bf16.mxu1 %vm695_vm3, %v9353_v11  ;;  %v2267_v11 = vsel %vm6451_vm4, %v2262_v61, %v2266_v30  ;;  %v2346_v61 = vrot.slane %v2344_v9, 5  ;;  %v2336_v30 = vshll.u32 %v7416_v62, 16  ;;  %v2276_v1 = vrot.slane %v2275_v63, 4 }
  0xc4   : > { %v2356_v20 = vrot.slane %v2354_v15, 4  ;;  %v5218_v53 = vcombine.low %v2257_v21, %v2267_v11  ;;  %v2374_v38 = vshll.u32 %v7424_v18, 16  ;;  %v9356_v35 = vcombine.low %v7157_v43, %v7163_v10 }
  0xc5   : > { %v2300_v16 = vrot.slane %v2299_v2, 4  ;;  %v2310_v9 = vrot.slane %v2309_v27, 4  ;;  %v2314_v15 = vrot.slane %v2312_v33, 5  ;;  %v9357_v4 = vcombine.low %v7173_v3, %v7180_v13  ;;  %v7455_v27 = vld [vmem:[%s6406_s9 + $0xc8] sm:$0x1] }
  0xc6   : > { %5923 = vmatmul.mubr.msk.bf16.gmra.mxu0 %vm695_vm3, %v7334_v23  ;;  %v2378_v23 = vshrl.u32 %v7424_v18, 16  ;;  %v2324_v63 = vrot.slane %v2323_v12, 4  ;;  %v2347_v21 = vor.u32 %v2346_v61, %v2343_v14  ;;  %v2357_v11 = vor.u32 %v2356_v20, %v7428_v44 }
  0xc7   : > { %5926 = vmatprep.mubr.msk.bf16.mxu0 %vm695_vm3, %v5216_v59  ;;  %v2286_v59 = vrot.slane %v2285_v46, 4  ;;  %v2360_v48 = vshll.u32 %v7434_v39, 16  ;;  %v2334_v62 = vrot.slane %v2333_v40, 4  ;;  %v2338_v43 = vrot.slane %v2336_v30, 5 }
  0xc8   : > { %v2367_v10 = vrot.slane %v2365_v56, 4  ;;  %v5185_v46 = vcombine.low %v7260_v19, %v7266_v47  ;;  %v5186_v2 = vcombine.low %v7320_v0, %v7328_v17  ;;  %v7457_v33 = vrot.slane %v2374_v38, 5 }
  0xc9   : > { %v2380_v12 = vrot.slane %v2378_v23, 4  ;;  %v2281_v14 = vsel %vm6451_vm4, %v2276_v1, %v7387_v6  ;;  %v2291_v61 = vsel %vm6451_vm4, %v2286_v59, %v2290_v31  ;;  %v2305_v20 = vsel %vm6451_vm4, %v2300_v16, %v7394_v34 }
  0xca   : > { %5889 = vmatmul.mubr.msk.bf16.gmra.mxu1 %vm695_vm3, %v9356_v35  ;;  %v2370_v35 = vrot.slane %v2368_v60, 5  ;;  %v2315_v40 = vsel %vm6451_vm4, %v2310_v9, %v2314_v15  ;;  %v2329_v30 = vsel %vm6451_vm4, %v2324_v63, %v7410_v25  ;;  %v2348_v56 = vrot.slane %v2347_v21, 4  ;;  %v7503_v63 = vld [vmem:[%s6406_s9 + $0x1c] sm:$0xf] }
  0xcb   : > { %5892 = vmatprep.mubr.msk.bf16.mxu1 %vm695_vm3, %v9357_v4  ;;  %v2358_v60 = vrot.slane %v2357_v11, 4  ;;  %v2362_v23 = vrot.slane %v2360_v48, 5  ;;  %v2339_v6 = vsel %vm6451_vm4, %v2334_v62, %v2338_v43  ;;  %v2384_v34 = vshll.u32 %v7455_v27, 16  ;;  %v7500_v4 = vld [vmem:[%s6406_s9 + $0x18] sm:$0xf] }
  0xcc   : > { %v2371_v31 = vor.u32 %v2370_v35, %v2367_v10  ;;  %v2700_v1 = vrot.slane %v6956_v42, 5  ;;  %v5187_v38 = vcombine.low %v7341_v22, %v7344_v8  ;;  %v5188_v25 = vcombine.low %v7354_v37, %v7368_v54  ;;  %v9359_v35 = vld [vmem:[#allocation14_spill] sm:$0xff] }
  0xcd   : > { %v2381_v48 = vor.u32 %v2380_v12, %v7457_v33  ;;  %v5220_v62 = vcombine.low %v2305_v20, %v2315_v40  ;;  %v5189_v42 = vcombine.low %v7379_v45, %v7385_v36  ;;  %v2707_v10 = vrot.slane %v6980_v5, 5  ;;  %v7512_v40 = vld [vmem:[%s6406_s9 + $0x28] sm:$0xf] }
  0xce   : > { %5927 = vmatmul.mubr.msk.bf16.gmra.mxu0 %vm695_vm3, %v5217_v51  ;;  %v5219_v51 = vcombine.low %v2281_v14, %v2291_v61  ;;  %v5221_v59 = vcombine.low %v2329_v30, %v2339_v6  ;;  %v2353_v16 = vsel %vm6451_vm4, %v2348_v56, %v7428_v44  ;;  %v2363_v9 = vsel %vm6451_vm4, %v2358_v60, %v2362_v23  ;;  %v9361_v44 = vld [vmem:[#allocation15_spill] sm:$0xff] }
  0xcf   : > { %5930 = vmatprep.mubr.msk.bf16.mxu0 %vm695_vm3, %v5218_v53  ;;  %v9358_v53 = vcombine.low %v7205_v28, %v7216_v41  ;;  %v5240_v15 = vrot.slane %v6950_v7, 9  ;;  %v2372_v21 = vrot.slane %v2371_v31, 4  ;;  %v2386_v11 = vrot.slane %v2384_v34, 5 }
  0xd0   : > { %v2702_v5 = vrot.slane %v2700_v1, 4  ;;  %v2703_v12 = vrot.slane %v9359_v35, 5  ;;  %v2382_v14 = vrot.slane %v2381_v48, 4  ;;  %v5241_v61 = vrot.slane %v6975_v58, 9  ;;  %v9377_v58 = vld [vmem:[#allocation10_spill] sm:$0xff] }
  0xd1   : > { %v2710_v20 = vrot.slane %v9361_v44, 5  ;;  %v2709_v30 = vrot.slane %v2707_v10, 4  ;;  %v3516_v60 = vshll.u32 %v7512_v40, 16  ;;  %v3520_v23 = vshrl.u32 %v7512_v40, 16 }
  0xd2   : > { %5893 = vmatmul.mubr.msk.bf16.gmra.mxu1 %vm695_vm3, %v9358_v53  ;;  %v5222_v6 = vcombine.low %v2353_v16, %v2363_v9  ;;  %v7521_v34 = vsel %vm6736_vm7, %v5240_v15, %v2700_v1  ;;  %v2377_v53 = vsel %vm6451_vm4, %v2372_v21, %v7457_v33  ;;  %v7532_v35 = vsel %vm6736_vm7, %v2702_v5, %v2703_v12  ;;  %v7639_v12 = vld [vmem:[%s6406_s9 + $0x48] sm:$0xf] }
  0xd3   : > { %5896 = vmatprep.mubr.msk.bf16.mxu1 %vm695_vm3, %v5185_v46  ;;  %v7507_v46 = vld [vmem:[%s6406_s9 + $0x24] sm:$0xf]  ;;  %v2714_v1 = vrot.slane %v6988_v52, 5  ;;  %v2387_v16 = vsel %vm6451_vm4, %v2382_v14, %v2386_v11  ;;  %v9257_v33 = vrot.slane %v7512_v40, 5  ;;  %v7546_v15 = vsel %vm6736_vm7, %v2709_v30, %v2710_v20  ;;  %v7558_v14 = vld [vmem:[%s6406_s9 + $0x30] sm:$0xf] }
  0xd4   : > { %9360 = vst [vmem:[#allocation14_spill] sm:$0xff] %v7507_v46  ;;  %v3507_v7 = vshrl.u32 %v7507_v46, 16  ;;  %v3510_v56 = vshll.u32 %v7507_v46, 16  ;;  %v7548_v5 = vrot.slane %v3516_v60, 5  ;;  %v3522_v52 = vrot.slane %v3520_v23, 4 }
  0xd5   : > { %v5223_v44 = vcombine.low %v2377_v53, %v2387_v16  ;;  %v2716_v20 = vrot.slane %v2714_v1, 4  ;;  %v7574_v60 = vsel %vm744_vm0, %v7271_v29, 0  ;;  %v5243_v29 = vrot.slane %v6997_v50, 9  ;;  %v7649_v11 = vld [vmem:[%s6406_s9 + $0x4c] sm:$0xf] }
  0xd6   : > { %5931 = vmatmul.mubr.msk.bf16.gmra.mxu0 %vm695_vm3, %v5219_v51  ;;  %v3509_v9 = vrot.slane %v3507_v7, 4  ;;  %v3512_v21 = vrot.slane %v3510_v56, 5  ;;  %9363 = vst [vmem:[#allocation15_spill] sm:$0xff] %v7548_v5  ;;  %v2717_v7 = vrot.slane %v7033_v49, 5  ;;  %v3523_v53 = vor.u32 %v3522_v52, %v7548_v5  ;;  %v7592_v52 = vld [vmem:[%s6406_s9 + $0x3c] sm:$0xf] }
  0xd7   : > { %5934 = vmatprep.mubr.msk.bf16.mxu0 %vm695_vm3, %v5220_v62  ;;  %v7540_v62 = vsel %vm6736_vm7, %v5241_v61, %v2707_v10  ;;  %v7561_v61 = vld [vmem:[%s6406_s9 + $0x34] sm:$0xf]  ;;  %v7579_v49 = vsel %vm744_vm0, %v7242_v57, 0  ;;  %v3558_v50 = vshll.u32 %v7592_v52, 16  ;;  %v9381_v5 = vld [vmem:[#allocation11_spill] sm:$0xff] }
  0xd8   : > { %v3513_v23 = vor.u32 %v3512_v21, %v3509_v9  ;;  %v9365_v9 = vld [vmem:[#allocation18_spill] sm:$0xff]  ;;  %v7597_v57 = vsel %vm6736_vm7, %v2716_v20, %v2717_v7  ;;  %v7614_v7 = vrot.slane %v3523_v53, 4  ;;  %v9369_v51 = vld [vmem:[#allocation12_spill] sm:$0xff]  ;;  %v9370_v53 = vld [vmem:[#allocation17_spill] sm:$0xff] }
  0xd9   : > { %v2724_v21 = vrot.slane %v9365_v9, 5  ;;  %v2735_v56 = vrot.slane %v9369_v51, 5 }
  0xda   : > { %5897 = vmatmul.mubr.msk.bf16.gmra.mxu1 %vm695_vm3, %v5186_v2  ;;  %v5242_v2 = vrot.slane %v6983_v55, 9  ;;  %v7570_v55 = vrot.slane %v9257_v33, 4  ;;  %v7612_v20 = vrot.slane %v3513_v23, 4 }
  0xdb   : > { %5900 = vmatprep.mubr.msk.bf16.mxu1 %vm695_vm3, %v5187_v38  ;;  %v2721_v38 = vrot.slane %v7006_v24, 5  ;;  %v9372_v24 = vld [vmem:[#allocation9_spill] sm:$0xff]  ;;  %v2737_v43 = vrot.slane %v2735_v56, 4 }
  0xdc   : > { %9364 = vst [vmem:[#allocation20_spill] sm:$0xff] %v7570_v55  ;;  %v7586_v16 = vsel %vm6736_vm7, %v5242_v2, %v2714_v1  ;;  %v3555_v1 = vshrl.u32 %v7592_v52, 16  ;;  %v9366_v2 = vld [vmem:[#allocation16_spill] sm:$0xff]  ;;  %9367 = vst [vmem:[#allocation18_spill] sm:$0xff] %v7612_v20  ;;  %v2731_v48 = vrot.slane %v9372_v24, 5  ;;  %v9382_v20 = vcombine.low %v7521_v34, %v7532_v35  ;;  %v9394_v55 = vld [vmem:[#allocation25_spill] sm:$0xff] }
  0xdd   : > { %v2723_v33 = vrot.slane %v2721_v38, 4  ;;  %v2728_v10 = vrot.slane %v9366_v2, 5  ;;  %9368 = vst [vmem:[#allocation16_spill] sm:$0xff] %v7614_v7  ;;  %v5244_v2 = vrot.slane %v9370_v53, 9  ;;  %v2738_v7 = vrot.slane %v9377_v58, 5 }
  0xde   : > { %5935 = vmatmul.mubr.msk.bf16.gmra.mxu0 %vm695_vm3, %v5221_v59  ;;  %v7600_v59 = vld [vmem:[%s6406_s9 + $0x40] sm:$0xf]  ;;  %v7635_v30 = vrot.slane %v3555_v1, 4  ;;  %v7655_v24 = vld [vmem:[%s6406_s9 + $0x54] sm:$0xf]  ;;  %v9379_v58 = vcombine.low %v7500_v4, %v7503_v63 }
  0xdf   : > { %5938 = vmatprep.mubr.msk.bf16.mxu0 %vm695_vm3, %v5222_v6  ;;  %v3564_v9 = vshll.u32 %v7600_v59, 16  ;;  %v3568_v6 = vshrl.u32 %v7600_v59, 16  ;;  %v7633_v51 = vsel %vm6736_vm7, %v2723_v33, %v2724_v21  ;;  %v9376_v21 = vld [vmem:[#allocation19_spill] sm:$0xff]  ;;  %v3603_v53 = vshrl.u32 %v7655_v24, 16  ;;  %v9378_v33 = vld [vmem:[#allocation13_spill] sm:$0xff] }
  0xe0   : > { %9371 = vst [vmem:[#allocation12_spill] sm:$0xff] %v7635_v30  ;;  %v5245_v1 = vrot.slane %v9376_v21, 9  ;;  %v2742_v21 = vrot.slane %v9378_v33, 5  ;;  %v7695_v32 = vsel %vm6736_vm7, %v2737_v43, %v2738_v7  ;;  %v7708_v43 = vld [vmem:[%s6406_s9 + $0x60] sm:$0xf] }
  0xe1   : > { %v7645_v23 = vrot.slane %v3568_v6, 4  ;;  %v7665_v6 = vld [vmem:[%s6406_s9 + $0x58] sm:$0xf]  ;;  %v9384_v7 = vld [vmem:[#allocation22_spill] sm:$0xff]  ;;  %v7711_v33 = vrot.slane %v3603_v53, 4  ;;  %v2756_v53 = vrot.slane %v7180_v13, 5 }
  0xe2   : > { %5901 = vmatmul.mubr.msk.bf16.gmra.mxu1 %vm695_vm3, %v5188_v25  ;;  %v7626_v25 = vsel %vm6736_vm7, %v5243_v29, %v2721_v38  ;;  %v7641_v38 = vrot.slane %v3558_v50, 5  ;;  %v7643_v29 = vrot.slane %v3564_v9, 5  ;;  %v7662_v9 = vsel %vm6736_vm7, %v5244_v2, %v2728_v10  ;;  %v7720_v35 = vld [vmem:[%s6406_s9 + $0x64] sm:$0xf]  ;;  %v7727_v30 = vld [vmem:[%s6406_s9 + $0x6c] sm:$0xf] }
  0xe3   : > { %5904 = vmatprep.mubr.msk.bf16.mxu1 %vm695_vm3, %v5189_v42  ;;  %v2730_v42 = vrot.slane %v2728_v10, 4  ;;  %9375 = vst [vmem:[#allocation31_spill] sm:$0xff] %v7645_v23  ;;  %v3606_v50 = vshll.u32 %v7655_v24, 16  ;;  %v3612_v10 = vshll.u32 %v7665_v6, 16  ;;  %v3616_v2 = vshrl.u32 %v7665_v6, 16  ;;  %9385 = vst [vmem:[#allocation19_spill] sm:$0xff] %v7711_v33 }
  0xe4   : > { %9373 = vst [vmem:[#allocation17_spill] sm:$0xff] %v7641_v38  ;;  %9374 = vst [vmem:[#allocation9_spill] sm:$0xff] %v7643_v29  ;;  %v2749_v29 = vrot.slane %v9384_v7, 5  ;;  %v9391_v7 = vld [vmem:[#allocation24_spill] sm:$0xff]  ;;  %v2758_v33 = vrot.slane %v2756_v53, 4 }
  0xe5   : > { %v7713_v38 = vrot.slane %v3606_v50, 5  ;;  %v7717_v34 = vrot.slane %v3616_v2, 4 }
  0xe6   : > { %5939 = vmatmul.mubr.msk.bf16.gmra.mxu0 %vm695_vm3, %v5223_v44  ;;  %v7675_v44 = vsel %vm6736_vm7, %v2730_v42, %v2731_v48  ;;  %v9380_v48 = vcombine.low %v7419_v26, %v7424_v18  ;;  %v7691_v42 = vsel %vm6736_vm7, %v5245_v1, %v2735_v56  ;;  %v2744_v56 = vrot.slane %v2742_v21, 4  ;;  %v9383_v1 = vld [vmem:[#allocation23_spill] sm:$0xff] }
  0xe7   : > { %5978 = vmatprep.mubr.msk.bf16.mxu0 %vm695_vm3, %v9379_v58  ;;  %v5246_v58 = vrot.slane %v9381_v5, 9  ;;  %v2745_v23 = vrot.slane %v9383_v1, 5  ;;  %9386 = vst [vmem:[#allocation10_spill] sm:$0xff] %v7713_v38  ;;  %v7715_v5 = vrot.slane %v3612_v10, 5  ;;  %9388 = vst [vmem:[#allocation11_spill] sm:$0xff] %v7717_v34  ;;  %v9390_v10 = vld [vmem:[#allocation21_spill] sm:$0xff]  ;;  %v9392_v1 = vcombine.low %v7507_v46, %v7512_v40 }
  0xe8   : > { %9389 = vst [vmem:[#allocation23_spill] sm:$0xff] %v7727_v30  ;;  %v5247_v2 = vrot.slane %v9390_v10, 9  ;;  %v2752_v34 = vrot.slane %v9391_v7, 5  ;;  %v9393_v10 = vcombine.low %v7558_v14, %v7561_v61  ;;  %v2763_v46 = vrot.slane %v7216_v41, 5  ;;  %v7777_v41 = vld [vmem:[%s6406_s9 + $0x78] sm:$0xf] }
  0xe9   : > { %9387 = vst [vmem:[#allocation13_spill] sm:$0xff] %v7715_v5  ;;  %v7732_v50 = vsel %vm6736_vm7, %v5246_v58, %v2742_v21  ;;  %v7737_v5 = vld [vmem:[%s6406_s9 + $0x70] sm:$0xf]  ;;  %v7746_v13 = vsel %vm6736_vm7, %v2744_v56, %v2745_v23  ;;  %v3654_v21 = vshll.u32 %v7727_v30, 16  ;;  %v5248_v56 = vrot.slane %v7173_v3, 9  ;;  %9396 = vst [vmem:[#allocation22_spill] sm:$0xff] %v7777_v41 }
  0xea   : > { %5905 = vmatmul.mubr.msk.bf16.gmra.mxu1 %vm695_vm3, %v9380_v48  ;;  %v2751_v48 = vrot.slane %v2749_v29, 4  ;;  %v3660_v58 = vshll.u32 %v7737_v5, 16  ;;  %v7771_v3 = vsel %vm6736_vm7, %v5247_v2, %v2749_v29  ;;  %v7795_v23 = vld [vmem:[%s6406_s9 + $0x7c] sm:$0xf]  ;;  %v9414_v7 = vcombine.low %v7662_v9, %v7675_v44 }
  0xeb   : > { %5944 = vmatprep.mubr.msk.bf16.mxu1 %vm695_vm3, %v9382_v20  ;;  %v3651_v20 = vshrl.u32 %v7727_v30, 16  ;;  %v7790_v2 = vrot.slane %v3654_v21, 5  ;;  %9399 = vst [vmem:[#allocation24_spill] sm:$0xff] %v7795_v23  ;;  %v7812_v21 = vld [vmem:[%s6406_s9 + $0x88] sm:$0xf]  ;;  %v9422_v9 = vcombine.low %v7655_v24, %v7665_v6 }
  0xec   : > { %v7889_v44 = vld [vmem:[%s6406_s9 + $0x9c] sm:$0xf] }
  0xed   : > { %v7788_v29 = vrot.slane %v3651_v20, 4  ;;  %v2765_v20 = vrot.slane %v2763_v46, 4 }
  0xee   : > { %5979 = vmatmul.mubr.msk.bf16.vlgmr.msra.gmra.mxu0 %vm695_vm3, %v9392_v1 }
  0xef   : > { %6045 = vmatpush3.bf16.msra.mxu0 %v7579_v49  ;;  %5982 = vmatprep.mubr.msk.bf16.mxu0 %vm695_vm3, %v9393_v10  ;;  %v2759_v49 = vrot.slane %v9394_v55, 5  ;;  %v9395_v10 = vcombine.low %v7540_v62, %v7546_v15  ;;  %v3664_v55 = vshrl.u32 %v7737_v5, 16  ;;  %v9397_v62 = vcombine.low %v7586_v16, %v7597_v57  ;;  %v9400_v57 = vld [vmem:[#allocation26_spill] sm:$0xff] }
  0xf0   : > { %v7786_v15 = vsel %vm6736_vm7, %v2751_v48, %v2752_v34  ;;  %v5249_v16 = vrot.slane %v7205_v28, 9  ;;  %v7805_v48 = vld [vmem:[%s6406_s9 + $0x84] sm:$0xf]  ;;  %9402 = vst [vmem:[#allocation26_spill] sm:$0xff] %v7812_v21  ;;  %v3712_v28 = vshrl.u32 %v7812_v21, 16 }
  0xf1   : > { %9401 = vst [vmem:[#allocation25_spill] sm:$0xff] %v7805_v48  ;;  %v7809_v34 = vsel %vm6736_vm7, %v2758_v33, %v2759_v49  ;;  %v3702_v38 = vshll.u32 %v7805_v48, 16  ;;  %v9404_v33 = vcombine.low %v7592_v52, %v7600_v59  ;;  %v9411_v49 = vcombine.low %v7626_v25, %v7633_v51 }
  0xf2   : > { %5945 = vmatmul.mubr.msk.bf16.vlgmr.msra.gmra.mxu1 %vm695_vm3, %v9395_v10  ;;  %v7792_v10 = vrot.slane %v3660_v58, 5  ;;  %v3699_v58 = vshrl.u32 %v7805_v48, 16  ;;  %v7829_v1 = vpop.f32.mrf.mxu0  ;;  %v7876_v25 = vrot.slane %v3712_v28, 4  ;;  %v2777_v28 = vrot.slane %v7328_v17, 5 }
  0xf3   : > { %6011 = vmatpush3.bf16.msra.mxu1 %v7574_v60  ;;  %5948 = vmatprep.mubr.msk.bf16.mxu1 %vm695_vm3, %v9397_v62  ;;  %v7800_v60 = vsel %vm6736_vm7, %v5248_v56, %v2756_v53  ;;  %v2766_v62 = vrot.slane %v9400_v57, 5  ;;  %v7818_v56 = vrot.slane %v3664_v55, 4  ;;  %v2770_v57 = vrot.slane %v7266_v47, 5  ;;  %9405 = vst [vmem:[#allocation33_spill] sm:$0xff] %v7829_v1  ;;  %v7859_v53 = vld [vmem:[%s6406_s9 + $0x94] sm:$0xf] }
  0xf4   : > { %9398 = vst [vmem:[#allocation21_spill] sm:$0xff] %v7792_v10  ;;  %v3708_v55 = vshll.u32 %v7812_v21, 16  ;;  %v9406_v47 = vcombine.low %v7639_v12, %v7649_v11  ;;  %v7845_v1 = vsel %vm6736_vm7, %v5249_v16, %v2763_v46  ;;  %v7851_v10 = vrot.slane %v3699_v58, 4  ;;  %9410 = vst [vmem:[#allocation37_spill] sm:$0xff] %v7859_v53  ;;  %v7878_v51 = vpop.f32.mrf.mxu0 }
  0xf5   : > { %9403 = vst [vmem:[#allocation32_spill] sm:$0xff] %v7818_v56  ;;  %v7849_v56 = vsel %vm6736_vm7, %v2765_v20, %v2766_v62  ;;  %v5250_v16 = vrot.slane %v7260_v19, 9  ;;  %v2772_v62 = vrot.slane %v2770_v57, 4  ;;  %v9413_v20 = vld [vmem:[#allocation27_spill] sm:$0xff]  ;;  %9416 = vst [vmem:[#allocation39_spill] sm:$0xff] %v7876_v25  ;;  %v9418_v19 = vld [vmem:[#allocation30_spill] sm:$0xff] }
  0xf6   : > { %5983 = vmatmul.mubr.msk.bf16.gmra.mxu0 %vm695_vm3, %v9404_v33  ;;  %9407 = vst [vmem:[#allocation34_spill] sm:$0xff] %v7851_v10  ;;  %v7856_v33 = vld [vmem:[%s6406_s9 + $0x90] sm:$0xf]  ;;  %v2773_v58 = vrot.slane %v9413_v20, 5  ;;  %9417 = vst [vmem:[#allocation40_spill] sm:$0xff] %v7878_v51  ;;  %v5251_v17 = vrot.slane %v7320_v0, 9  ;;  %v9424_v0 = vcombine.low %v7708_v43, %v7720_v35 }
  0xf7   : > { %5986 = vmatprep.mubr.msk.bf16.mxu0 %vm695_vm3, %v9406_v47  ;;  %v7853_v47 = vrot.slane %v3702_v38, 5  ;;  %9409 = vst [vmem:[#allocation36_spill] sm:$0xff] %v7856_v33  ;;  %v7865_v46 = vpop.f32.mrf.mxu1  ;;  %v5253_v38 = vrot.slane %v7354_v37, 9  ;;  %9419 = vst [vmem:[#allocation30_spill] sm:$0xff] %v7889_v44  ;;  %v7904_v37 = vsel %vm6736_vm7, %v5250_v16, %v2770_v57  ;;  %v3747_v57 = vshrl.u32 %v7889_v44, 16 }
  0xf8   : > { %9412 = vst [vmem:[#allocation38_spill] sm:$0xff] %v7865_v46  ;;  %v2794_v46 = vrot.slane %v9418_v19, 5  ;;  %v7908_v10 = vsel %vm6736_vm7, %v2772_v62, %v2773_v58  ;;  %v2784_v16 = vrot.slane %v7344_v8, 5  ;;  %v9425_v58 = vld [vmem:[#allocation28_spill] sm:$0xff]  ;;  %v5255_v8 = vrot.slane %v7419_v26, 9 }
  0xf9   : > { %9408 = vst [vmem:[#allocation35_spill] sm:$0xff] %v7853_v47  ;;  %v7874_v47 = vrot.slane %v3708_v55, 5  ;;  %v7894_v55 = vld [vmem:[%s6406_s9 + $0xa0] sm:$0xf]  ;;  %v7900_v20 = vpop.f32.mrf.mxu1  ;;  %v2805_v25 = vrot.slane %v7424_v18, 5 }
  0xfa   : > { %5949 = vmatmul.mubr.msk.bf16.gmra.mxu1 %vm695_vm3, %v9411_v49  ;;  %v2791_v49 = vrot.slane %v7368_v54, 5  ;;  %9420 = vst [vmem:[#allocation41_spill] sm:$0xff] %v7894_v55  ;;  %9421 = vst [vmem:[#allocation42_spill] sm:$0xff] %v7900_v20  ;;  %v5252_v20 = vrot.slane %v7341_v22, 9  ;;  %v2808_v22 = vrot.slane %v7455_v27, 5 }
  0xfb   : > { %5952 = vmatprep.mubr.msk.bf16.mxu1 %vm695_vm3, %v9414_v7  ;;  %9415 = vst [vmem:[#allocation27_spill] sm:$0xff] %v7874_v47  ;;  %v2780_v7 = vrot.slane %v9425_v58, 5  ;;  %v7943_v58 = vpop.f32.mrf.mxu1  ;;  %v9428_v47 = vcombine.low %v7732_v50, %v7746_v13  ;;  %v7965_v18 = vld [vmem:[%s6406_s9 + $0xa8] sm:$0xf]  ;;  %v2798_v50 = vrot.slane %v7385_v36, 5  ;;  %v7970_v13 = vsel %vm6736_vm7, %v5255_v8, %v2805_v25 }
  0xfc   : > { %v7898_v54 = vsel %vm6736_vm7, %v5253_v38, %v2791_v49  ;;  %v2793_v19 = vrot.slane %v2791_v49, 4  ;;  %v7916_v38 = vpop.f32.mrf.mxu0  ;;  %v3750_v49 = vshll.u32 %v7889_v44, 16  ;;  %9427 = vst [vmem:[#allocation28_spill] sm:$0xff] %v7943_v58  ;;  %v7988_v36 = vsel %vm6736_vm7, %v5252_v20, %v2784_v16  ;;  %v7991_v8 = vld [vmem:[%s6406_s9 + $0xac] sm:$0xf] }
  0xfd   : > { %9423 = vst [vmem:[#allocation43_spill] sm:$0xff] %v7916_v38  ;;  %v3760_v38 = vshrl.u32 %v7894_v55, 16 }
  0xfe   : > { %5987 = vmatmul.mubr.msk.bf16.gmra.mxu0 %vm695_vm3, %v9422_v9  ;;  %v7923_v62 = vsel %vm6736_vm7, %v2793_v19, %v2794_v46  ;;  %v2779_v46 = vrot.slane %v2777_v28, 4  ;;  %v3756_v19 = vshll.u32 %v7894_v55, 16  ;;  %v7947_v9 = vsel %vm6736_vm7, %v5251_v17, %v2777_v28  ;;  %v9431_v28 = vld [vmem:[#allocation29_spill] sm:$0xff] }
  0xff   : > { %5990 = vmatprep.mubr.msk.bf16.mxu0 %vm695_vm3, %v9424_v0  ;;  %v9426_v0 = vcombine.low %v7691_v42, %v7695_v32  ;;  %v7956_v32 = vpop.f32.mrf.mxu0  ;;  %v7958_v42 = vrot.slane %v3747_v57, 4  ;;  %v2787_v17 = vrot.slane %v9431_v28, 5  ;;  %v7962_v26 = vrot.slane %v3750_v49, 5  ;;  %v7982_v49 = vld [vmem:[%s6406_s9 + $0xb4] sm:$0xf] }
 0x100   : > { %9429 = vst [vmem:[#allocation44_spill] sm:$0xff] %v7956_v32  ;;  %v7974_v57 = vsel %vm6736_vm7, %v2779_v46, %v2780_v7  ;;  %v7976_v58 = vrot.slane %v3756_v19, 5  ;;  %v7978_v28 = vrot.slane %v3760_v38, 4  ;;  %v3795_v7 = vshrl.u32 %v7982_v49, 16  ;;  %v8045_v32 = vld [vmem:[%s6406_s9 + $0xc4] sm:$0xf] }
 0x101   : > { %9430 = vst [vmem:[#allocation45_spill] sm:$0xff] %v7958_v42  ;;  %9432 = vst [vmem:[#allocation29_spill] sm:$0xff] %v7962_v26  ;;  %v7984_v26 = vpop.f32.mrf.mxu1  ;;  %v3798_v46 = vshll.u32 %v7982_v49, 16  ;;  %v9436_v19 = vcombine.low %v7727_v30, %v7737_v5  ;;  %v8062_v42 = vld [vmem:[%s6406_s9 + $0xcc] sm:$0xf] }
 0x102   : > { %5953 = vmatmul.mubr.msk.bf16.gmra.mxu1 %vm695_vm3, %v9426_v0  ;;  %v2786_v0 = vrot.slane %v2784_v16, 4  ;;  %9433 = vst [vmem:[#allocation46_spill] sm:$0xff] %v7976_v58  ;;  %9434 = vst [vmem:[#allocation47_spill] sm:$0xff] %v7978_v28  ;;  %v8042_v28 = vld [vmem:[%s6406_s9 + $0xc0] sm:$0xf] }
 0x103   : > { %5956 = vmatprep.mubr.msk.bf16.mxu1 %vm695_vm3, %v9428_v47  ;;  %v2807_v47 = vrot.slane %v2805_v25, 4  ;;  %9435 = vst [vmem:[#allocation48_spill] sm:$0xff] %v7984_v26  ;;  %v7994_v25 = vld [vmem:[%s6406_s9 + $0xb8] sm:$0xf]  ;;  %v8006_v27 = vpop.f32.mrf.mxu0 }
 0x104   : > { %9437 = vst [vmem:[#allocation49_spill] sm:$0xff] %v8006_v27  ;;  %v8010_v20 = vsel %vm6736_vm7, %v2786_v0, %v2787_v17  ;;  %v3804_v16 = vshll.u32 %v7994_v25, 16  ;;  %v3808_v26 = vshrl.u32 %v7994_v25, 16  ;;  %v2800_v0 = vrot.slane %v2798_v50, 4 }
 0x105   : > { %v8000_v38 = vsel %vm6736_vm7, %v2807_v47, %v2808_v22  ;;  %v9438_v22 = vcombine.low %v7777_v41, %v7795_v23  ;;  %v2801_v17 = vrot.slane %v7434_v39, 5  ;;  %v3492_v27 = vshll.u32 %v7503_v63, 16  ;;  %v8145_v41 = vld [vmem:[%s6406_s9 + $0x44] sm:$0x1] }
 0x106   : > { %5991 = vmatmul.mubr.msk.bf16.gmra.mxu0 %vm695_vm3, %v9436_v19  ;;  %v5254_v19 = vrot.slane %v7379_v45, 9  ;;  %v8055_v47 = vrot.slane %v3798_v46, 5  ;;  %v8057_v58 = vrot.slane %v3804_v16, 5  ;;  %v8059_v39 = vrot.slane %v3808_v26, 4  ;;  %v5291_v16 = vld [vmem:[%s6406_s9 + $0x20] sm:$0x1] }
 0x107   : > { %5994 = vmatprep.mubr.msk.bf16.mxu0 %vm695_vm3, %v9438_v22  ;;  %v9439_v22 = vcombine.low %v7771_v3, %v7786_v15  ;;  %v8033_v45 = vpop.f32.mrf.mxu1  ;;  %v9441_v3 = vcombine.low %v7800_v60, %v7809_v34  ;;  %v8051_v15 = vpop.f32.mrf.mxu0  ;;  %v8071_v34 = vsel %vm6736_vm7, %v2800_v0, %v2801_v17  ;;  %v3843_v46 = vshrl.u32 %v8062_v42, 16 }
 0x108   : > { %9440 = vst [vmem:[#allocation50_spill] sm:$0xff] %v8033_v45  ;;  %9442 = vst [vmem:[#allocation51_spill] sm:$0xff] %v8051_v15  ;;  %v8067_v60 = vsel %vm6736_vm7, %v5254_v19, %v2798_v50  ;;  %v9447_v26 = vshrl.u32 %v7500_v4, 16  ;;  %v8082_v45 = vrot.slane %v3492_v27, 5  ;;  %v9449_v50 = vshrl.u32 %v7503_v63, 16 }
 0x109   : > { %9444 = vst [vmem:[#allocation53_spill] sm:$0xff] %v8055_v47  ;;  %9445 = vst [vmem:[#allocation54_spill] sm:$0xff] %v8057_v58  ;;  %v8086_v47 = vpop.f32.mrf.mxu1  ;;  %v3846_v15 = vshll.u32 %v8062_v42, 16  ;;  %v8098_v27 = vpop.f32.mrf.mxu0  ;;  %v4178_v17 = vrot.slane %v7503_v63, 5  ;;  %v3502_v0 = vshll.u32 %v5291_v16, 16 }
 0x10a   : > { %5957 = vmatmul.mubr.msk.bf16.gmra.mxu1 %vm695_vm3, %v9439_v22  ;;  %v8053_v22 = vrot.slane %v3795_v7, 4  ;;  %9446 = vst [vmem:[#allocation55_spill] sm:$0xff] %v8059_v39  ;;  %v8074_v7 = vld [vmem:[%s6406_s9 + $0xd0] sm:$0xf]  ;;  %v9448_v39 = vshll.u32 %v7500_v4, 16  ;;  %v3498_v19 = vrot.slane %v9449_v50, 4 }
 0x10b   : > { %5960 = vmatprep.mubr.msk.bf16.mxu1 %vm695_vm3, %v9441_v3  ;;  %v3485_v3 = vrot.slane %v9447_v26, 4  ;;  %9450 = vst [vmem:[#allocation56_spill] sm:$0xff] %v8086_v47  ;;  %v5294_v26 = vld [vmem:[%s6406_s9 + $0x2c] sm:$0x1]  ;;  %9452 = vst [vmem:[#allocation57_spill] sm:$0xff] %v8098_v27  ;;  %v3852_v27 = vshll.u32 %v8074_v7, 16 }
 0x10c   : > { %9443 = vst [vmem:[#allocation52_spill] sm:$0xff] %v8053_v22  ;;  %v3488_v58 = vrot.slane %v9448_v39, 5  ;;  %v9451_v39 = vcombine.low %v7805_v48, %v7812_v21  ;;  %v9453_v22 = vcombine.low %v7856_v33, %v7859_v53  ;;  %v3540_v50 = vshll.u32 %v7561_v61, 16 }
 0x10d   : > { %v3499_v21 = vor.u32 %v3498_v19, %v8082_v45  ;;  %v3526_v63 = vshll.u32 %v5294_v26, 16  ;;  %v9455_v33 = vcombine.low %v7845_v1, %v7849_v56  ;;  %v8122_v48 = vrot.slane %v3846_v15, 5 }
 0x10e   : > { %5995 = vmatmul.mubr.msk.bf16.gmra.mxu0 %vm695_vm3, %v9451_v39  ;;  %v8111_v39 = vrot.slane %v3843_v46, 4  ;;  %v3489_v47 = vor.u32 %v3488_v58, %v3485_v3  ;;  %v3856_v46 = vshrl.u32 %v8074_v7, 16  ;;  %v4181_v53 = vrot.slane %v5291_v16, 5  ;;  %v8130_v3 = vpop.f32.mrf.mxu0  ;;  %v5297_v16 = vld [vmem:[%s6406_s9 + $0x38] sm:$0x1] }
 0x10f   : > { %5998 = vmatprep.mubr.msk.bf16.mxu0 %vm695_vm3, %v9453_v22  ;;  %v8120_v22 = vpop.f32.mrf.mxu1  ;;  %9457 = vst [vmem:[#allocation60_spill] sm:$0xff] %v8122_v48  ;;  %v9458_v58 = vcombine.low %v7904_v37, %v7908_v10  ;;  %9459 = vst [vmem:[#allocation61_spill] sm:$0xff] %v8130_v3  ;;  %v4180_v1 = vrot.slane %v4178_v17, 4  ;;  %v4188_v56 = vrot.slane %v5294_v26, 5  ;;  %v9461_v15 = vshll.u32 %v7558_v14, 16 }
 0x110   : > { %9454 = vst [vmem:[#allocation58_spill] sm:$0xff] %v8111_v39  ;;  %9456 = vst [vmem:[#allocation59_spill] sm:$0xff] %v8120_v22  ;;  %v5403_v39 = vrot.slane %v7500_v4, 9  ;;  %v8136_v48 = vrot.slane %v3852_v27, 5  ;;  %v8140_v51 = vrot.slane %v3540_v50, 5  ;;  %v9463_v10 = vshrl.u32 %v7561_v61, 16 }
 0x111   : > { %v3536_v22 = vrot.slane %v9461_v15, 5  ;;  %v3500_v3 = vrot.slane %v3499_v21, 4  ;;  %v3504_v30 = vrot.slane %v3502_v0, 5  ;;  %v3528_v26 = vrot.slane %v3526_v63, 5  ;;  %v9467_v15 = vld [vmem:[#allocation14_spill] sm:$0xff] }
 0x112   : > { %5961 = vmatmul.mubr.msk.bf16.gmra.mxu1 %vm695_vm3, %v9455_v33  ;;  %v9460_v33 = vshrl.u32 %v7558_v14, 16  ;;  %9462 = vst [vmem:[#allocation62_spill] sm:$0xff] %v8136_v48  ;;  %v3546_v37 = vrot.slane %v9463_v10, 4  ;;  %v8149_v23 = vrot.slane %v3856_v46, 4  ;;  %v8153_v27 = vsel %vm6736_vm7, %v5403_v39, %v4178_v17  ;;  %v9478_v48 = vld [vmem:[#allocation18_spill] sm:$0xff] }
 0x113   : > { %5964 = vmatprep.mubr.msk.bf16.mxu1 %vm695_vm3, %v9458_v58  ;;  %v3490_v58 = vrot.slane %v3489_v47, 4  ;;  %v9466_v50 = vrot.slane %v7512_v40, 5  ;;  %v9468_v4 = vrot.slane %v9467_v15, 9  ;;  %v4192_v21 = vrot.slane %v7561_v61, 5  ;;  %v9470_v40 = vld [vmem:[#allocation20_spill] sm:$0xff]  ;;  %v9473_v15 = vld [vmem:[#allocation17_spill] sm:$0xff] }
 0x114   : > { %v3533_v19 = vrot.slane %v9460_v33, 4  ;;  %v8147_v33 = vpop.f32.mrf.mxu1  ;;  %9465 = vst [vmem:[#allocation64_spill] sm:$0xff] %v8149_v23  ;;  %v9469_v0 = vcombine.low %v7889_v44, %v7894_v55  ;;  %v8168_v63 = vpop.f32.mrf.mxu0  ;;  %v8172_v17 = vsel %vm6736_vm7, %v4180_v1, %v4181_v53  ;;  %v8177_v39 = vsel %vm6736_vm7, %v9470_v40, %v4188_v56  ;;  %v9475_v53 = vld [vmem:[#allocation31_spill] sm:$0xff] }
 0x115   : > { %9464 = vst [vmem:[#allocation63_spill] sm:$0xff] %v8147_v33  ;;  %v8161_v47 = vsel %vm6736_vm7, %v9468_v4, %v9466_v50  ;;  %v3550_v4 = vshll.u32 %v5297_v16, 16  ;;  %v9471_v61 = vcombine.low %v7965_v18, %v7991_v8  ;;  %v3547_v10 = vor.u32 %v3546_v37, %v8140_v51  ;;  %v9472_v50 = vld [vmem:[#allocation12_spill] sm:$0xff]  ;;  %v9474_v33 = vld [vmem:[#allocation9_spill] sm:$0xff]  ;;  %v9477_v40 = vld [vmem:[#allocation15_spill] sm:$0xff] }
 0x116   : > { %5999 = vmatmul.mubr.msk.bf16.gmra.mxu0 %vm695_vm3, %v9469_v0  ;;  %v3537_v46 = vor.u32 %v3536_v22, %v3533_v19  ;;  %v3561_v0 = vor.u32 %v9473_v15, %v9472_v50  ;;  %v3571_v1 = vor.u32 %v9475_v53, %v9474_v33  ;;  %v3574_v23 = vshll.u32 %v8145_v41, 16 }
 0x117   : > { %6002 = vmatprep.mubr.msk.bf16.mxu0 %vm695_vm3, %v9471_v61  ;;  %v3495_v22 = vsel %vm6451_vm4, %v3490_v58, %v8082_v45  ;;  %v3505_v19 = vsel %vm6451_vm4, %v3500_v3, %v3504_v30  ;;  %v3519_v37 = vsel %vm6451_vm4, %v9478_v48, %v9477_v40  ;;  %v9479_v61 = vld [vmem:[#allocation16_spill] sm:$0xff]  ;;  %v9480_v15 = vcombine.low %v7947_v9, %v7974_v57  ;;  %v8213_v40 = vpop.f32.mrf.mxu0 }
 0x118   : > { %v3529_v50 = vsel %vm6451_vm4, %v9479_v61, %v3528_v26  ;;  %v5405_v45 = vrot.slane %v7558_v14, 9  ;;  %v4194_v58 = vrot.slane %v4192_v21, 4  ;;  %v4195_v30 = vrot.slane %v5297_v16, 5  ;;  %9483 = vst [vmem:[#allocation20_spill] sm:$0xff] %v8213_v40 }
 0x119   : > { %v8205_v53 = vpop.f32.mrf.mxu1  ;;  %v3588_v3 = vshll.u32 %v7649_v11, 16  ;;  %v9482_v48 = vcombine.low %v7988_v36, %v8010_v20  ;;  %v3538_v26 = vrot.slane %v3537_v46, 4  ;;  %v3552_v14 = vrot.slane %v3550_v4, 5  ;;  %v8238_v4 = vld [vmem:[%s6406_s9 + $0x50] sm:$0x1] }
 0x11a   : > { %5965 = vmatmul.mubr.msk.bf16.gmra.mxu1 %vm695_vm3, %v9480_v15  ;;  %9481 = vst [vmem:[#allocation14_spill] sm:$0xff] %v8205_v53  ;;  %v3548_v61 = vrot.slane %v3547_v10, 4  ;;  %v3562_v16 = vrot.slane %v3561_v0, 4  ;;  %v3572_v15 = vrot.slane %v3571_v1, 4  ;;  %v3576_v53 = vrot.slane %v3574_v23, 5 }
 0x11b   : > { %5968 = vmatprep.mubr.msk.bf16.mxu1 %vm695_vm3, %v9482_v48  ;;  %v8219_v44 = vcombine.low %v3495_v22, %v3505_v19  ;;  %v8221_v36 = vcombine.low %v3519_v37, %v3529_v50  ;;  %v9484_v20 = vshrl.u32 %v7639_v12, 16  ;;  %v9485_v55 = vshll.u32 %v7639_v12, 16  ;;  %v8227_v40 = vpop.f32.mrf.mxu1  ;;  %v8248_v22 = vpop.f32.mrf.mxu0 }
 0x11c   : > { %9486 = vst [vmem:[#allocation12_spill] sm:$0xff] %v8227_v40  ;;  %v8231_v46 = vsel %vm6736_vm7, %v5405_v45, %v4192_v21  ;;  %v8235_v23 = vsel %vm6736_vm7, %v4194_v58, %v4195_v30  ;;  %v8240_v10 = vrot.slane %v3588_v3, 5  ;;  %v9487_v0 = vshrl.u32 %v7649_v11, 16  ;;  %v8265_v3 = vld [vmem:[%s6406_s9 + $0x5c] sm:$0x1] }
 0x11d   : > { %v3581_v48 = vrot.slane %v9484_v20, 4  ;;  %v3584_v9 = vrot.slane %v9485_v55, 5  ;;  %v9488_v55 = vcombine.low %v7982_v49, %v7994_v25  ;;  %v3543_v21 = vsel %vm6451_vm4, %v3538_v26, %v8140_v51  ;;  %v8323_v40 = vld [vmem:[%s6406_s9 + $0x74] sm:$0x1] }
 0x11e   : > { %v3594_v1 = vrot.slane %v9487_v0, 4  ;;  %v9489_v19 = vrot.slane %v7600_v59, 5  ;;  %v9490_v37 = vrot.slane %v7592_v52, 9  ;;  %v4202_v30 = vrot.slane %v8145_v41, 5 }
 0x11f   : > { %6003 = vmatmul.mubr.msk.bf16.gmra.mxu0 %vm695_vm3, %v9488_v55  ;;  %v9492_v20 = vcombine.low %v8042_v28, %v8045_v32  ;;  %v3553_v51 = vsel %vm6451_vm4, %v3548_v61, %v3552_v14  ;;  %v3567_v52 = vsel %vm6451_vm4, %v3562_v16, %v9474_v33  ;;  %v3577_v59 = vsel %vm6451_vm4, %v3572_v15, %v3576_v53  ;;  %v8287_v61 = vpop.f32.mrf.mxu1  ;;  %v9495_v53 = vld [vmem:[#allocation19_spill] sm:$0xff]  ;;  %v9496_v16 = vld [vmem:[#allocation10_spill] sm:$0xff] }
 0x120   : > { %v8259_v50 = vsel %vm6736_vm7, %v9490_v37, %v9489_v19  ;;  %v9491_v45 = vmov %v9489_v19  ;;  %v3636_v26 = vshll.u32 %v7720_v35, 16  ;;  %v3585_v0 = vor.u32 %v3584_v9, %v3581_v48  ;;  %9494 = vst [vmem:[#allocation17_spill] sm:$0xff] %v8287_v61  ;;  %v9497_v37 = vld [vmem:[#allocation13_spill] sm:$0xff]  ;;  %v8295_v48 = vpop.f32.mrf.mxu0 }
 0x121   : > { %v4201_v58 = vrot.slane %v9491_v45, 4  ;;  %6006 = vmatprep.mubr.msk.bf16.mxu0 %vm695_vm3, %v9492_v20  ;;  %v3598_v55 = vshll.u32 %v8238_v4, 16  ;;  %v4206_v19 = vrot.slane %v7649_v11, 5  ;;  %v9493_v14 = vcombine.low %v7898_v54, %v7923_v62  ;;  %v9498_v45 = vld [vmem:[#allocation11_spill] sm:$0xff] }
 0x122   : > { %v3595_v33 = vor.u32 %v3594_v1, %v8240_v10  ;;  %v3609_v15 = vor.u32 %v9496_v16, %v9495_v53  ;;  %v3619_v20 = vor.u32 %v9498_v45, %v9497_v37  ;;  %v3622_v9 = vshll.u32 %v8265_v3, 16 }
 0x123   : > { %5969 = vmatmul.mubr.msk.bf16.gmra.mxu1 %vm695_vm3, %v9493_v14  ;;  %v9499_v11 = vcombine.low %v8067_v60, %v8071_v34  ;;  %v8301_v54 = vcombine.low %v3543_v21, %v3553_v51  ;;  %v8303_v62 = vcombine.low %v3567_v52, %v3577_v59  ;;  %v8307_v1 = vsel %vm6736_vm7, %v4201_v58, %v4202_v30  ;;  %v5309_v30 = vld [vmem:[%s6406_s9 + $0x68] sm:$0x1] }
 0x124   : > { %v5407_v14 = vrot.slane %v7639_v12, 9  ;;  %v9500_v53 = vshrl.u32 %v7708_v43, 16  ;;  %v9501_v45 = vshll.u32 %v7708_v43, 16  ;;  %v8314_v60 = vrot.slane %v3636_v26, 5 }
 0x125   : > { %5972 = vmatprep.mubr.msk.bf16.mxu1 %vm695_vm3, %v9499_v11  ;;  %v9502_v34 = vshrl.u32 %v7720_v35, 16  ;;  %v3586_v51 = vrot.slane %v3585_v0, 4  ;;  %v3600_v52 = vrot.slane %v3598_v55, 5  ;;  %v4208_v59 = vrot.slane %v4206_v19, 4  ;;  %v8320_v11 = vpop.f32.mrf.mxu1 }
 0x126   : > { %v3629_v16 = vrot.slane %v9500_v53, 4  ;;  %v3632_v41 = vrot.slane %v9501_v45, 5  ;;  %v4209_v58 = vrot.slane %v8238_v4, 5  ;;  %9503 = vst [vmem:[#allocation9_spill] sm:$0xff] %v8320_v11  ;;  %v3596_v12 = vrot.slane %v3595_v33, 4  ;;  %v8325_v45 = vpop.f32.mrf.mxu0 }
 0x127   : > { %v3642_v21 = vrot.slane %v9502_v34, 4  ;;  %v3610_v57 = vrot.slane %v3609_v15, 4  ;;  %v3620_v61 = vrot.slane %v3619_v20, 4  ;;  %v3624_v53 = vrot.slane %v3622_v9, 5 }
 0x128   : > { %v9504_v26 = vcombine.low %v8062_v42, %v8074_v7  ;;  %v8333_v0 = vsel %vm6736_vm7, %v5407_v14, %v4206_v19  ;;  %v9505_v4 = vrot.slane %v7665_v6, 5  ;;  %v4216_v33 = vrot.slane %v8265_v3, 5  ;;  %v8346_v14 = vpop.f32.mrf.mxu0 }
 0x129   : > { %v4220_v15 = vrot.slane %v7720_v35, 5  ;;  %v9506_v20 = vcombine.low %v8153_v27, %v8172_v17  ;;  %v3633_v9 = vor.u32 %v3632_v41, %v3629_v16  ;;  %v3643_v34 = vor.u32 %v3642_v21, %v8314_v60  ;;  %v9509_v17 = vld [vmem:[#allocation21_spill] sm:$0xff]  ;;  %v9510_v41 = vld [vmem:[#allocation32_spill] sm:$0xff] }
 0x12a   : > { %6007 = vmatmul.mubr.msk.bf16.gmra.mxu0 %vm695_vm3, %v9504_v26  ;;  %v4215_v55 = vrot.slane %v9505_v4, 4  ;;  %v3646_v26 = vshll.u32 %v5309_v30, 16  ;;  %v3657_v19 = vor.u32 %v7790_v2, %v7788_v29  ;;  %v3591_v3 = vsel %vm6451_vm4, %v3586_v51, %v8240_v10  ;;  %v8362_v29 = vpop.f32.mrf.mxu1 }
 0x12b   : > { %6046 = vmatprep.mubr.msk.bf16.mxu0 %vm695_vm3, %v9506_v20  ;;  %v9507_v35 = vmov %v9505_v4  ;;  %v9508_v4 = vrot.slane %v7655_v24, 9  ;;  %v3667_v16 = vor.u32 %v9510_v41, %v9509_v17  ;;  %v3670_v21 = vshll.u32 %v8323_v40, 16  ;;  %9511 = vst [vmem:[#allocation31_spill] sm:$0xff] %v8362_v29  ;;  %v8379_v20 = vpop.f32.mrf.mxu0 }
 0x12c   : > { %v9512_v2 = vcombine.low %v7970_v13, %v8000_v38  ;;  %v3601_v6 = vsel %vm6451_vm4, %v3596_v12, %v3600_v52  ;;  %v8372_v24 = vsel %vm6736_vm7, %v4208_v59, %v4209_v58  ;;  %v3615_v10 = vsel %vm6451_vm4, %v3610_v57, %v9497_v37  ;;  %v8388_v58 = vpop.f32.mrf.mxu1 }
 0x12d   : > { %v8357_v27 = vsel %vm6736_vm7, %v9508_v4, %v9507_v35  ;;  %v3625_v51 = vsel %vm6451_vm4, %v3620_v61, %v3624_v53  ;;  %v8385_v13 = vsel %vm6736_vm7, %v4215_v55, %v4216_v33  ;;  %v5409_v38 = vrot.slane %v7708_v43, 9  ;;  %9513 = vst [vmem:[#allocation8_spill] sm:$0xff] %v8388_v58  ;;  %v8390_v61 = vpop.f32.mrf.mxu0  ;;  %v9596_v56 = vld [vmem:[#allocation9_spill] sm:$0xff] }
 0x12e   : > { %5973 = vmatmul.mubr.msk.bf16.gmra.mxu1 %vm695_vm3, %v9512_v2  ;;  %v4222_v52 = vrot.slane %v4220_v15, 4  ;;  %v4223_v59 = vrot.slane %v5309_v30, 5  ;;  %v3634_v12 = vrot.slane %v3633_v9, 4  ;;  %v3644_v57 = vrot.slane %v3643_v34, 4  ;;  %v8395_v33 = vpop.f32.mrf.mxu1  ;;  %v9516_v34 = vld [vmem:[#allocation24_spill] sm:$0xff] }
 0x12f   : > { %6012 = vmatprep.mubr.msk.bf16.mxu1 %vm695_vm3, %v8219_v44  ;;  %v3648_v37 = vrot.slane %v3646_v26, 5  ;;  %v3658_v35 = vrot.slane %v3657_v19, 4  ;;  %v3668_v53 = vrot.slane %v3667_v16, 4  ;;  %v3672_v4 = vrot.slane %v3670_v21, 5  ;;  %9515 = vst [vmem:[#allocation15_spill] sm:$0xff] %v8395_v33  ;;  %v5844_v19 = vpop.f32.mrf.mxu0 }
 0x130   : > { %v9514_v44 = vrot.slane %v7737_v5, 5  ;;  %v4230_v55 = vrot.slane %v8323_v40, 5  ;;  %v5423_v43 = vcombine.low %v8259_v50, %v8307_v1  ;;  %v8399_v30 = vcombine.low %v3591_v3, %v3601_v6  ;;  %v9518_v1 = vld [vmem:[#allocation22_spill] sm:$0xff]  ;;  %v8420_v6 = vpop.f32.mrf.mxu1 }
 0x131   : > { %v5424_v9 = vcombine.low %v8333_v0, %v8372_v24  ;;  %v3684_v26 = vshll.u32 %v9516_v34, 16  ;;  %v9517_v16 = vcombine.low %v8161_v47, %v8177_v39  ;;  %v8410_v40 = vsel %vm6736_vm7, %v5409_v38, %v4220_v15  ;;  %9521 = vst [vmem:[#allocation18_spill] sm:$0xff] %v8420_v6 }
 0x132   : > { %v4229_v41 = vrot.slane %v9514_v44, 4  ;;  %v8414_v50 = vsel %vm6736_vm7, %v4222_v52, %v4223_v59  ;;  %v9519_v3 = vshrl.u32 %v9518_v1, 16  ;;  %v9520_v0 = vshll.u32 %v9518_v1, 16  ;;  %v5315_v52 = vld [vmem:[%s6406_s9 + $0x80] sm:$0x1]  ;;  %v1467_v59 = vpop.f32.mrf.mxu0 }
 0x133   : > { %6047 = vmatmul.mubr.msk.bf16.vlgmr.msra.gmra.mxu0 %vm695_vm3, %v9517_v16  ;;  %v9522_v47 = vcombine.low %v8231_v46, %v8235_v23  ;;  %v8426_v39 = vcombine.low %v3615_v10, %v3625_v51  ;;  %v3639_v24 = vsel %vm6451_vm4, %v3634_v12, %v8314_v60  ;;  %v3649_v38 = vsel %vm6451_vm4, %v3644_v57, %v3648_v37  ;;  %v9524_v51 = vld [vmem:[#allocation23_spill] sm:$0xff]  ;;  %v5810_v12 = vpop.f32.mrf.mxu1 }
 0x134   : > { %v3677_v21 = vrot.slane %v9519_v3, 4  ;;  %v3680_v2 = vrot.slane %v9520_v0, 5  ;;  %v3663_v46 = vsel %vm6451_vm4, %v3658_v35, %v9509_v17  ;;  %v3673_v23 = vsel %vm6451_vm4, %v3668_v53, %v3672_v4  ;;  %v8463_v53 = vld [vmem:[%s6406_s9 + $0x8c] sm:$0x1]  ;;  %v9527_v4 = vld [vmem:[#allocation33_spill] sm:$0xff] }
 0x135   : > { %6050 = vmatprep.mubr.msk.bf16.mxu0 %vm695_vm3, %v9522_v47  ;;  %v9523_v10 = vmov %v9514_v44  ;;  %v9525_v44 = vrot.slane %v9524_v51, 9  ;;  %v8451_v60 = vsel %vm6736_vm7, %v4229_v41, %v4230_v55  ;;  %v8457_v57 = vrot.slane %v3684_v26, 5  ;;  %v5845_v41 = vpop.f32.mrf.mxu0  ;;  %v1074_v47 = vpop.f32.mrf.mxu1  ;;  %v9528_v51 = vld [vmem:[#allocation34_spill] sm:$0xff] }
 0x136   : > { %6013 = vmatmul.mubr.msk.bf16.vlgmr.msra.gmra.mxu1 %vm695_vm3, %v8221_v36  ;;  %v9526_v5 = vshrl.u32 %v9516_v34, 16  ;;  %v4234_v35 = vrot.slane %v9516_v34, 5  ;;  %v1083_v3 = vadd.f32 %v5810_v12, %v9527_v4  ;;  %v8468_v55 = vcombine.low %v3639_v24, %v3649_v38  ;;  %v9531_v4 = vld [vmem:[#allocation40_spill] sm:$0xff]  ;;  %v9532_v24 = vld [vmem:[#allocation27_spill] sm:$0xff] }
 0x137   : > { %v8447_v16 = vsel %vm6736_vm7, %v9525_v44, %v9523_v10  ;;  %6016 = vmatprep.mubr.msk.bf16.mxu1 %vm695_vm3, %v8301_v54  ;;  %v3681_v36 = vor.u32 %v3680_v2, %v3677_v21  ;;  %v3694_v0 = vshll.u32 %v5315_v52, 16  ;;  %v8470_v26 = vcombine.low %v3663_v46, %v3673_v23  ;;  %v9529_v44 = vld [vmem:[#allocation35_spill] sm:$0xff]  ;;  %v1470_v54 = vpop.f32.mrf.mxu0  ;;  %v5811_v46 = vpop.f32.mrf.mxu1 }
 0x138   : > { %v3690_v37 = vrot.slane %v9526_v5, 4  ;;  %v5411_v34 = vrot.slane %v9518_v1, 9  ;;  %v3705_v5 = vor.u32 %v9529_v44, %v9528_v51  ;;  %v8477_v12 = vadd.f32 %v5844_v19, %v1083_v3  ;;  %v9533_v38 = vld [vmem:[#allocation39_spill] sm:$0xff]  ;;  %v9534_v1 = vld [vmem:[#allocation37_spill] sm:$0xff] }
 0x139   : > { %v1075_v17 = vadd.f32 %v1074_v47, %v9531_v4  ;;  %v3715_v21 = vor.u32 %v9533_v38, %v9532_v24  ;;  %v3718_v2 = vshll.u32 %v8463_v53, 16  ;;  %v4236_v10 = vrot.slane %v4234_v35, 4  ;;  %v9536_v19 = vld [vmem:[#allocation43_spill] sm:$0xff]  ;;  %v5848_v51 = vpop.f32.mrf.mxu0  ;;  %v1077_v4 = vpop.f32.mrf.mxu1 }
 0x13a   : > { %9530 = vst [vmem:[#allocation16_spill] sm:$0xff] %v8477_v12  ;;  %v3691_v23 = vor.u32 %v3690_v37, %v8457_v57  ;;  %v4237_v15 = vrot.slane %v5315_v52, 5  ;;  %v3732_v6 = vshll.u32 %v9534_v1, 16  ;;  %v1086_v3 = vadd.f32 %v5811_v46, %v9536_v19 }
 0x13b   : > { %v8485_v33 = vadd.f32 %v1467_v59, %v1075_v17  ;;  %6051 = vmatmul.mubr.msk.bf16.gmra.mxu0 %vm695_vm3, %v5423_v43  ;;  %v8489_v47 = vrot.slane %v3681_v36, 4  ;;  %v8491_v44 = vrot.slane %v3694_v0, 5  ;;  %v8496_v37 = vsel %vm6736_vm7, %v5411_v34, %v4234_v35  ;;  %v8501_v59 = vld [vmem:[%s6406_s9 + $0x98] sm:$0x1]  ;;  %v9537_v17 = vld [vmem:[#allocation36_spill] sm:$0xff]  ;;  %v1483_v12 = vpop.f32.mrf.mxu0  ;;  %v5814_v35 = vpop.f32.mrf.mxu1 }
 0x13c   : > { %6054 = vmatprep.mubr.msk.bf16.mxu0 %vm695_vm3, %v5424_v9  ;;  %v8498_v52 = vrot.slane %v3705_v5, 4  ;;  %v9538_v38 = vshrl.u32 %v9537_v17, 16  ;;  %v9539_v43 = vshll.u32 %v9537_v17, 16  ;;  %v8507_v19 = vadd.f32 %v5845_v41, %v1086_v3  ;;  %v9541_v0 = vld [vmem:[#allocation44_spill] sm:$0xff] }
 0x13d   : > { %9535 = vst [vmem:[#allocation19_spill] sm:$0xff] %v8485_v33  ;;  %v1078_v33 = vadd.f32 %v1077_v4, %v9541_v0  ;;  %v8510_v9 = vrot.slane %v3715_v21, 4  ;;  %v8512_v58 = vrot.slane %v3718_v2, 5  ;;  %v3692_v34 = vrot.slane %v3691_v23, 4  ;;  %v9544_v21 = vld [vmem:[#allocation49_spill] sm:$0xff]  ;;  %v5849_v2 = vpop.f32.mrf.mxu0 }
 0x13e   : > { %v3725_v46 = vrot.slane %v9538_v38, 4  ;;  %v3728_v36 = vrot.slane %v9539_v43, 5  ;;  %9540 = vst [vmem:[#allocation10_spill] sm:$0xff] %v8507_v19  ;;  %6017 = vmatmul.mubr.msk.bf16.gmra.mxu1 %vm695_vm3, %v8303_v62  ;;  %v8518_v5 = vsel %vm6736_vm7, %v4236_v10, %v4237_v15  ;;  %v8520_v38 = vrot.slane %v3732_v6, 5  ;;  %v1090_v6 = vpop.f32.mrf.mxu1  ;;  %v9545_v10 = vld [vmem:[#allocation26_spill] sm:$0xff]  ;;  %v9547_v23 = vld [vmem:[#allocation25_spill] sm:$0xff] }
 0x13f   : > { %v9542_v41 = vshrl.u32 %v9534_v1, 16  ;;  %v8524_v4 = vadd.f32 %v1470_v54, %v1078_v33  ;;  %v1099_v43 = vadd.f32 %v5814_v35, %v9544_v21  ;;  %6020 = vmatprep.mubr.msk.bf16.mxu1 %vm695_vm3, %v8399_v30  ;;  %v3687_v62 = vsel %vm6451_vm4, %v8489_v47, %v8457_v57 }
 0x140   : > { %v3742_v15 = vshll.u32 %v8501_v59, 16  ;;  %v9546_v54 = vrot.slane %v9545_v10, 5  ;;  %v9548_v0 = vrot.slane %v9547_v23, 9  ;;  %v3729_v35 = vor.u32 %v3728_v36, %v3725_v46  ;;  %v5815_v11 = vpop.f32.mrf.mxu1  ;;  %v8564_v36 = vld [vmem:[%s6406_s9 + $0xa4] sm:$0x1]  ;;  %v9555_v10 = vld [vmem:[#allocation29_spill] sm:$0xff] }
 0x141   : > { %v3738_v3 = vrot.slane %v9542_v41, 4  ;;  %9543 = vst [vmem:[#allocation13_spill] sm:$0xff] %v8524_v4  ;;  %v4248_v57 = vrot.slane %v9534_v1, 5  ;;  %v8547_v47 = vadd.f32 %v5848_v51, %v1099_v43  ;;  %v9549_v41 = vld [vmem:[#allocation51_spill] sm:$0xff]  ;;  %v1486_v4 = vpop.f32.mrf.mxu0  ;;  %v5428_v19 = vcombine.low %v8496_v37, %v8518_v5  ;;  %v9551_v5 = vld [vmem:[#allocation57_spill] sm:$0xff] }
 0x142   : > { %v8544_v30 = vsel %vm6736_vm7, %v9548_v0, %v9546_v54  ;;  %v1091_v21 = vadd.f32 %v1090_v6, %v9549_v41  ;;  %v9550_v33 = vmov %v9546_v54  ;;  %v3697_v54 = vsel %vm6451_vm4, %v3692_v34, %v8491_v44  ;;  %v9557_v41 = vld [vmem:[#allocation46_spill] sm:$0xff] }
 0x143   : > { %v4243_v29 = vrot.slane %v9550_v33, 4  ;;  %v3721_v1 = vsel %vm6451_vm4, %v8510_v9, %v8512_v58  ;;  %v4244_v51 = vrot.slane %v8463_v53, 5  ;;  %v3739_v46 = vor.u32 %v3738_v3, %v8520_v38  ;;  %v5852_v6 = vpop.f32.mrf.mxu0  ;;  %v1093_v58 = vpop.f32.mrf.mxu1 }
 0x144   : > { %v8566_v37 = vadd.f32 %v1483_v12, %v1091_v21  ;;  %v1102_v43 = vadd.f32 %v5815_v11, %v9551_v5  ;;  %v9552_v33 = vcombine.low %v8357_v27, %v8385_v13  ;;  %v3744_v44 = vrot.slane %v3742_v15, 5  ;;  %v9554_v11 = vld [vmem:[#allocation45_spill] sm:$0xff] }
 0x145   : > { %v5413_v34 = vrot.slane %v9537_v17, 9  ;;  %v9553_v53 = vcombine.low %v8410_v40, %v8414_v50  ;;  %v3730_v9 = vrot.slane %v3729_v35, 4  ;;  %v4250_v12 = vrot.slane %v4248_v57, 4  ;;  %v9556_v27 = vld [vmem:[#allocation61_spill] sm:$0xff]  ;;  %v1499_v15 = vpop.f32.mrf.mxu0  ;;  %v9558_v17 = vld [vmem:[#allocation47_spill] sm:$0xff]  ;;  %v5818_v40 = vpop.f32.mrf.mxu1 }
 0x146   : > { %6055 = vmatmul.mubr.msk.bf16.gmra.mxu0 %vm695_vm3, %v9552_v33  ;;  %v4251_v3 = vrot.slane %v8501_v59, 5  ;;  %v3753_v23 = vor.u32 %v9555_v10, %v9554_v11  ;;  %v8581_v0 = vadd.f32 %v5849_v2, %v1102_v43  ;;  %v1094_v13 = vadd.f32 %v1093_v58, %v9556_v27  ;;  %6021 = vmatmul.mubr.msk.bf16.gmra.mxu1 %vm695_vm3, %v8426_v39 }
 0x147   : > { %6058 = vmatprep.mubr.msk.bf16.mxu0 %vm695_vm3, %v9553_v53  ;;  %v3763_v21 = vor.u32 %v9558_v17, %v9557_v41  ;;  %v3766_v5 = vshll.u32 %v8564_v36, 16  ;;  %v3740_v50 = vrot.slane %v3739_v46, 4  ;;  %v9559_v59 = vshrl.u32 %v7965_v18, 16  ;;  %v5853_v11 = vpop.f32.mrf.mxu0  ;;  %6024 = vmatprep.mubr.msk.bf16.mxu1 %vm695_vm3, %v8468_v55  ;;  %v1106_v46 = vpop.f32.mrf.mxu1 }
 0x148   : > { %v9560_v33 = vshll.u32 %v7965_v18, 16  ;;  %v3780_v43 = vshll.u32 %v7991_v8, 16  ;;  %v8594_v58 = vadd.f32 %v1486_v4, %v1094_v13  ;;  %v1115_v53 = vadd.f32 %v5818_v40, %v8168_v63 }
 0x149   : > { %v3773_v35 = vrot.slane %v9559_v59, 4  ;;  %v5379_v10 = vcombine.low %v3687_v62, %v3697_v54  ;;  %v8601_v39 = vsel %vm6736_vm7, %v4243_v29, %v4244_v51  ;;  %v3735_v27 = vsel %vm6451_vm4, %v3730_v9, %v8520_v38  ;;  %v9561_v62 = vld [vmem:[#allocation20_spill] sm:$0xff]  ;;  %v1502_v54 = vpop.f32.mrf.mxu0  ;;  %v5819_v40 = vpop.f32.mrf.mxu1 }
 0x14a   : > { %v3776_v2 = vrot.slane %v9560_v33, 5  ;;  %v8608_v4 = vsel %vm6736_vm7, %v5413_v34, %v4248_v57  ;;  %v8612_v63 = vsel %vm6736_vm7, %v4250_v12, %v4251_v3  ;;  %v3754_v13 = vrot.slane %v3753_v23, 4 }
 0x14b   : > { %v8614_v55 = vadd.f32 %v5852_v6, %v1115_v53  ;;  %v1107_v29 = vadd.f32 %v1106_v46, %v9561_v62  ;;  %v3764_v51 = vrot.slane %v3763_v21, 4  ;;  %v3768_v17 = vrot.slane %v3766_v5, 5  ;;  %v5856_v23 = vpop.f32.mrf.mxu0  ;;  %v9564_v21 = vld [vmem:[#allocation41_spill] sm:$0xff] }
 0x14c   : > { %v3745_v38 = vsel %vm6451_vm4, %v3740_v50, %v3744_v44  ;;  %v3777_v9 = vor.u32 %v3776_v2, %v3773_v35  ;;  %v8619_v57 = vrot.slane %v3780_v43, 5  ;;  %v9562_v34 = vshrl.u32 %v7991_v8, 16  ;;  %v5327_v50 = vld [vmem:[%s6406_s9 + $0xb0] sm:$0x1]  ;;  %v1109_v35 = vpop.f32.mrf.mxu1 }
 0x14d   : > { %v8623_v3 = vadd.f32 %v1499_v15, %v1107_v29  ;;  %v1118_v6 = vadd.f32 %v5819_v40, %v8248_v22  ;;  %v9563_v59 = vcombine.low %v8447_v16, %v8451_v60  ;;  %v9565_v5 = vrot.slane %v9564_v21, 5  ;;  %v1515_v43 = vpop.f32.mrf.mxu0  ;;  %v9570_v29 = vld [vmem:[#allocation52_spill] sm:$0xff] }
 0x14e   : > { %v3786_v12 = vrot.slane %v9562_v34, 4  ;;  %v4258_v44 = vrot.slane %v8564_v36, 5  ;;  %v9566_v22 = vsel %vm6451_vm4, %v8498_v52, %v9532_v24  ;;  %v5429_v16 = vcombine.low %v8544_v30, %v8601_v39  ;;  %v5822_v52 = vpop.f32.mrf.mxu1  ;;  %6025 = vmatmul.mubr.msk.bf16.gmra.mxu1 %vm695_vm3, %v8470_v26 }
 0x14f   : > { %6059 = vmatmul.mubr.msk.bf16.gmra.mxu0 %vm695_vm3, %v9563_v59  ;;  %v4257_v33 = vrot.slane %v9565_v5, 4  ;;  %v5380_v15 = vcombine.low %v9566_v22, %v3721_v1  ;;  %v5430_v60 = vcombine.low %v8608_v4, %v8612_v63  ;;  %v3759_v36 = vsel %vm6451_vm4, %v3754_v13, %v9557_v41  ;;  %v5857_v46 = vpop.f32.mrf.mxu0  ;;  %6028 = vmatprep.mubr.msk.bf16.mxu1 %vm695_vm3, %v5379_v10 }
 0x150   : > { %6062 = vmatprep.mubr.msk.bf16.mxu0 %vm695_vm3, %v5428_v19  ;;  %v8647_v2 = vadd.f32 %v5853_v11, %v1118_v6  ;;  %v1110_v19 = vadd.f32 %v1109_v35, %v8295_v48  ;;  %v3769_v53 = vsel %vm6451_vm4, %v3764_v51, %v3768_v17  ;;  %v4262_v24 = vrot.slane %v7991_v8, 5  ;;  %v9568_v8 = vld [vmem:[#allocation30_spill] sm:$0xff]  ;;  %v1122_v13 = vpop.f32.mrf.mxu1 }
 0x151   : > { %v5381_v30 = vcombine.low %v3735_v27, %v3745_v38  ;;  %v8655_v1 = vrot.slane %v3777_v9, 4  ;;  %v3787_v39 = vor.u32 %v3786_v12, %v8619_v57  ;;  %v3790_v41 = vshll.u32 %v5327_v50, 16  ;;  %v1518_v38 = vpop.f32.mrf.mxu0 }
 0x152   : > { %v8658_v11 = vadd.f32 %v1502_v54, %v1110_v19  ;;  %v1131_v48 = vadd.f32 %v5822_v52, %v8325_v45  ;;  %v9567_v4 = vmov %v9565_v5  ;;  %v9569_v63 = vrot.slane %v9568_v8, 9  ;;  %v9571_v54 = vld [vmem:[#allocation53_spill] sm:$0xff]  ;;  %v5823_v12 = vpop.f32.mrf.mxu1  ;;  %v9576_v8 = vld [vmem:[#allocation55_spill] sm:$0xff] }
 0x153   : > { %v8672_v27 = vsel %vm6736_vm7, %v4257_v33, %v4258_v44  ;;  %v8674_v62 = vcombine.low %v3759_v36, %v3769_v53  ;;  %v5415_v45 = vrot.slane %v7965_v18, 9  ;;  %v3801_v10 = vor.u32 %v9571_v54, %v9570_v29  ;;  %v5330_v33 = vld [vmem:[%s6406_s9 + $0xbc] sm:$0x1] }
 0x154   : > { %v8668_v26 = vsel %vm6736_vm7, %v9569_v63, %v9567_v4  ;;  %v3828_v51 = vshll.u32 %v8045_v32, 16  ;;  %v8680_v17 = vadd.f32 %v5856_v23, %v1131_v48  ;;  %v1123_v40 = vadd.f32 %v1122_v13, %v8346_v14  ;;  %v5860_v14 = vpop.f32.mrf.mxu0  ;;  %v1125_v36 = vpop.f32.mrf.mxu1  ;;  %v9575_v4 = vld [vmem:[#allocation54_spill] sm:$0xff] }
 0x155   : > { %v4264_v9 = vrot.slane %v4262_v24, 4  ;;  %v4265_v34 = vrot.slane %v5327_v50, 5  ;;  %v5431_v6 = vcombine.low %v8668_v26, %v8672_v27  ;;  %v3783_v18 = vsel %vm6451_vm4, %v8655_v1, %v8619_v57  ;;  %v9578_v13 = vld [vmem:[#allocation38_spill] sm:$0xff] }
 0x156   : > { %v3788_v59 = vrot.slane %v3787_v39, 4  ;;  %v3792_v21 = vrot.slane %v3790_v41, 5  ;;  %v8689_v5 = vadd.f32 %v1515_v43, %v1123_v40  ;;  %v1134_v23 = vadd.f32 %v5823_v12, %v8379_v20  ;;  %v1531_v1 = vpop.f32.mrf.mxu0  ;;  %v5333_v41 = vld [vmem:[%s6406_s9 + $0xc8] sm:$0x1]  ;;  %v5826_v48 = vpop.f32.mrf.mxu1  ;;  %6029 = vmatmul.mubr.msk.bf16.gmra.mxu1 %vm695_vm3, %v5380_v15  ;;  %v9579_v12 = vld [vmem:[#allocation42_spill] sm:$0xff] }
 0x157   : > { %6063 = vmatmul.mubr.msk.bf16.gmra.mxu0 %vm695_vm3, %v5429_v16  ;;  %v9572_v44 = vshrl.u32 %v8042_v28, 16  ;;  %v9573_v35 = vshll.u32 %v8042_v28, 16  ;;  %v4263_v57 = vsel %vm6736_vm7, %v5415_v45, %v4262_v24  ;;  %v8701_v19 = vrot.slane %v3801_v10, 4  ;;  %6032 = vmatprep.mubr.msk.bf16.mxu1 %vm695_vm3, %v5381_v30 }
 0x158   : > { %6066 = vmatprep.mubr.msk.bf16.mxu0 %vm695_vm3, %v5430_v60  ;;  %v8703_v20 = vrot.slane %v3828_v51, 5  ;;  %v9574_v43 = vshrl.u32 %v8045_v32, 16  ;;  %v8707_v53 = vadd.f32 %v5857_v46, %v1134_v23  ;;  %v1126_v52 = vadd.f32 %v1125_v36, %v8390_v61  ;;  %v5861_v29 = vpop.f32.mrf.mxu0  ;;  %v1138_v15 = vpop.f32.mrf.mxu1 }
 0x159   : > { %v3821_v50 = vrot.slane %v9572_v44, 4  ;;  %v3824_v22 = vrot.slane %v9573_v35, 5  ;;  %v4266_v39 = vsel %vm6736_vm7, %v4264_v9, %v4265_v34  ;;  %v4276_v60 = vrot.slane %v8045_v32, 5 }
 0x15a   : > { %v3834_v16 = vrot.slane %v9574_v43, 4  ;;  %v3793_v24 = vsel %vm6451_vm4, %v3788_v59, %v3792_v21  ;;  %v3811_v63 = vor.u32 %v9576_v8, %v9575_v4  ;;  %v3814_v46 = vshll.u32 %v5330_v33, 16  ;;  %v5827_v44 = vpop.f32.mrf.mxu1 }
 0x15b   : > { %v9577_v26 = vrot.slane %v7994_v25, 5  ;;  %v8721_v27 = vadd.f32 %v1518_v38, %v1126_v52  ;;  %v1147_v45 = vadd.f32 %v5826_v48, %v9578_v13  ;;  %v4272_v32 = vrot.slane %v5330_v33, 5  ;;  %v1534_v38 = vpop.f32.mrf.mxu0 }
 0x15c   : > { %v3825_v54 = vor.u32 %v3824_v22, %v3821_v50  ;;  %v5432_v10 = vcombine.low %v4263_v57, %v4266_v39  ;;  %v3835_v51 = vor.u32 %v3834_v16, %v8703_v20  ;;  %v3838_v40 = vshll.u32 %v5333_v41, 16  ;;  %v1141_v39 = vpop.f32.mrf.mxu1 }
 0x15d   : > { %v4271_v61 = vrot.slane %v9577_v26, 4  ;;  %v5417_v9 = vrot.slane %v8042_v28, 9  ;;  %v8727_v34 = vadd.f32 %v5860_v14, %v1147_v45  ;;  %v1139_v59 = vadd.f32 %v1138_v15, %v9579_v12  ;;  %v9582_v14 = vld [vmem:[#allocation28_spill] sm:$0xff]  ;;  %v5864_v43 = vpop.f32.mrf.mxu0  ;;  %v9586_v45 = vld [vmem:[#allocation62_spill] sm:$0xff] }
 0x15e   : > { %v4278_v21 = vrot.slane %v4276_v60, 4  ;;  %v4279_v23 = vrot.slane %v5333_v41, 5  ;;  %v5383_v35 = vcombine.low %v3783_v18, %v3793_v24  ;;  %v3812_v30 = vrot.slane %v3811_v63, 4  ;;  %v5336_v41 = vld [vmem:[%s6406_s9 + $0xd4] sm:$0x1]  ;;  %6033 = vmatmul.mubr.msk.bf16.gmra.mxu1 %vm695_vm3, %v8674_v62  ;;  %s4876_s9 = sshll.u32 %s9061_s7, 4  ;;  %s9145_s9 = int_to_ptr.vmem [resolvable:$true] %s4876_s9 }
 0x15f   : > { %v3816_v33 = vrot.slane %v3814_v46, 5  ;;  %v9580_v50 = vmov %v9577_v26  ;;  %v9581_v22 = vrot.slane %v7982_v49, 9  ;;  %v8736_v28 = vadd.f32 %v1531_v1, %v1139_v59  ;;  %6067 = vmatmul.mubr.msk.bf16.gmra.mxu0 %vm695_vm3, %v5431_v6  ;;  %v9583_v6 = vld [vmem:[#allocation48_spill] sm:$0xff]  ;;  %v1547_v8 = vpop.f32.mrf.mxu0  ;;  %v5830_v46 = vpop.f32.mrf.mxu1  ;;  %v9584_v26 = vld [vmem:[#allocation58_spill] sm:$0xff]  ;;  %s6201_s21 = scalar_lea.vmem %s9145_s9, 2048  ;;  %p6208_p1 = scmp.lt.s32.totalorder %s9145_s9, %s6206_s26 }
 0x160   : > { %v1150_v57 = vadd.f32 %v5827_v44, %v9582_v14  ;;  %v4273_v18 = vsel %vm6736_vm7, %v4271_v61, %v4272_v32  ;;  %v3826_v16 = vrot.slane %v3825_v54, 4  ;;  %v4283_v52 = vrot.slane %v8074_v7, 5  ;;  %6070 = vmatprep.mubr.msk.bf16.mxu0 %vm695_vm3, %v5432_v10  ;;  %v9585_v61 = vld [vmem:[#allocation60_spill] sm:$0xff]  ;;  %6036 = vmatprep.mubr.msk.bf16.mxu1 %vm695_vm3, %v5383_v35  ;;  %p6202_p12 = scmp.ne.s32.totalorder %s9145_s9, %s6201_s21  ;;  %p6209_p2 = scmp.lt.s32.totalorder %s6207_s27, %s6201_s21 }
 0x161   : > { %v4270_v36 = vsel %vm6736_vm7, %v9581_v22, %v9580_v50  ;;  %v3807_v49 = vsel %vm6451_vm4, %v8701_v19, %v9575_v4  ;;  %v3836_v25 = vrot.slane %v3835_v51, 4  ;;  %v3840_v1 = vrot.slane %v3838_v40, 5  ;;  %v5865_v10 = vpop.f32.mrf.mxu0  ;;  %v1154_v40 = vpop.f32.mrf.mxu1 }
 0x162   : > { %v8749_v48 = vadd.f32 %v5861_v29, %v1150_v57  ;;  %v1142_v24 = vadd.f32 %v1141_v39, %v9583_v6  ;;  %v4277_v63 = vsel %vm6736_vm7, %v5417_v9, %v4276_v60  ;;  %v4280_v7 = vsel %vm6736_vm7, %v4278_v21, %v4279_v23  ;;  %v9587_v29 = vld [vmem:[#allocation64_spill] sm:$0xff]  ;;  %v9588_v60 = vld [vmem:[#allocation50_spill] sm:$0xff]  ;;  %p6203_p13 = pnand %p6202_p12, %p6373_p4  ;;  %p6210_p3 = por %p6209_p2, %p6208_p1 }
 0x163   : > { %v3817_v19 = vsel %vm6451_vm4, %v3812_v30, %v3816_v33  ;;  %v5433_v4 = vcombine.low %v4270_v36, %v4273_v18  ;;  %v3849_v13 = vor.u32 %v9585_v61, %v9584_v26  ;;  %v3859_v32 = vor.u32 %v9587_v29, %v9586_v45  ;;  %v1550_v30 = vpop.f32.mrf.mxu0  ;;  %v5831_v33 = vpop.f32.mrf.mxu1  ;;  %v9594_v61 = vld [vmem:[#allocation12_spill] sm:$0xff] }
 0x164   : > { %v8764_v54 = vadd.f32 %v1534_v38, %v1142_v24  ;;  %v1163_v15 = vadd.f32 %v5830_v46, %v9588_v60  ;;  %v3831_v62 = vsel %vm6451_vm4, %v3826_v16, %v8703_v20  ;;  %v3862_v51 = vshll.u32 %v5336_v41, 16  ;;  %v9589_v38 = vld [vmem:[#allocation56_spill] sm:$0xff]  ;;  %v9590_v20 = vld [vmem:[#allocation59_spill] sm:$0xff]  ;;  %p6204_p0 = pneg %p6203_p13 }
 0x165   : > { %v3841_v9 = vsel %vm6451_vm4, %v3836_v25, %v3840_v1  ;;  %v5434_v12 = vcombine.low %v4277_v63, %v4280_v7  ;;  %v4285_v59 = vrot.slane %v4283_v52, 4  ;;  %v4286_v21 = vrot.slane %v5336_v41, 5  ;;  %v5868_v57 = vpop.f32.mrf.mxu0  ;;  %v1157_v39 = vpop.f32.mrf.mxu1  ;;  %v9592_v41 = vld [vmem:[#allocation63_spill] sm:$0xff] }
 0x166   : > { %v8773_v23 = vadd.f32 %v5864_v43, %v1163_v15  ;;  %v1155_v44 = vadd.f32 %v1154_v40, %v9589_v38  ;;  %v5384_v50 = vcombine.low %v3807_v49, %v3817_v19  ;;  %v3850_v35 = vrot.slane %v3849_v13, 4  ;;  %v9595_v15 = vld [vmem:[#allocation17_spill] sm:$0xff]  ;;  %v9597_v38 = vld [vmem:[#allocation31_spill] sm:$0xff]  ;;  %p6211_p5 = pnand %p6210_p3, %p6204_p0 }
 0x167   : > { %v3860_v22 = vrot.slane %v3859_v32, 4  ;;  %v1166_v14 = vadd.f32 %v5831_v33, %v9590_v20  ;;  %6071 = vmatmul.mubr.msk.bf16.gmra.mxu0 %vm695_vm3, %v5433_v4  ;;  %v5385_v18 = vcombine.low %v3831_v62, %v3841_v9  ;;  %v3864_v16 = vrot.slane %v3862_v51, 5  ;;  %v1563_v24 = vpop.f32.mrf.mxu0 }
 0x168   : > { %v8776_v36 = vadd.f32 %v1547_v8, %v1155_v44  ;;  %6074 = vmatprep.mubr.msk.bf16.mxu0 %vm695_vm3, %v5434_v12  ;;  %v9591_v43 = vrot.slane %v8062_v42, 9  ;;  %v4287_v49 = vsel %vm6736_vm7, %v4285_v59, %v4286_v21  ;;  %v1158_v6 = vadd.f32 %v1157_v39, %v9592_v41  ;;  %v5834_v8 = vpop.f32.mrf.mxu1  ;;  %6037 = vmatmul.mubr.msk.bf16.gmra.mxu1 %vm695_vm3, %v5384_v50  ;;  %v9593_v42 = vld [vmem:[#allocation14_spill] sm:$0xff] }
 0x169   : > { %v8787_v1 = vadd.f32 %v5865_v10, %v1166_v14  ;;  %v3855_v63 = vsel %vm6451_vm4, %v3850_v35, %v9586_v45  ;;  %v1179_v46 = vadd.f32 %v5834_v8, %v9593_v42  ;;  %6040 = vmatprep.mubr.msk.bf16.mxu1 %vm695_vm3, %v5385_v18  ;;  %v3865_v31 = vsel %vm6451_vm4, %v3860_v22, %v3864_v16  ;;  %v9598_v35 = vld [vmem:[#allocation8_spill] sm:$0xff]  ;;  %v9599_v18 = vld [vmem:[#allocation15_spill] sm:$0xff] }
 0x16a   : > { %v4284_v25 = vsel %vm6736_vm7, %v9591_v43, %v4283_v52  ;;  %v8794_v7 = vadd.f32 %v1550_v30, %v1158_v6  ;;  %v5869_v52 = vpop.f32.mrf.mxu0  ;;  %v1170_v4 = vpop.f32.mrf.mxu1  ;;  %v5386_v60 = vcombine.low %v3855_v63, %v3865_v31  ;;  %v9601_v63 = vld [vmem:[#allocation16_spill] sm:$0xff] }
 0x16b   : > { %v5435_v19 = vcombine.low %v4284_v25, %v4287_v49  ;;  %v8800_v26 = vadd.f32 %v5868_v57, %v1179_v46  ;;  %v1171_v13 = vadd.f32 %v1170_v4, %v9594_v61  ;;  %v9600_v49 = vld [vmem:[#allocation18_spill] sm:$0xff] }
 0x16c   : > { %v1566_v29 = vpop.f32.mrf.mxu0  ;;  %v5835_v32 = vpop.f32.mrf.mxu1 }
 0x16d   : > { %v8803_v45 = vadd.f32 %v1563_v24, %v1171_v13  ;;  %v1182_v10 = vadd.f32 %v5835_v32, %v9595_v15  ;;  %v9603_v32 = vld [vmem:[#allocation10_spill] sm:$0xff] }
 0x16e   : > { %v5872_v62 = vpop.f32.mrf.mxu0  ;;  %v1173_v51 = vpop.f32.mrf.mxu1 }
 0x16f   : > { %6075 = vmatmul.mubr.msk.bf16.gmra.mxu0 %vm695_vm3, %v5435_v19  ;;  %v8807_v40 = vadd.f32 %v5869_v52, %v1182_v10  ;;  %v1174_v9 = vadd.f32 %v1173_v51, %v9596_v56  ;;  %v9602_v19 = vld [vmem:[#allocation19_spill] sm:$0xff]  ;;  %v9604_v51 = vld [vmem:[#allocation13_spill] sm:$0xff] }
 0x170   : > { %v1579_v12 = vpop.f32.mrf.mxu0  ;;  %v5838_v59 = vpop.f32.mrf.mxu1  ;;  %6041 = vmatmul.mubr.msk.bf16.gmra.mxu1 %vm695_vm3, %v5386_v60 }
 0x171   : > { %v8811_v21 = vadd.f32 %v1566_v29, %v1174_v9  ;;  %v1195_v44 = vadd.f32 %v5838_v59, %v9597_v38 }
 0x172   : > { %v5873_v30 = vpop.f32.mrf.mxu0  ;;  %v1186_v33 = vpop.f32.mrf.mxu1 }
 0x173   : > { %v8814_v50 = vadd.f32 %v5872_v62, %v1195_v44  ;;  %v1187_v22 = vadd.f32 %v1186_v33, %v9598_v35 }
 0x174   : > { %v1582_v20 = vpop.f32.mrf.mxu0  ;;  %v5839_v14 = vpop.f32.mrf.mxu1 }
 0x175   : > { %v8817_v57 = vadd.f32 %v1579_v12, %v1187_v22  ;;  %v1198_v16 = vadd.f32 %v5839_v14, %v9599_v18 }
 0x176   : > { %v5912_v39 = vpop.f32.mrf.mxu0  ;;  %v1189_v43 = vpop.f32.mrf.mxu1 }
 0x177   : > { %v8820_v25 = vadd.f32 %v5873_v30, %v1198_v16  ;;  %v1190_v41 = vadd.f32 %v1189_v43, %v9600_v49 }
 0x178   : > { %v2523_v6 = vpop.f32.mrf.mxu0  ;;  %v5878_v24 = vpop.f32.mrf.mxu1 }
 0x179   : > { %v8823_v8 = vadd.f32 %v1582_v20, %v1190_v41  ;;  %v1974_v42 = vadd.f32 %v5878_v24, %v9601_v63 }
 0x17a   : > { %v5913_v46 = vpop.f32.mrf.mxu0  ;;  %v1845_v52 = vpop.f32.mrf.mxu1 }
 0x17b   : > { %v8826_v31 = vadd.f32 %v5912_v39, %v1974_v42  ;;  %v1972_v4 = vadd.f32 %v1845_v52, %v9602_v19 }
 0x17c   : > { %v2526_v61 = vpop.f32.mrf.mxu0  ;;  %v5879_v13 = vpop.f32.mrf.mxu1 }
 0x17d   : > { %v8829_v29 = vadd.f32 %v2523_v6, %v1972_v4  ;;  %v1975_v60 = vadd.f32 %v5879_v13, %v9603_v32 }
 0x17e   : > { %v5916_v15 = vpop.f32.mrf.mxu0  ;;  %v1848_v10 = vpop.f32.mrf.mxu1 }
 0x17f   : > { %v8832_v62 = vadd.f32 %v5913_v46, %v1975_v60  ;;  %v1973_v56 = vadd.f32 %v1848_v10, %v9604_v51 }
 0x180   : > { %v2539_v9 = vpop.f32.mrf.mxu0  ;;  %v5882_v12 = vpop.f32.mrf.mxu1 }
 0x181   : > { %v8835_v59 = vadd.f32 %v2526_v61, %v1973_v56  ;;  %v1978_v38 = vadd.f32 %v5882_v12, %v8547_v47 }
 0x182   : > { %v5917_v44 = vpop.f32.mrf.mxu0  ;;  %v1861_v30 = vpop.f32.mrf.mxu1 }
 0x183   : > { %v8838_v33 = vadd.f32 %v5916_v15, %v1978_v38  ;;  %v1976_v35 = vadd.f32 %v1861_v30, %v8566_v37 }
 0x184   : > { %v2542_v22 = vpop.f32.mrf.mxu0  ;;  %v5883_v20 = vpop.f32.mrf.mxu1 }
 0x185   : > { %v8841_v14 = vadd.f32 %v2539_v9, %v1976_v35  ;;  %v1979_v18 = vadd.f32 %v5883_v20, %v8581_v0 }
 0x186   : > { %v5920_v16 = vpop.f32.mrf.mxu0  ;;  %v1864_v39 = vpop.f32.mrf.mxu1 }
 0x187   : > { %v8844_v43 = vadd.f32 %v5917_v44, %v1979_v18  ;;  %v1977_v49 = vadd.f32 %v1864_v39, %v8594_v58 }
 0x188   : > { %v2555_v41 = vpop.f32.mrf.mxu0  ;;  %v5886_v47 = vpop.f32.mrf.mxu1 }
 0x189   : > { %v8847_v6 = vadd.f32 %v2542_v22, %v1977_v49  ;;  %v1982_v24 = vadd.f32 %v5886_v47, %v8614_v55 }
 0x18a   : > { %v5921_v63 = vpop.f32.mrf.mxu0  ;;  %v1877_v37 = vpop.f32.mrf.mxu1 }
 0x18b   : > { %v8850_v42 = vadd.f32 %v5920_v16, %v1982_v24  ;;  %v1980_v46 = vadd.f32 %v1877_v37, %v8623_v3 }
 0x18c   : > { %v2558_v52 = vpop.f32.mrf.mxu0  ;;  %v5887_v0 = vpop.f32.mrf.mxu1 }
 0x18d   : > { %v8853_v19 = vadd.f32 %v2555_v41, %v1980_v46  ;;  %v1983_v4 = vadd.f32 %v5887_v0, %v8647_v2 }
 0x18e   : > { %v5924_v61 = vpop.f32.mrf.mxu0  ;;  %v1880_v58 = vpop.f32.mrf.mxu1 }
 0x18f   : > { %v8856_v13 = vadd.f32 %v5921_v63, %v1983_v4  ;;  %v1981_v32 = vadd.f32 %v1880_v58, %v8658_v11 }
 0x190   : > { %v2571_v60 = vpop.f32.mrf.mxu0  ;;  %v5890_v55 = vpop.f32.mrf.mxu1 }
 0x191   : > { %v8859_v15 = vadd.f32 %v2558_v52, %v1981_v32  ;;  %v1986_v10 = vadd.f32 %v5890_v55, %v8680_v17 }
 0x192   : > { %v5925_v51 = vpop.f32.mrf.mxu0  ;;  %v1893_v3 = vpop.f32.mrf.mxu1 }
 0x193   : > { %v8862_v56 = vadd.f32 %v5924_v61, %v1986_v10  ;;  %v1984_v9 = vadd.f32 %v1893_v3, %v8689_v5 }
 0x194   : > { %v2574_v12 = vpop.f32.mrf.mxu0  ;;  %v5891_v2 = vpop.f32.mrf.mxu1 }
 0x195   : > { %v8865_v38 = vadd.f32 %v2571_v60, %v1984_v9  ;;  %v1987_v44 = vadd.f32 %v5891_v2, %v8707_v53 }
 0x196   : > { %v5928_v30 = vpop.f32.mrf.mxu0  ;;  %v1896_v11 = vpop.f32.mrf.mxu1 }
 0x197   : > { %v8868_v35 = vadd.f32 %v5925_v51, %v1987_v44  ;;  %v1985_v22 = vadd.f32 %v1896_v11, %v8721_v27 }
 0x198   : > { %v2587_v20 = vpop.f32.mrf.mxu0  ;;  %v5894_v17 = vpop.f32.mrf.mxu1 }
 0x199   : > { %v8871_v18 = vadd.f32 %v2574_v12, %v1985_v22  ;;  %v1990_v16 = vadd.f32 %v5894_v17, %v8727_v34 }
 0x19a   : > { %v5929_v39 = vpop.f32.mrf.mxu0  ;;  %v1909_v5 = vpop.f32.mrf.mxu1 }
 0x19b   : > { %v8874_v49 = vadd.f32 %v5928_v30, %v1990_v16  ;;  %v1988_v41 = vadd.f32 %v1909_v5, %v8736_v28 }
 0x19c   : > { %v2590_v47 = vpop.f32.mrf.mxu0  ;;  %v5895_v53 = vpop.f32.mrf.mxu1 }
 0x19d   : > { %v8877_v24 = vadd.f32 %v2587_v20, %v1988_v41  ;;  %v1991_v63 = vadd.f32 %v5895_v53, %v8749_v48 }
 0x19e   : > { %v5932_v37 = vpop.f32.mrf.mxu0  ;;  %v1912_v27 = vpop.f32.mrf.mxu1 }
 0x19f   : > { %v8880_v46 = vadd.f32 %v5929_v39, %v1991_v63  ;;  %v1989_v52 = vadd.f32 %v1912_v27, %v8764_v54 }
 0x1a0   : > { %v2603_v0 = vpop.f32.mrf.mxu0  ;;  %v5898_v34 = vpop.f32.mrf.mxu1 }
 0x1a1   : > { %v8883_v4 = vadd.f32 %v2590_v47, %v1989_v52  ;;  %v1994_v61 = vadd.f32 %v5898_v34, %v8773_v23 }
 0x1a2   : > { %v5933_v58 = vpop.f32.mrf.mxu0  ;;  %v1925_v28 = vpop.f32.mrf.mxu1 }
 0x1a3   : > { %v8886_v32 = vadd.f32 %v5932_v37, %v1994_v61  ;;  %v1992_v60 = vadd.f32 %v1925_v28, %v8776_v36 }
 0x1a4   : > { %v2606_v55 = vpop.f32.mrf.mxu0  ;;  %v5899_v48 = vpop.f32.mrf.mxu1 }
 0x1a5   : > { %v8889_v10 = vadd.f32 %v2603_v0, %v1992_v60  ;;  %v1995_v51 = vadd.f32 %v5899_v48, %v8787_v1 }
 0x1a6   : > { %v5936_v3 = vpop.f32.mrf.mxu0  ;;  %v1928_v54 = vpop.f32.mrf.mxu1 }
 0x1a7   : > { %9605 = vst [vmem:[#allocation11_spill] sm:$0xff] %v8889_v10  ;;  %v8892_v9 = vadd.f32 %v5933_v58, %v1995_v51  ;;  %v1993_v12 = vadd.f32 %v1928_v54, %v8794_v7 }
 0x1a8   : > { %v2619_v2 = vpop.f32.mrf.mxu0  ;;  %v5902_v23 = vpop.f32.mrf.mxu1 }
 0x1a9   : > { %9606 = vst [vmem:[#allocation21_spill] sm:$0xff] %v8892_v9  ;;  %v8895_v44 = vadd.f32 %v2606_v55, %v1993_v12  ;;  %v1998_v30 = vadd.f32 %v5902_v23, %v8800_v26 }
 0x1aa   : > { %v5937_v11 = vpop.f32.mrf.mxu0  ;;  %v1941_v36 = vpop.f32.mrf.mxu1 }
 0x1ab   : > { %9607 = vst [vmem:[#allocation32_spill] sm:$0xff] %v8895_v44  ;;  %v8898_v22 = vadd.f32 %v5936_v3, %v1998_v30  ;;  %v1996_v20 = vadd.f32 %v1941_v36, %v8803_v45 }
 0x1ac   : > { %v2622_v17 = vpop.f32.mrf.mxu0  ;;  %v5903_v1 = vpop.f32.mrf.mxu1 }
 0x1ad   : > { %v8901_v16 = vadd.f32 %v2619_v2, %v1996_v20  ;;  %v1999_v39 = vadd.f32 %v5903_v1, %v8807_v40 }
 0x1ae   : > { %v5940_v5 = vpop.f32.mrf.mxu0  ;;  %v1944_v7 = vpop.f32.mrf.mxu1 }
 0x1af   : > { %9608 = vst [vmem:[#allocation24_spill] sm:$0xff] %v8901_v16  ;;  %v8904_v41 = vadd.f32 %v5937_v11, %v1999_v39  ;;  %v1997_v47 = vadd.f32 %v1944_v7, %v8811_v21 }
 0x1b0   : > { %v2635_v53 = vpop.f32.mrf.mxu0  ;;  %v5906_v26 = vpop.f32.mrf.mxu1 }
 0x1b1   : > { %9609 = vst [vmem:[#allocation22_spill] sm:$0xff] %v8904_v41  ;;  %v8907_v63 = vadd.f32 %v2622_v17, %v1997_v47  ;;  %v2002_v37 = vadd.f32 %v5906_v26, %v8814_v50 }
 0x1b2   : > { %v5941_v27 = vpop.f32.mrf.mxu0  ;;  %v1957_v45 = vpop.f32.mrf.mxu1 }
 0x1b3   : > { %9610 = vst [vmem:[#allocation23_spill] sm:$0xff] %v8907_v63  ;;  %v8910_v52 = vadd.f32 %v5940_v5, %v2002_v37  ;;  %v2000_v0 = vadd.f32 %v1957_v45, %v8817_v57 }
 0x1b4   : > { %v2638_v34 = vpop.f32.mrf.mxu0  ;;  %v5907_v40 = vpop.f32.mrf.mxu1 }
 0x1b5   : > { %v8913_v61 = vadd.f32 %v2635_v53, %v2000_v0  ;;  %v2003_v58 = vadd.f32 %v5907_v40, %v8820_v25 }
 0x1b6   : > { %v5980_v28 = vpop.f32.mrf.mxu0  ;;  %v1960_v21 = vpop.f32.mrf.mxu1 }
 0x1b7   : > { %9611 = vst [vmem:[#allocation33_spill] sm:$0xff] %v8913_v61  ;;  %v8916_v60 = vadd.f32 %v5941_v27, %v2003_v58  ;;  %v2001_v55 = vadd.f32 %v1960_v21, %v8823_v8 }
 0x1b8   : > { %v3323_v48 = vpop.f32.mrf.mxu0  ;;  %v5946_v50 = vpop.f32.mrf.mxu1 }
 0x1b9   : > { %9612 = vst [vmem:[#allocation34_spill] sm:$0xff] %v8916_v60  ;;  %v8919_v51 = vadd.f32 %v2638_v34, %v2001_v55  ;;  %v3074_v3 = vadd.f32 %v5946_v50, %v8826_v31 }
 0x1ba   : > { %v8922_v54 = vpop.f32.mrf.mxu0  ;;  %v2945_v57 = vpop.f32.mrf.mxu1 }
 0x1bb   : > { %9613 = vst [vmem:[#allocation35_spill] sm:$0xff] %v8919_v51  ;;  %v8924_v12 = vadd.f32 %v5980_v28, %v3074_v3  ;;  %v3072_v2 = vadd.f32 %v2945_v57, %v8829_v29 }
 0x1bc   : > { %v8927_v25 = vpop.f32.mrf.mxu0  ;;  %v8929_v23 = vpop.f32.mrf.mxu1 }
 0x1bd   : > { %v8931_v30 = vadd.f32 %v3323_v48, %v3072_v2 }
 0x1be   : > { %v5984_v8 = vpop.f32.mrf.mxu0  ;;  %v8933_v11 = vpop.f32.mrf.mxu1 }
 0x1c0   : > { %v8935_v36 = vpop.f32.mrf.mxu0  ;;  %v5950_v20 = vpop.f32.mrf.mxu1 }
 0x1c1   : > { %v3078_v31 = vadd.f32 %v5950_v20, %v8838_v33 }
 0x1c2   : > { %v8938_v17 = vpop.f32.mrf.mxu0  ;;  %v8940_v1 = vpop.f32.mrf.mxu1 }
 0x1c3   : > { %v8942_v39 = vadd.f32 %v5984_v8, %v3078_v31 }
 0x1c4   : > { %v8944_v29 = vpop.f32.mrf.mxu0  ;;  %v8946_v5 = vpop.f32.mrf.mxu1 }
 0x1c6   : > { %v5988_v7 = vpop.f32.mrf.mxu0  ;;  %v8948_v47 = vpop.f32.mrf.mxu1 }
 0x1c8   : > { %v8950_v53 = vpop.f32.mrf.mxu0  ;;  %v5954_v26 = vpop.f32.mrf.mxu1 }
 0x1c9   : > { %v3082_v37 = vadd.f32 %v5954_v26, %v8850_v42 }
 0x1ca   : > { %v8953_v27 = vpop.f32.mrf.mxu0  ;;  %v8955_v33 = vpop.f32.mrf.mxu1 }
 0x1cb   : > { %v8957_v45 = vadd.f32 %v5988_v7, %v3082_v37 }
 0x1cc   : > { %v8959_v0 = vpop.f32.mrf.mxu0  ;;  %v8961_v34 = vpop.f32.mrf.mxu1 }
 0x1ce   : > { %v5992_v40 = vpop.f32.mrf.mxu0  ;;  %v8963_v58 = vpop.f32.mrf.mxu1 }
 0x1d0   : > { %v8965_v28 = vpop.f32.mrf.mxu0  ;;  %v5958_v21 = vpop.f32.mrf.mxu1 }
 0x1d1   : > { %v3086_v55 = vadd.f32 %v5958_v21, %v8862_v56 }
 0x1d2   : > { %v8968_v48 = vpop.f32.mrf.mxu0  ;;  %v8970_v42 = vpop.f32.mrf.mxu1 }
 0x1d3   : > { %v8972_v50 = vadd.f32 %v5992_v40, %v3086_v55 }
 0x1d4   : > { %v8974_v3 = vpop.f32.mrf.mxu0  ;;  %v8976_v57 = vpop.f32.mrf.mxu1 }
 0x1d6   : > { %v5996_v2 = vpop.f32.mrf.mxu0  ;;  %v8978_v8 = vpop.f32.mrf.mxu1 }
 0x1d8   : > { %v8980_v20 = vpop.f32.mrf.mxu0  ;;  %v5962_v31 = vpop.f32.mrf.mxu1 }
 0x1d9   : > { %v3090_v7 = vadd.f32 %v5962_v31, %v8874_v49 }
 0x1da   : > { %v8983_v26 = vpop.f32.mrf.mxu0  ;;  %v8985_v56 = vpop.f32.mrf.mxu1 }
 0x1db   : > { %v8987_v37 = vadd.f32 %v5996_v2, %v3090_v7 }
 0x1dc   : > { %v8989_v40 = vpop.f32.mrf.mxu0  ;;  %v8991_v21 = vpop.f32.mrf.mxu1 }
 0x1dd   : > { %9614 = vst [vmem:[#allocation40_spill] sm:$0xff] %v8989_v40 }
 0x1de   : > { %v6000_v55 = vpop.f32.mrf.mxu0  ;;  %v8993_v51 = vpop.f32.mrf.mxu1 }
 0x1e0   : > { %v8995_v60 = vpop.f32.mrf.mxu0  ;;  %v5966_v61 = vpop.f32.mrf.mxu1 }
 0x1e1   : > { %9615 = vst [vmem:[#allocation27_spill] sm:$0xff] %v8995_v60  ;;  %v3094_v63 = vadd.f32 %v5966_v61, %v8886_v32 }
 0x1e2   : > { %v8998_v41 = vpop.f32.mrf.mxu0  ;;  %v9000_v49 = vpop.f32.mrf.mxu1 }
 0x1e3   : > { %9616 = vst [vmem:[#allocation39_spill] sm:$0xff] %v8998_v41  ;;  %v9002_v31 = vadd.f32 %v6000_v55, %v3094_v63 }
 0x1e4   : > { %v9004_v2 = vpop.f32.mrf.mxu0  ;;  %v9006_v7 = vpop.f32.mrf.mxu1 }
 0x1e5   : > { %9617 = vst [vmem:[#allocation37_spill] sm:$0xff] %v9002_v31  ;;  %9618 = vst [vmem:[#allocation43_spill] sm:$0xff] %v9004_v2 }
 0x1e6   : > { %v6004_v16 = vpop.f32.mrf.mxu0  ;;  %v9008_v44 = vpop.f32.mrf.mxu1 }
 0x1e7   : > { %9619 = vst [vmem:[#allocation36_spill] sm:$0xff] %v9008_v44 }
 0x1e8   : > { %v9010_v9 = vpop.f32.mrf.mxu0  ;;  %v5970_v10 = vpop.f32.mrf.mxu1 }
 0x1e9   : > { %9620 = vst [vmem:[#allocation44_spill] sm:$0xff] %v9010_v9  ;;  %v3098_v60 = vadd.f32 %v5970_v10, %v8898_v22 }
 0x1ea   : > { %v9013_v40 = vpop.f32.mrf.mxu0  ;;  %v9015_v32 = vpop.f32.mrf.mxu1 }
 0x1eb   : > { %9621 = vst [vmem:[#allocation49_spill] sm:$0xff] %v9013_v40  ;;  %9622 = vst [vmem:[#allocation26_spill] sm:$0xff] %v9015_v32  ;;  %v9017_v61 = vadd.f32 %v6004_v16, %v3098_v60 }
 0x1ec   : > { %v9019_v63 = vpop.f32.mrf.mxu0  ;;  %v9021_v55 = vpop.f32.mrf.mxu1 }
 0x1ed   : > { %9623 = vst [vmem:[#allocation25_spill] sm:$0xff] %v9017_v61  ;;  %9624 = vst [vmem:[#allocation51_spill] sm:$0xff] %v9019_v63 }
 0x1ee   : > { %9625 = vst [vmem:[#allocation57_spill] sm:$0xff] %v9021_v55  ;;  %v6008_v2 = vpop.f32.mrf.mxu0  ;;  %v9023_v31 = vpop.f32.mrf.mxu1 }
 0x1ef   : > { %9626 = vst [vmem:[#allocation45_spill] sm:$0xff] %v9023_v31 }
 0x1f0   : > { %v9025_v41 = vpop.f32.mrf.mxu0  ;;  %v5974_v9 = vpop.f32.mrf.mxu1 }
 0x1f1   : > { %9627 = vst [vmem:[#allocation29_spill] sm:$0xff] %v9025_v41  ;;  %v3102_v44 = vadd.f32 %v5974_v9, %v8910_v52  ;;  %v3075_v41 = vadd.f32 %v8929_v23, %v8832_v62  ;;  %v3073_v9 = vadd.f32 %v8933_v11, %v8835_v59  ;;  %v3076_v59 = vadd.f32 %v8940_v1, %v8841_v14 }
 0x1f2   : > { %v9028_v10 = vpop.f32.mrf.mxu0  ;;  %v9030_v22 = vpop.f32.mrf.mxu1  ;;  %v3079_v11 = vadd.f32 %v8946_v5, %v8844_v43 }
 0x1f3   : > { %9628 = vst [vmem:[#allocation61_spill] sm:$0xff] %v9028_v10  ;;  %9629 = vst [vmem:[#allocation46_spill] sm:$0xff] %v9030_v22  ;;  %v9032_v40 = vadd.f32 %v6008_v2, %v3102_v44  ;;  %v3453_v44 = vadd.f32 %v8922_v54, %v3075_v41  ;;  %v3451_v62 = vadd.f32 %v8927_v25, %v3073_v9 }
 0x1f4   : > { %v9034_v16 = vpop.f32.mrf.mxu0  ;;  %v9036_v60 = vpop.f32.mrf.mxu1  ;;  %v3457_v14 = vadd.f32 %v8938_v17, %v3079_v11 }
 0x1f5   : > { %9630 = vst [vmem:[#allocation47_spill] sm:$0xff] %v9032_v40  ;;  %9631 = vst [vmem:[#allocation20_spill] sm:$0xff] %v9034_v16 }
 0x1f6   : > { %9632 = vst [vmem:[#allocation41_spill] sm:$0xff] %v9036_v60  ;;  %v6048_v63 = vpop.f32.mrf.mxu0  ;;  %v9038_v61 = vpop.f32.mrf.mxu1 }
 0x1f7   : > { %9633 = vst [vmem:[#allocation30_spill] sm:$0xff] %v9038_v61 }
 0x1f8   : > { %v4423_v31 = vpop.f32.mrf.mxu0  ;;  %v6014_v55 = vpop.f32.mrf.mxu1 }
 0x1f9   : > { %v4130_v2 = vadd.f32 %v6014_v55, %v8924_v12 }
 0x1fa   : > { %v6049_v52 = vpop.f32.mrf.mxu0  ;;  %v4001_v10 = vpop.f32.mrf.mxu1 }
 0x1fb   : > { %v4128_v16 = vadd.f32 %v4001_v10, %v8931_v30  ;;  %v4552_v32 = vadd.f32 %v6048_v63, %v4130_v2  ;;  %v3077_v30 = vadd.f32 %v8948_v47, %v8847_v6 }
 0x1fc   : > { %v4426_v40 = vpop.f32.mrf.mxu0  ;;  %v6015_v61 = vpop.f32.mrf.mxu1 }
 0x1fd   : > { %v4131_v23 = vadd.f32 %v6015_v61, %v3453_v44  ;;  %v4550_v41 = vadd.f32 %v4423_v31, %v4128_v16  ;;  %v3454_v44 = vadd.f32 %v8935_v36, %v3076_v59  ;;  %v3080_v36 = vadd.f32 %v8955_v33, %v8853_v19 }
 0x1fe   : > { %v6052_v60 = vpop.f32.mrf.mxu0  ;;  %v4004_v22 = vpop.f32.mrf.mxu1  ;;  %v4781_v16 = vmul.f32 %v4552_v32, %v4552_v32 }
 0x1ff   : > { %v4553_v54 = vadd.f32 %v6049_v52, %v4131_v23  ;;  %v4129_v12 = vadd.f32 %v4004_v22, %v3451_v62  ;;  %v4779_v5 = vmul.f32 %v4550_v41, %v4550_v41  ;;  %v3083_v23 = vadd.f32 %v8961_v34, %v8856_v13 }
 0x200   : > { %v4439_v55 = vpop.f32.mrf.mxu0  ;;  %v6018_v10 = vpop.f32.mrf.mxu1 }
 0x201   : > { %v5532_v25 = vpack.c.bf16 %v4553_v54, %v4552_v32  ;;  %v4551_v61 = vadd.f32 %v4426_v40, %v4129_v12  ;;  %v4134_v1 = vadd.f32 %v6018_v10, %v8942_v39  ;;  %v3455_v40 = vadd.f32 %v8944_v29, %v3077_v30 }
 0x202   : > { %v6053_v9 = vpop.f32.mrf.mxu0  ;;  %v4017_v43 = vpop.f32.mrf.mxu1  ;;  %v4782_v59 = vmul.f32 %v4553_v54, %v4553_v54 }
 0x203   : > { %5604 = vst [vmem:[%s9061_s7 + $0x8] sm:$0xff] %v5532_v25   ;;  %v5527_v31 = vpack.c.bf16 %v4551_v61, %v4550_v41  ;;  %v4742_v63 = vadd.f32 %v4551_v61, %v4550_v41  ;;  %v4780_v6 = vmul.f32 %v4551_v61, %v4551_v61  ;;  %v4132_v22 = vadd.f32 %v4017_v43, %v3454_v44 }
 0x204   : > { %v4442_v47 = vpop.f32.mrf.mxu0  ;;  %v6019_v17 = vpop.f32.mrf.mxu1  ;;  %v4556_v11 = vadd.f32 %v6052_v60, %v4134_v1  ;;  %v3458_v25 = vadd.f32 %v8950_v53, %v3080_v36  ;;  %v3461_v1 = vadd.f32 %v8953_v27, %v3083_v23 }
 0x205   : > { %5528 = vst [vmem:[%s9061_s7] sm:$0xff] %v5527_v31   ;;  %v4743_v39 = vadd.f32 %v4742_v63, %v4552_v32  ;;  %v4811_v52 = vadd.f32 %v4780_v6, %v4779_v5  ;;  %v4135_v2 = vadd.f32 %v6019_v17, %v3457_v14  ;;  %v4554_v41 = vadd.f32 %v4439_v55, %v4132_v22 }
 0x206   : > { %v6056_v62 = vpop.f32.mrf.mxu0  ;;  %v4020_v12 = vpop.f32.mrf.mxu1  ;;  %v3081_v32 = vadd.f32 %v8963_v58, %v8859_v15  ;;  %v4785_v22 = vmul.f32 %v4556_v11, %v4556_v11 }
 0x207   : > { %v4812_v10 = vadd.f32 %v4811_v52, %v4781_v16  ;;  %v4744_v29 = vadd.f32 %v4743_v39, %v4553_v54  ;;  %v4557_v30 = vadd.f32 %v6053_v9, %v4135_v2  ;;  %v4133_v19 = vadd.f32 %v4020_v12, %v3455_v40 }
 0x208   : > { %v4455_v33 = vpop.f32.mrf.mxu0  ;;  %v6022_v61 = vpop.f32.mrf.mxu1  ;;  %v4783_v14 = vmul.f32 %v4554_v41, %v4554_v41  ;;  %v3459_v6 = vadd.f32 %v8959_v0, %v3081_v32  ;;  %v3084_v40 = vadd.f32 %v8970_v42, %v8865_v38 }
 0x209   : > { %v4745_v44 = vadd.f32 %v4744_v29, %v4554_v41  ;;  %v4813_v43 = vadd.f32 %v4812_v10, %v4782_v59  ;;  %v5542_v13 = vpack.c.bf16 %v4557_v30, %v4556_v11  ;;  %v4555_v60 = vadd.f32 %v4442_v47, %v4133_v19 }
 0x20a   : > { %v6057_v34 = vpop.f32.mrf.mxu0  ;;  %v4033_v55 = vpop.f32.mrf.mxu1  ;;  %v4138_v9 = vadd.f32 %v6022_v61, %v8957_v45  ;;  %v3087_v47 = vadd.f32 %v8976_v57, %v8868_v35  ;;  %v4786_v0 = vmul.f32 %v4557_v30, %v4557_v30  ;;  %v3462_v42 = vadd.f32 %v8965_v28, %v3084_v40 }
 0x20b   : > { %v4814_v54 = vadd.f32 %v4813_v43, %v4783_v14  ;;  %5606 = vst [vmem:[%s9061_s7 + $0x18] sm:$0xff] %v5542_v13   ;;  %v4136_v5 = vadd.f32 %v4033_v55, %v3458_v25  ;;  %v5537_v31 = vpack.c.bf16 %v4555_v60, %v4554_v41  ;;  %v4746_v63 = vadd.f32 %v4745_v44, %v4555_v60 }
 0x20c   : > { %v4458_v53 = vpop.f32.mrf.mxu0  ;;  %v4784_v15 = vmul.f32 %v4555_v60, %v4555_v60  ;;  %v6023_v58 = vpop.f32.mrf.mxu1  ;;  %v4560_v52 = vadd.f32 %v6056_v62, %v4138_v9  ;;  %v3085_v35 = vadd.f32 %v8978_v8, %v8871_v18  ;;  %v3465_v29 = vadd.f32 %v8968_v48, %v3087_v47 }
 0x20d   : > { %v4139_v27 = vadd.f32 %v6023_v58, %v3461_v1  ;;  %5605 = vst [vmem:[%s9061_s7 + $0x10] sm:$0xff] %v5537_v31   ;;  %v4747_v17 = vadd.f32 %v4746_v63, %v4556_v11  ;;  %v4558_v16 = vadd.f32 %v4455_v33, %v4136_v5  ;;  %v3088_v48 = vadd.f32 %v8985_v56, %v8877_v24 }
 0x20e   : > { %v4815_v45 = vadd.f32 %v4814_v54, %v4784_v15  ;;  %v4036_v39 = vpop.f32.mrf.mxu1  ;;  %v3463_v8 = vadd.f32 %v8974_v3, %v3085_v35  ;;  %v3091_v13 = vadd.f32 %v8991_v21, %v8880_v46  ;;  %v4789_v55 = vmul.f32 %v4560_v52, %v4560_v52 }
 0x20f   : > { %v6060_v36 = vpop.f32.mrf.mxu0  ;;  %v4561_v2 = vadd.f32 %v6057_v34, %v4139_v27  ;;  %v4137_v23 = vadd.f32 %v4036_v39, %v3459_v6  ;;  %v4748_v12 = vadd.f32 %v4747_v17, %v4557_v30  ;;  %v4787_v62 = vmul.f32 %v4558_v16, %v4558_v16 }
 0x210   : > { %v4816_v41 = vadd.f32 %v4815_v45, %v4785_v22  ;;  %v6026_v38 = vpop.f32.mrf.mxu1  ;;  %v3466_v56 = vadd.f32 %v8980_v20, %v3088_v48  ;;  %v3089_v46 = vadd.f32 %v8993_v51, %v8883_v4  ;;  %v3469_v47 = vadd.f32 %v8983_v26, %v3091_v13  ;;  %v9634_v51 = vld [vmem:[#allocation40_spill] sm:$0xff]  ;;  %v9640_v48 = vld [vmem:[#allocation39_spill] sm:$0xff] }
 0x211   : > { %v4471_v59 = vpop.f32.mrf.mxu0  ;;  %v5552_v57 = vpack.c.bf16 %v4561_v2, %v4560_v52  ;;  %v4559_v10 = vadd.f32 %v4458_v53, %v4137_v23  ;;  %v4749_v19 = vadd.f32 %v4748_v12, %v4558_v16  ;;  %v4142_v30 = vadd.f32 %v6026_v38, %v8972_v50 }
 0x212   : > { %v4817_v33 = vadd.f32 %v4816_v41, %v4786_v0  ;;  %v4049_v25 = vpop.f32.mrf.mxu1  ;;  %v4790_v3 = vmul.f32 %v4561_v2, %v4561_v2  ;;  %v9635_v0 = vld [vmem:[#allocation11_spill] sm:$0xff]  ;;  %v9636_v41 = vld [vmem:[#allocation21_spill] sm:$0xff] }
 0x213   : > { %v6061_v11 = vpop.f32.mrf.mxu0  ;;  %5608 = vst [vmem:[%s9061_s7 + $0x28] sm:$0xff] %v5552_v57   ;;  %v5547_v32 = vpack.c.bf16 %v4559_v10, %v4558_v16  ;;  %v4788_v61 = vmul.f32 %v4559_v10, %v4559_v10  ;;  %v4140_v44 = vadd.f32 %v4049_v25, %v3462_v42  ;;  %v4750_v43 = vadd.f32 %v4749_v19, %v4559_v10 }
 0x214   : > { %v4818_v14 = vadd.f32 %v4817_v33, %v4787_v62  ;;  %v6027_v18 = vpop.f32.mrf.mxu1  ;;  %v4564_v5 = vadd.f32 %v6060_v36, %v4142_v30  ;;  %v3092_v26 = vadd.f32 %v9000_v49, %v9635_v0  ;;  %v3095_v12 = vadd.f32 %v9006_v7, %v9636_v41  ;;  %v9637_v30 = vld [vmem:[#allocation27_spill] sm:$0xff]  ;;  %v9638_v7 = vld [vmem:[#allocation32_spill] sm:$0xff] }
 0x215   : > { %v4474_v28 = vpop.f32.mrf.mxu0  ;;  %5607 = vst [vmem:[%s9061_s7 + $0x20] sm:$0xff] %v5547_v32   ;;  %v4143_v34 = vadd.f32 %v6027_v18, %v3465_v29  ;;  %v4751_v1 = vadd.f32 %v4750_v43, %v4560_v52  ;;  %v4562_v50 = vadd.f32 %v4471_v59, %v4140_v44  ;;  %v3467_v59 = vadd.f32 %v9634_v51, %v3089_v46  ;;  %v9644_v46 = vld [vmem:[#allocation26_spill] sm:$0xff] }
 0x216   : > { %v4819_v54 = vadd.f32 %v4818_v14, %v4788_v61  ;;  %v4052_v9 = vpop.f32.mrf.mxu1  ;;  %v4793_v35 = vmul.f32 %v4564_v5, %v4564_v5  ;;  %v3470_v44 = vadd.f32 %v9637_v30, %v3092_v26  ;;  %v3473_v13 = vadd.f32 %v9640_v48, %v3095_v12  ;;  %v9647_v26 = vld [vmem:[#allocation44_spill] sm:$0xff]  ;;  %v9648_v12 = vld [vmem:[#allocation23_spill] sm:$0xff]  ;;  %v9654_v48 = vld [vmem:[#allocation46_spill] sm:$0xff] }
 0x217   : > { %v6064_v60 = vpop.f32.mrf.mxu0  ;;  %v4565_v53 = vadd.f32 %v6061_v11, %v4143_v34  ;;  %v4141_v31 = vadd.f32 %v4052_v9, %v3463_v8  ;;  %v4752_v58 = vadd.f32 %v4751_v1, %v4561_v2  ;;  %v4791_v36 = vmul.f32 %v4562_v50, %v4562_v50  ;;  %v9641_v9 = vld [vmem:[#allocation37_spill] sm:$0xff] }
 0x218   : > { %v4820_v15 = vadd.f32 %v4819_v54, %v4789_v55  ;;  %v6030_v24 = vpop.f32.mrf.mxu1 }
 0x219   : > { %v4487_v63 = vpop.f32.mrf.mxu0  ;;  %v5562_v21 = vpack.c.bf16 %v4565_v53, %v4564_v5  ;;  %v4563_v6 = vadd.f32 %v4474_v28, %v4141_v31  ;;  %v4753_v27 = vadd.f32 %v4752_v58, %v4562_v50  ;;  %v4146_v39 = vadd.f32 %v6030_v24, %v8987_v37  ;;  %v9639_v28 = vld [vmem:[#allocation36_spill] sm:$0xff]  ;;  %v9642_v58 = vld [vmem:[#allocation43_spill] sm:$0xff] }
 0x21a   : > { %v4821_v22 = vadd.f32 %v4820_v15, %v4790_v3  ;;  %v4065_v17 = vpop.f32.mrf.mxu1  ;;  %v4794_v25 = vmul.f32 %v4565_v53, %v4565_v53  ;;  %v3093_v14 = vadd.f32 %v9639_v28, %v9638_v7 }
 0x21b   : > { %v6065_v40 = vpop.f32.mrf.mxu0  ;;  %5610 = vst [vmem:[%s9061_s7 + $0x38] sm:$0xff] %v5562_v21   ;;  %v5557_v45 = vpack.c.bf16 %v4563_v6, %v4562_v50  ;;  %v4792_v16 = vmul.f32 %v4563_v6, %v4563_v6  ;;  %v4144_v52 = vadd.f32 %v4065_v17, %v3466_v56  ;;  %v4754_v23 = vadd.f32 %v4753_v27, %v4563_v6  ;;  %v9643_v56 = vld [vmem:[#allocation24_spill] sm:$0xff]  ;;  %v9645_v6 = vld [vmem:[#allocation22_spill] sm:$0xff] }
 0x21c   : > { %v4822_v2 = vadd.f32 %v4821_v22, %v4791_v36  ;;  %v6031_v4 = vpop.f32.mrf.mxu1  ;;  %v4568_v29 = vadd.f32 %v6064_v60, %v4146_v39  ;;  %v3471_v24 = vadd.f32 %v9642_v58, %v3093_v14  ;;  %v3096_v21 = vadd.f32 %v9644_v46, %v9643_v56 }
 0x21d   : > { %v4490_v20 = vpop.f32.mrf.mxu0  ;;  %5609 = vst [vmem:[%s9061_s7 + $0x30] sm:$0xff] %v5557_v45   ;;  %v4147_v38 = vadd.f32 %v6031_v4, %v3469_v47  ;;  %v4755_v57 = vadd.f32 %v4754_v23, %v4564_v5  ;;  %v4566_v37 = vadd.f32 %v4487_v63, %v4144_v52 }
 0x21e   : > { %v4823_v10 = vadd.f32 %v4822_v2, %v4792_v16  ;;  %v4068_v11 = vpop.f32.mrf.mxu1  ;;  %v4797_v22 = vmul.f32 %v4568_v29, %v4568_v29  ;;  %v3474_v41 = vadd.f32 %v9647_v26, %v3096_v21 }
 0x21f   : > { %v6068_v42 = vpop.f32.mrf.mxu0  ;;  %v4569_v19 = vadd.f32 %v6065_v40, %v4147_v38  ;;  %v4145_v62 = vadd.f32 %v4068_v11, %v3467_v59  ;;  %v4756_v61 = vadd.f32 %v4755_v57, %v4565_v53  ;;  %v4795_v60 = vmul.f32 %v4566_v37, %v4566_v37  ;;  %v9646_v40 = vld [vmem:[#allocation57_spill] sm:$0xff] }
 0x220   : > { %v4824_v32 = vadd.f32 %v4823_v10, %v4793_v35  ;;  %v6034_v49 = vpop.f32.mrf.mxu1  ;;  %v3099_v47 = vadd.f32 %v9646_v40, %v9645_v6  ;;  %v9649_v38 = vld [vmem:[#allocation45_spill] sm:$0xff] }
 0x221   : > { %v4503_v33 = vpop.f32.mrf.mxu0  ;;  %v5572_v43 = vpack.c.bf16 %v4569_v19, %v4568_v29  ;;  %v4567_v18 = vadd.f32 %v4490_v20, %v4145_v62  ;;  %v4757_v34 = vadd.f32 %v4756_v61, %v4566_v37  ;;  %v4150_v5 = vadd.f32 %v6034_v49, %v9641_v9  ;;  %v9650_v11 = vld [vmem:[#allocation49_spill] sm:$0xff] }
 0x222   : > { %v4825_v55 = vadd.f32 %v4824_v32, %v4794_v25  ;;  %v4081_v1 = vpop.f32.mrf.mxu1  ;;  %v4798_v4 = vmul.f32 %v4569_v19, %v4569_v19  ;;  %v3097_v35 = vadd.f32 %v9649_v38, %v9648_v12  ;;  %v9657_v6 = vld [vmem:[#allocation29_spill] sm:$0xff] }
 0x223   : > { %v6069_v8 = vpop.f32.mrf.mxu0  ;;  %5612 = vst [vmem:[%s9061_s7 + $0x48] sm:$0xff] %v5572_v43   ;;  %v5567_v54 = vpack.c.bf16 %v4567_v18, %v4566_v37  ;;  %v4796_v50 = vmul.f32 %v4567_v18, %v4567_v18  ;;  %v4148_v53 = vadd.f32 %v4081_v1, %v3470_v44  ;;  %v4758_v3 = vadd.f32 %v4757_v34, %v4567_v18  ;;  %v9652_v43 = vld [vmem:[#allocation51_spill] sm:$0xff]  ;;  %v9655_v34 = vld [vmem:[#allocation34_spill] sm:$0xff] }
 0x224   : > { %v4826_v63 = vadd.f32 %v4825_v55, %v4795_v60  ;;  %v6035_v15 = vpop.f32.mrf.mxu1  ;;  %v4572_v52 = vadd.f32 %v6068_v42, %v4150_v5  ;;  %v3475_v18 = vadd.f32 %v9652_v43, %v3097_v35  ;;  %v9656_v60 = vld [vmem:[#allocation41_spill] sm:$0xff]  ;;  %v9662_v35 = vld [vmem:[#allocation20_spill] sm:$0xff] }
 0x225   : > { %v4506_v31 = vpop.f32.mrf.mxu0  ;;  %5611 = vst [vmem:[%s9061_s7 + $0x40] sm:$0xff] %v5567_v54   ;;  %v4151_v27 = vadd.f32 %v6035_v15, %v3473_v13  ;;  %v4759_v17 = vadd.f32 %v4758_v3, %v4568_v29  ;;  %v4570_v16 = vadd.f32 %v4503_v33, %v4148_v53  ;;  %v3477_v29 = vadd.f32 %v9650_v11, %v3099_v47  ;;  %v9658_v47 = vld [vmem:[#allocation35_spill] sm:$0xff] }
 0x226   : > { %v4827_v45 = vadd.f32 %v4826_v63, %v4796_v50  ;;  %v4084_v39 = vpop.f32.mrf.mxu1  ;;  %v3103_v55 = vadd.f32 %v9656_v60, %v9655_v34  ;;  %v4801_v50 = vmul.f32 %v4572_v52, %v4572_v52 }
 0x227   : > { %v6072_v36 = vpop.f32.mrf.mxu0  ;;  %v4573_v20 = vadd.f32 %v6069_v8, %v4151_v27  ;;  %v4149_v2 = vadd.f32 %v4084_v39, %v3471_v24  ;;  %v4760_v59 = vadd.f32 %v4759_v17, %v4569_v19  ;;  %v4799_v42 = vmul.f32 %v4570_v16, %v4570_v16  ;;  %v9651_v19 = vld [vmem:[#allocation25_spill] sm:$0xff]  ;;  %v9659_v27 = vld [vmem:[#allocation30_spill] sm:$0xff] }
 0x228   : > { %v4828_v51 = vadd.f32 %v4827_v45, %v4797_v22  ;;  %v6038_v0 = vpop.f32.mrf.mxu1  ;;  %v9653_v8 = vld [vmem:[#allocation33_spill] sm:$0xff]  ;;  %v3101_v22 = vadd.f32 %v9659_v27, %v9658_v47 }
 0x229   : > { %v4519_v23 = vpop.f32.mrf.mxu0  ;;  %v5582_v57 = vpack.c.bf16 %v4573_v20, %v4572_v52  ;;  %v4571_v10 = vadd.f32 %v4506_v31, %v4149_v2  ;;  %v4761_v62 = vadd.f32 %v4760_v59, %v4570_v16  ;;  %v4154_v49 = vadd.f32 %v6038_v0, %v9651_v19 }
 0x22a   : > { %v4829_v33 = vadd.f32 %v4828_v51, %v4798_v4  ;;  %v4097_v25 = vpop.f32.mrf.mxu1  ;;  %v3100_v13 = vadd.f32 %v9654_v48, %v9653_v8  ;;  %v4802_v58 = vmul.f32 %v4573_v20, %v4573_v20 }
 0x22b   : > { %v6073_v37 = vpop.f32.mrf.mxu0  ;;  %5614 = vst [vmem:[%s9061_s7 + $0x58] sm:$0xff] %v5582_v57   ;;  %v5577_v32 = vpack.c.bf16 %v4571_v10, %v4570_v16  ;;  %v4800_v61 = vmul.f32 %v4571_v10, %v4571_v10  ;;  %v4152_v30 = vadd.f32 %v4097_v25, %v3474_v41  ;;  %v4762_v28 = vadd.f32 %v4761_v62, %v4571_v10  ;;  %v9660_v16 = vld [vmem:[#allocation61_spill] sm:$0xff] }
 0x22c   : > { %v4830_v7 = vadd.f32 %v4829_v33, %v4799_v42  ;;  %v6039_v14 = vpop.f32.mrf.mxu1  ;;  %v4576_v63 = vadd.f32 %v6072_v36, %v4154_v49  ;;  %v3478_v40 = vadd.f32 %v9657_v6, %v3100_v13  ;;  %v3481_v39 = vadd.f32 %v9660_v16, %v3103_v55 }
 0x22d   : > { %v4522_v44 = vpop.f32.mrf.mxu0  ;;  %5613 = vst [vmem:[%s9061_s7 + $0x50] sm:$0xff] %v5577_v32   ;;  %v4155_v1 = vadd.f32 %v6039_v14, %v3477_v29  ;;  %v4763_v9 = vadd.f32 %v4762_v28, %v4572_v52  ;;  %v4574_v53 = vadd.f32 %v4519_v23, %v4152_v30  ;;  %v3479_v57 = vadd.f32 %v9662_v35, %v3101_v22 }
 0x22e   : > { %v4831_v5 = vadd.f32 %v4830_v7, %v4800_v61  ;;  %v4100_v31 = vpop.f32.mrf.mxu1 }
 0x22f   : > { %v6076_v54 = vpop.f32.mrf.mxu0  ;;  %v4577_v3 = vadd.f32 %v6073_v37, %v4155_v1  ;;  %v4153_v15 = vadd.f32 %v4100_v31, %v3475_v18  ;;  %v4764_v56 = vadd.f32 %v4763_v9, %v4573_v20  ;;  %v4803_v36 = vmul.f32 %v4574_v53, %v4574_v53  ;;  %v9661_v20 = vld [vmem:[#allocation47_spill] sm:$0xff] }
 0x230   : > { %v4832_v24 = vadd.f32 %v4831_v5, %v4801_v50  ;;  %v6042_v46 = vpop.f32.mrf.mxu1  ;;  %v4805_v37 = vmul.f32 %v4576_v63, %v4576_v63 }
 0x231   : > { %v4535_v21 = vpop.f32.mrf.mxu0  ;;  %v5592_v17 = vpack.c.bf16 %v4577_v3, %v4576_v63  ;;  %v4575_v45 = vadd.f32 %v4522_v44, %v4153_v15  ;;  %v4765_v52 = vadd.f32 %v4764_v56, %v4574_v53  ;;  %v4158_v59 = vadd.f32 %v6042_v46, %v9661_v20 }
 0x232   : > { %v4833_v2 = vadd.f32 %v4832_v24, %v4802_v58  ;;  %v4113_v23 = vpop.f32.mrf.mxu1  ;;  %v4806_v61 = vmul.f32 %v4577_v3, %v4577_v3 }
 0x233   : > { %5616 = vst [vmem:[%s9061_s7 + $0x68] sm:$0xff] %v5592_v17   ;;  %v5587_v4 = vpack.c.bf16 %v4575_v45, %v4574_v53  ;;  %v4804_v51 = vmul.f32 %v4575_v45, %v4575_v45  ;;  %v4156_v0 = vadd.f32 %v4113_v23, %v3478_v40  ;;  %v4766_v41 = vadd.f32 %v4765_v52, %v4575_v45  ;;  %v6077_v38 = vpop.f32.mrf.mxu0 }
 0x234   : > { %v4834_v26 = vadd.f32 %v4833_v2, %v4803_v36  ;;  %v6043_v12 = vpop.f32.mrf.mxu1  ;;  %v4580_v33 = vadd.f32 %v6076_v54, %v4158_v59 }
 0x235   : > { %5615 = vst [vmem:[%s9061_s7 + $0x60] sm:$0xff] %v5587_v4   ;;  %v4159_v10 = vadd.f32 %v6043_v12, %v3481_v39  ;;  %v4767_v11 = vadd.f32 %v4766_v41, %v4576_v63  ;;  %v4578_v62 = vadd.f32 %v4535_v21, %v4156_v0  ;;  %v4538_v30 = vpop.f32.mrf.mxu0 }
 0x236   : > { %v4835_v29 = vadd.f32 %v4834_v26, %v4804_v51  ;;  %v4116_v42 = vpop.f32.mrf.mxu1  ;;  %v4809_v34 = vmul.f32 %v4580_v33, %v4580_v33 }
 0x237   : > { %v4581_v25 = vadd.f32 %v6077_v38, %v4159_v10  ;;  %v4157_v32 = vadd.f32 %v4116_v42, %v3479_v57  ;;  %v4768_v49 = vadd.f32 %v4767_v11, %v4577_v3  ;;  %v4807_v14 = vmul.f32 %v4578_v62, %v4578_v62 }
 0x238   : > { %v4836_v19 = vadd.f32 %v4835_v29, %v4805_v37 }
 0x239   : > { %v5602_v44 = vpack.c.bf16 %v4581_v25, %v4580_v33  ;;  %v4579_v7 = vadd.f32 %v4538_v30, %v4157_v32  ;;  %v4769_v28 = vadd.f32 %v4768_v49, %v4578_v62 }
 0x23a   : > { %v4837_v43 = vadd.f32 %v4836_v19, %v4806_v61 }
 0x23b   : > { %5618 = vst [vmem:[%s9061_s7 + $0x78] sm:$0xff] %v5602_v44   ;;  %v5597_v18 = vpack.c.bf16 %v4579_v7, %v4578_v62  ;;  %v4808_v8 = vmul.f32 %v4579_v7, %v4579_v7  ;;  %v4770_v13 = vadd.f32 %v4769_v28, %v4579_v7 }
 0x23c   : > { %v4838_v48 = vadd.f32 %v4837_v43, %v4807_v14 }
 0x23d   : > { %5617 = vst [vmem:[%s9061_s7 + $0x70] sm:$0xff] %v5597_v18   ;;  %v4771_v60 = vadd.f32 %v4770_v13, %v4580_v33 }
 0x23e   : > { %v4839_v55 = vadd.f32 %v4838_v48, %v4808_v8 }
 0x23f   : > { %6214 = shalt.err (!%p6211_p5)
}
 0x240   : > { %s6215_s28 = scalar_lea.hbm %s9143_s18, 2048  ;;  %s6219_s4 = scalar_lea.hbm %s9214_s2, 4096 }
 0x241   : > { %p6216_p6 = scmp.ne.s32.totalorder %s9143_s18, %s6215_s28  ;;  %p6220_p10 = scmp.lt.s32.totalorder %s9143_s18, %s9214_s2 }
 0x242   : > { %p6221_p11 = scmp.lt.s32.totalorder %s6219_s4, %s6215_s28 }
 0x243   : > { %p6217_p7 = pnand %p6216_p6, %p6373_p4 }
 0x244   : > { %p6222_p12 = por %p6221_p11, %p6220_p10 }
 0x245   : > { %p6218_p9 = pneg %p6217_p7 }
 0x247   : > { %p6223_p13 = pnand %p6222_p12, %p6218_p9 }
 0x249   : > { %6226 = shalt.err (!%p6223_p13)
}
 0x24a   : > { %s6310_s8 = smov 64   ;;  %s6311_s10 = smov 4   ;;  %v4810_v1 = vmul.f32 %v4581_v25, %v4581_v25  ;;  %v4772_v54 = vadd.f32 %v4771_v60, %v4581_v25  ;;  %v4840_v50 = vadd.f32 %v4839_v55, %v4809_v34  ;;  %v4848_v63 = vlaneseq }
 0x24b   : > { %6091 = dma.vmem_to_hbm [thread:$0]  (%p6373_p4), %s9145_s9, 2048, %s9143_s18, %s4857_s19, %s6310_s8, %s6310_s8, %s6311_s10  }
 0x24c   : > { %v4773_v9 = vrot.slane %v4772_v54, 4  ;;  %v4841_v5 = vadd.f32 %v4840_v50, %v4810_v1  ;;  %s5010_s11 = sshll.u32 %s9045_s5, 3  ;;  %v4849_v56 = vshrl.u32 %v4848_v63, 7  ;;  %s5488_s9 = sshll.u32 %s6299_s15, 7 }
 0x24d   : > { %s193_s18 = scalar_lea.vmem [#allocation4], %s5010_s11  ;;  %s4891_s26 = scalar_lea.hbm %s9215_s3, %s5488_s9 }
 0x24e   : > { %v4774_v53 = vadd.f32 %v4773_v9, %v4772_v54  ;;  %v4842_v31 = vrot.slane %v4841_v5, 4  ;;  %vm4850_vm8 = vcmp.eq.s32.totalorder %v4849_v56, 0  ;;  %vm4852_vm9 = vcmp.eq.s32.totalorder %v4849_v56, 1  ;;  %s4893_s19 = sshll.u32 %s193_s18, 4  ;;  %s4862_s27 = scalar_lea.sflag [#allocation5], %s9045_s5  ;;  %s4894_s19 = int_to_ptr.vmem [resolvable:$true] %s4893_s19 }
 0x24f   : > { %s6227_s28 = scalar_lea.vmem %s4894_s19, 128  ;;  %s6312_s29 = smov [#allocation4]  }
 0x250   : > { %v4775_v3 = vrot.slane %v4774_v53, 2  ;;  %v4843_v15 = vadd.f32 %v4842_v31, %v4841_v5  ;;  %p6228_p0 = scmp.ne.s32.totalorder %s4894_s19, %s6227_s28  ;;  %s6231_s30 = sshll.u32 %s6312_s29, 4  ;;  %s6232_s30 = int_to_ptr.vmem [resolvable:$false] %s6231_s30 }
 0x251   : > { %s6233_s15 = scalar_lea.vmem %s6232_s30, 256  ;;  %p6234_p3 = scmp.lt.s32.totalorder %s4894_s19, %s6232_s30 }
 0x252   : > { %v4776_v58 = vadd.f32 %v4775_v3, %v4774_v53  ;;  %v4844_v24 = vrot.slane %v4843_v15, 2  ;;  %p6229_p1 = pnand %p6228_p0, %p6373_p4  ;;  %p6235_p5 = scmp.lt.s32.totalorder %s6233_s15, %s6227_s28 }
 0x254   : > { %v4777_v46 = vrot.slane %v4776_v58, 1  ;;  %v4845_v21 = vadd.f32 %v4844_v24, %v4843_v15  ;;  %p6230_p2 = pneg %p6229_p1  ;;  %p6236_p6 = por %p6235_p5, %p6234_p3 }
 0x256   : > { %v4778_v6 = vadd.f32 %v4777_v46, %v4776_v58  ;;  %v4846_v40 = vrot.slane %v4845_v21, 1  ;;  %p6237_p7 = pnand %p6236_p6, %p6230_p2 }
 0x258   : > { %v4847_v47 = vadd.f32 %v4846_v40, %v4845_v21  ;;  %v4851_v27 = vsel %vm4850_vm8, %v4778_v6, 0.0 }
 0x25a   : > { %v4853_v22 = vsel %vm4852_vm9, %v4847_v47, 0.0 }
 0x25b   : > { %v4854_v17 = vadd.f32 %v4853_v22, %v4851_v27 }
 0x25d   : > { %4855 = vst [vmem:[%s193_s18] sm:$0xff] %v4854_v17 }
 0x25e   : > { %6240 = shalt.err (!%p6237_p7)
}
 0x25f   : > { %s6241_s4 = scalar_lea.hbm %s4891_s26, 128  ;;  %s6245_s7 = scalar_lea.hbm %s9215_s3, 256 }
 0x260   : > { %p6242_p9 = scmp.ne.s32.totalorder %s4891_s26, %s6241_s4  ;;  %p6246_p12 = scmp.lt.s32.totalorder %s4891_s26, %s9215_s3 }
 0x261   : > { %p6247_p13 = scmp.lt.s32.totalorder %s6245_s7, %s6241_s4 }
 0x262   : > { %p6243_p10 = pnand %p6242_p9, %p6373_p4 }
 0x263   : > { %p6248_p0 = por %p6247_p13, %p6246_p12 }
 0x264   : > { %p6244_p11 = pneg %p6243_p10 }
 0x266   : > { %p6249_p1 = pnand %p6248_p0, %p6244_p11 }
 0x268   : > { %6252 = shalt.err (!%p6249_p1)
}
 0x269   : > { %6092 = dma.vmem_to_hbm [thread:$0]  (%p6373_p4), %s4894_s19, 128, %s4891_s26, %s4862_s27  }
 0x26a PF: > { %p6102_p2 = scmp.ge.s32.totalorder %s6307_s17, 2  ;;  %s4905_s11 = sand.u32 1, %s6287_s12  }
 0x26b   : > { %s4906_s9 = scalar_lea.sflag [#allocation3], %s4905_s11 }
 0x26c   : > { %p6096_p3 = pnand %p6102_p2, %p6380_p8 }
 0x26e   : > { %p6097_p5 = pneg %p6096_p3 }
 0x270   : > { %6278 = dma.done.wait (%p6097_p5), %s4906_s9, 2048  }
 0x271   : > { %6280 = vsyncadd (%p6097_p5), %s4906_s9, 4294965248  ;;  %s4915_s18 = scalar_lea.sflag [#allocation5], %s4905_s11 }
 0x272   : > { %6282 = dma.done.wait (%p6097_p5), %s4915_s18, 128  }
 0x273   : > { %6284 = vsyncadd (%p6097_p5), %s4915_s18, 4294967168  ;;  %s20_s17 = sadd.s32 1, %s6307_s17   ;;  %s9663_s12 = smov %s6291_s13 }
 0x274   : > { %p17_p6 = scmp.ge.s32.totalorder %s20_s17, 4   ;;  %s9664_s13 = smov %s6295_s14 }
 0x275   : > { %s9665_s14 = smov %s6386_s25  ;;  %s9666_s15 = smov %s6303_s16 }
 0x276   : > { %s9667_s16 = smov %s9669_s20  ;;  %19 = sbr.rel (!%p17_p6) target bundleno = 6 (0x6), region = 91 }
 0x27b   :  { %4920 = vsyncpa [#allocation3], 1 }
 0x27c   :  { %4922 = vsyncpa [#allocation3 + $0x1], 1 }
 0x27d   :  { %4923 = vsyncpa [#allocation5], 1 }
 0x27e   :  { %4925 = vsyncpa [#allocation5 + $0x1], 1 }

</bundles_post_ra>
